<compile_context>
chip_gen: v6e
topology: v6e:2x2x1
jax: 0.10.0
libtpu: 0.0.40
codegen_flags: <defaults>
</compile_context>

<pallas_src>
import jax
import jax.numpy as jnp
from jax import lax
from jax.experimental import pallas as pl
from jax.experimental.pallas import tpu as pltpu

H1 = 50        # lstm_1 hidden size (per direction)
H2 = 1         # lstm_2 hidden size (per direction)
HP = 64        # per-direction padded gate / hidden width (lane pad)
P = 2 * HP     # 128: one fwd|bwd "pair" = one vreg of lanes
GW = 4 * P     # 512: packed gate width (4 gates x fwd|bwd pair)


# --------------------------------------------------------------------------------------
# Fused decoder kernel
# --------------------------------------------------------------------------------------
def _decoder_kernel(x_ref, w1x_ref, b1_ref, w1h_ref,
                    w2a_ref, w2b_ref, b2_ref, w2h_ref,
                    out_ref, s1_ref, ga_ref, gb_ref):
    """Packed layouts (see pack_decoder_params):

    gates vector (width GW=512) is laid out as [i_f i_b | f_f f_b | g_f g_b | o_f o_b],
    each sub-block HP=64 lanes wide, so every gate pair is a 128-lane-aligned slice and the
    concatenated hidden/cell state [h_f | h_b] is a single (B, 128) slab.

    s1_ref[s*B:(s+1)*B, :]  holds the layer-1 state of loop iteration s:
        lanes [0:HP)   = h1_fwd(t = s)
        lanes [HP:2HP) = h1_bwd(t = T-1-s)
    ga/gb are the two halves of the layer-2 input projection; the layer-2 gate input at
    iteration u is ga[u] + gb[T-1-u]  (time alignment handled by the weight packing).
    """
    B = x_ref.shape[0]          # padded batch (multiple of 8)
    T = out_ref.shape[1]        # static seq_len

    def cell(gx, h, c, whh):
        # One biLSTM step for BOTH directions: single MXU matmul on the concatenated state.
        gates = gx + jnp.dot(h, whh, preferred_element_type=jnp.float32)
        i = jax.nn.sigmoid(gates[:, 0 * P:1 * P])
        f = jax.nn.sigmoid(gates[:, 1 * P:2 * P])
        g = jnp.tanh(gates[:, 2 * P:3 * P])
        o = jax.nn.sigmoid(gates[:, 3 * P:4 * P])
        c_new = f * c + i * g
        h_new = o * jnp.tanh(c_new)
        return h_new, c_new

    # ---------------- layer 1: hoisted (time-invariant) input projection ----------------
    gx1 = jnp.dot(x_ref[...], w1x_ref[...],
                  preferred_element_type=jnp.float32) + b1_ref[...]        # (B, 512), once
    w1h = w1h_ref[...]                                                     # (128, 512)

    h1 = jnp.zeros((B, P), jnp.float32)
    c1 = jnp.zeros((B, P), jnp.float32)
    for s in range(T):                       # fully unrolled; fwd handles t=s, bwd t=T-1-s
        h1, c1 = cell(gx1, h1, c1, w1h)
        s1_ref[s * B:(s + 1) * B, :] = h1    # full unmasked (8,128) store

    # ---------------- layer 2: batched input projection over all time steps -------------
    s1_all = s1_ref[...]                                                   # (T*B, 128)
    ga_ref[...] = jnp.dot(s1_all, w2a_ref[...],
                          preferred_element_type=jnp.float32) + b2_ref[...]
    gb_ref[...] = jnp.dot(s1_all, w2b_ref[...],
                          preferred_element_type=jnp.float32)

    w2h = w2h_ref[...]                                                     # (128, 512)
    h2 = jnp.zeros((B, P), jnp.float32)
    c2 = jnp.zeros((B, P), jnp.float32)
    cols_f = [None] * T
    cols_b = [None] * T
    for u in range(T):                       # fully unrolled
        gx2 = ga_ref[u * B:(u + 1) * B, :] + gb_ref[(T - 1 - u) * B:(T - u) * B, :]
        h2, c2 = cell(gx2, h2, c2, w2h)
        cols_f[u] = h2[:, 0:1]               # layer-2 fwd hidden at time u
        cols_b[T - 1 - u] = h2[:, HP:HP + 1]  # layer-2 bwd hidden at time T-1-u

    # Final output: out[b, t] = h2_fwd(t) + h2_bwd(t)   (== torch.sum(outputs, dim=-1))
    for t in range(T):
        out_ref[:, t:t + 1] = cols_f[t] + cols_b[t]


# --------------------------------------------------------------------------------------
# Wrapper
# --------------------------------------------------------------------------------------
def decoder_forward(x, packed, seq_len):
    """x: (B, 1, E) -> (B, 1, seq_len), matching Decoder.forward."""
    B, one, E = x.shape
    assert one == 1
    T = int(seq_len)
    B_pad = max(8, -(-B // 8) * 8)

    x2d = jnp.zeros((B_pad, E), jnp.float32).at[:B, :].set(x[:, 0, :].astype(jnp.float32))

    vm = pl.BlockSpec(memory_space=pltpu.MemorySpace.VMEM)
    out = pl.pallas_call(
        _decoder_kernel,
        out_shape=jax.ShapeDtypeStruct((B_pad, T), jnp.float32),
        in_specs=[vm] * 8,
        out_specs=vm,
        scratch_shapes=[
            pltpu.VMEM((T * B_pad, P), jnp.float32),    # layer-1 states (time-major slabs)
            pltpu.VMEM((T * B_pad, GW), jnp.float32),   # layer-2 input-gates, part A
            pltpu.VMEM((T * B_pad, GW), jnp.float32),   # layer-2 input-gates, part B
        ],
    )(x2d, packed["w1x"], packed["b1"], packed["w1h"],
      packed["w2a"], packed["w2b"], packed["b2"], packed["w2h"])

    return out[:B, None, :]                  # (B, 1, T)


# --------------------------------------------------------------------------------------
# Parameter packing (PyTorch layout -> kernel layout)
# --------------------------------------------------------------------------------------
def _pack_bilstm(w_ih_f, w_hh_f, b_f, w_ih_b, w_hh_b, b_b, H):
    """Pack one biLSTM layer into the interleaved [i_f i_b | f_f f_b | g_f g_b | o_f o_b]
    column layout (each sub-block padded to HP lanes).

    w_ih_*: (4H, Din), w_hh_*: (4H, H) in PyTorch layout; b_* = bias_ih + bias_hh, (4H,).
    Returns wx: (Din, GW), b: (1, GW), wh: (2*HP, GW) block-diagonal over directions.
    """
    Din = w_ih_f.shape[1]
    wx = jnp.zeros((Din, GW), jnp.float32)
    b = jnp.zeros((GW,), jnp.float32)
    wh = jnp.zeros((P, GW), jnp.float32)
    for g in range(4):
        cf, cb = g * P, g * P + HP
        wx = wx.at[:, cf:cf + H].set(w_ih_f[g * H:(g + 1) * H, :].T)
        wx = wx.at[:, cb:cb + H].set(w_ih_b[g * H:(g + 1) * H, :].T)
        b = b.at[cf:cf + H].set(b_f[g * H:(g + 1) * H])
        b = b.at[cb:cb + H].set(b_b[g * H:(g + 1) * H])
        wh = wh.at[0:H, cf:cf + H].set(w_hh_f[g * H:(g + 1) * H, :].T)
        wh = wh.at[HP:HP + H, cb:cb + H].set(w_hh_b[g * H:(g + 1) * H, :].T)
    return wx, b[None, :], wh


def _pack_layer2_input(w_ih_f, w_ih_b):
    """Layer-2 input projections consuming the layer-1 raw iteration slabs.

    The layer-1 slab at loop index s holds [h1_fwd(s) | h1_bwd(T-1-s)].  With
    gates_at_iter(u) = slab[u] @ w2a + slab[T-1-u] @ w2b, both layer-2 directions get their
    correctly time-aligned [h1_fwd(t) | h1_bwd(t)] input.
    w_ih_*: (4, 2*H1) PyTorch layout (hidden_size = 1).
    """
    w2a = jnp.zeros((P, GW), jnp.float32)
    w2b = jnp.zeros((P, GW), jnp.float32)
    for g in range(4):
        cf, cb = g * P, g * P + HP          # valid column of each gate (H2 == 1)
        # fwd-direction cell at time u: h1_fwd(u) from slab[u], h1_bwd(u) from slab[T-1-u]
        w2a = w2a.at[0:H1, cf].set(w_ih_f[g, 0:H1])
        w2b = w2b.at[HP:HP + H1, cf].set(w_ih_f[g, H1:2 * H1])
        # bwd-direction cell at time T-1-u: h1_fwd(T-1-u) from slab[T-1-u], h1_bwd(T-1-u) from slab[u]
        w2b = w2b.at[0:H1, cb].set(w_ih_b[g, 0:H1])
        w2a = w2a.at[HP:HP + H1, cb].set(w_ih_b[g, H1:2 * H1])
    return w2a, w2b


def pack_decoder_params(raw):
    l1, l2 = raw["l1"], raw["l2"]
    w1x, b1, w1h = _pack_bilstm(
        l1["w_ih_f"], l1["w_hh_f"], l1["b_ih_f"] + l1["b_hh_f"],
        l1["w_ih_b"], l1["w_hh_b"], l1["b_ih_b"] + l1["b_hh_b"], H=H1)

    w2a, w2b = _pack_layer2_input(l2["w_ih_f"], l2["w_ih_b"])

    b2 = jnp.zeros((GW,), jnp.float32)
    w2h = jnp.zeros((P, GW), jnp.float32)
    bf = l2["b_ih_f"] + l2["b_hh_f"]
    bb = l2["b_ih_b"] + l2["b_hh_b"]
    for g in range(4):
        cf, cb = g * P, g * P + HP
        b2 = b2.at[cf].set(bf[g])
        b2 = b2.at[cb].set(bb[g])
        w2h = w2h.at[0, cf].set(l2["w_hh_f"][g, 0])
        w2h = w2h.at[HP, cb].set(l2["w_hh_b"][g, 0])

    return {"w1x": w1x, "b1": b1, "w1h": w1h,
            "w2a": w2a, "w2b": w2b, "b2": b2[None, :], "w2h": w2h}


# --------------------------------------------------------------------------------------
# PyTorch-equivalent init + pure-JAX reference (for correctness check)
# --------------------------------------------------------------------------------------
def _init_lstm_dir(key, din, h):
    k = 1.0 / float(h) ** 0.5
    ks = jax.random.split(key, 4)
    u = lambda kk, shape: jax.random.uniform(kk, shape, jnp.float32, minval=-k, maxval=k)
    return {"w_ih": u(ks[0], (4 * h, din)), "w_hh": u(ks[1], (4 * h, h)),
            "b_ih": u(ks[2], (4 * h,)), "b_hh": u(ks[3], (4 * h,))}


def _init_bilstm(key, din, h):
    kf, kb = jax.random.split(key)
    f, b = _init_lstm_dir(kf, din, h), _init_lstm_dir(kb, din, h)
    return {"w_ih_f": f["w_ih"], "w_hh_f": f["w_hh"], "b_ih_f": f["b_ih"], "b_hh_f": f["b_hh"],
            "w_ih_b": b["w_ih"], "w_hh_b": b["w_hh"], "b_ih_b": b["b_ih"], "b_hh_b": b["b_hh"]}


def init_decoder_params(key, embedding_dim):
    k1, k2 = jax.random.split(key)
    return {"l1": _init_bilstm(k1, embedding_dim, H1),
            "l2": _init_bilstm(k2, 2 * H1, H2)}


def _lstm_dir_ref(x_tbd, w_ih, w_hh, b_ih, b_hh, reverse):
    H = w_hh.shape[1]
    Bn = x_tbd.shape[1]
    hi = jax.lax.Precision.HIGHEST

    def step(carry, x_t):
        h, c = carry
        gates = (jnp.dot(x_t, w_ih.T, precision=hi)
                 + jnp.dot(h, w_hh.T, precision=hi) + b_ih + b_hh)
        i = jax.nn.sigmoid(gates[:, 0 * H:1 * H])
        f = jax.nn.sigmoid(gates[:, 1 * H:2 * H])
        g = jnp.tanh(gates[:, 2 * H:3 * H])
        o = jax.nn.sigmoid(gates[:, 3 * H:4 * H])
        c = f * c + i * g
        h = o * jnp.tanh(c)
        return (h, c), h

    init = (jnp.zeros((Bn, H), jnp.float32), jnp.zeros((Bn, H), jnp.float32))
    _, hs = lax.scan(step, init, x_tbd, reverse=reverse)
    return hs                                             # (T, B, H), time order


def _bilstm_ref(x_tbd, p):
    hf = _lstm_dir_ref(x_tbd, p["w_ih_f"], p["w_hh_f"], p["b_ih_f"], p["b_hh_f"], reverse=False)
    hb = _lstm_dir_ref(x_tbd, p["w_ih_b"], p["w_hh_b"], p["b_ih_b"], p["b_hh_b"], reverse=True)
    return jnp.concatenate([hf, hb], axis=-1)


def decoder_reference(x, raw, seq_len):
    B, _, E = x.shape
    x_tbd = jnp.broadcast_to(x[:, 0, :][None], (seq_len, B, E)).astype(jnp.float32)
    y1 = _bilstm_ref(x_tbd, raw["l1"])                    # (T, B, 100)
    y2 = _bilstm_ref(y1, raw["l2"])                       # (T, B, 2)
    out = jnp.sum(y2, axis=-1)                            # (T, B)
    return jnp.transpose(out, (1, 0))[:, None, :]         # (B, 1, T)


# --------------------------------------------------------------------------------------
if __name__ == "__main__":
    key = jax.random.PRNGKey(0)
    B, E, T = 2, 8, 8                                     # batch, embedding_dim, seq_len

    raw = init_decoder_params(key, embedding_dim=E)
    packed = pack_decoder_params(raw)
    x = jax.random.normal(jax.random.fold_in(key, 123), (B, 1, E), jnp.float32)

    run = jax.jit(decoder_forward, static_argnums=2)
    out = jax.block_until_ready(run(x, packed, T))
    assert out.shape == (B, 1, T), out.shape
    assert bool(jnp.all(jnp.isfinite(out)))

    ref = jax.block_until_ready(decoder_reference(x, raw, T))
    max_err = float(jnp.max(jnp.abs(out - ref)))
    assert max_err < 2e-2, f"kernel/reference mismatch, max abs err = {max_err}"

    print("KERNEL_OK")
</pallas_src>

<mosaic_0001>
module attributes {stable_mosaic.version = 11 : i64} {
  func.func @_decoder_kernel(%arg0: memref<8x8xf32, #tpu.memory_space<vmem>>, %arg1: memref<8x512xf32, #tpu.memory_space<vmem>>, %arg2: memref<1x512xf32, #tpu.memory_space<vmem>>, %arg3: memref<128x512xf32, #tpu.memory_space<vmem>>, %arg4: memref<128x512xf32, #tpu.memory_space<vmem>>, %arg5: memref<128x512xf32, #tpu.memory_space<vmem>>, %arg6: memref<1x512xf32, #tpu.memory_space<vmem>>, %arg7: memref<128x512xf32, #tpu.memory_space<vmem>>, %arg8: memref<8x8xf32, #tpu.memory_space<vmem>>, %arg9: memref<64x128xf32, #tpu.memory_space<vmem>>, %arg10: memref<64x512xf32, #tpu.memory_space<vmem>>, %arg11: memref<64x512xf32, #tpu.memory_space<vmem>>) attributes {dimension_semantics = [], scalar_prefetch = 0 : i64, scratch_operands = 3 : i64, tpu.core_type = #tpu.core_type<tc>} {
    %c0 = arith.constant 0 : index
    %c0_0 = arith.constant 0 : index
    %0 = vector.load %arg0[%c0, %c0_0] : memref<8x8xf32, #tpu.memory_space<vmem>>, vector<8x8xf32>
    %c0_1 = arith.constant 0 : index
    %c0_2 = arith.constant 0 : index
    %1 = vector.load %arg1[%c0_1, %c0_2] : memref<8x512xf32, #tpu.memory_space<vmem>>, vector<8x512xf32>
    %cst = arith.constant dense<0.000000e+00> : vector<8x512xf32>
    %2 = tpu.matmul %0, %1, %cst {dimension_numbers = #tpu.dot_dimension_numbers<[1], [0], [0], [1], [0, 0, 1, 1], [], []>} : vector<8x8xf32>, vector<8x512xf32>, vector<8x512xf32> -> vector<8x512xf32>
    %c0_3 = arith.constant 0 : index
    %c0_4 = arith.constant 0 : index
    %3 = vector.load %arg2[%c0_3, %c0_4] : memref<1x512xf32, #tpu.memory_space<vmem>>, vector<1x512xf32>
    %4 = vector.broadcast %3 : vector<1x512xf32> to vector<8x512xf32>
    %5 = arith.addf %2, %4 : vector<8x512xf32>
    %c0_5 = arith.constant 0 : index
    %c0_6 = arith.constant 0 : index
    %6 = vector.load %arg3[%c0_5, %c0_6] : memref<128x512xf32, #tpu.memory_space<vmem>>, vector<128x512xf32>
    %cst_7 = arith.constant 0.000000e+00 : f32
    %7 = vector.broadcast %cst_7 : f32 to vector<8x128xf32>
    %cst_8 = arith.constant 0.000000e+00 : f32
    %8 = vector.broadcast %cst_8 : f32 to vector<8x128xf32>
    %cst_9 = arith.constant dense<0.000000e+00> : vector<8x512xf32>
    %9 = tpu.matmul %7, %6, %cst_9 {dimension_numbers = #tpu.dot_dimension_numbers<[1], [0], [0], [1], [0, 0, 1, 1], [], []>} : vector<8x128xf32>, vector<128x512xf32>, vector<8x512xf32> -> vector<8x512xf32>
    %10 = arith.addf %5, %9 : vector<8x512xf32>
    %11 = vector.extract_strided_slice %10 {offsets = [0, 0], sizes = [8, 128], strides = [1, 1]} : vector<8x512xf32> to vector<8x128xf32>
    %12 = arith.negf %11 : vector<8x128xf32>
    %13 = math.exp %12 : vector<8x128xf32>
    %cst_10 = arith.constant 1.000000e+00 : f32
    %14 = vector.broadcast %cst_10 : f32 to vector<8x128xf32>
    %15 = arith.addf %14, %13 : vector<8x128xf32>
    %16 = arith.divf %14, %15 : vector<8x128xf32>
    %17 = vector.extract_strided_slice %10 {offsets = [0, 128], sizes = [8, 128], strides = [1, 1]} : vector<8x512xf32> to vector<8x128xf32>
    %18 = arith.negf %17 : vector<8x128xf32>
    %19 = math.exp %18 : vector<8x128xf32>
    %cst_11 = arith.constant 1.000000e+00 : f32
    %20 = vector.broadcast %cst_11 : f32 to vector<8x128xf32>
    %21 = arith.addf %20, %19 : vector<8x128xf32>
    %22 = arith.divf %20, %21 : vector<8x128xf32>
    %23 = vector.extract_strided_slice %10 {offsets = [0, 256], sizes = [8, 128], strides = [1, 1]} : vector<8x512xf32> to vector<8x128xf32>
    %24 = math.tanh %23 : vector<8x128xf32>
    %25 = vector.extract_strided_slice %10 {offsets = [0, 384], sizes = [8, 128], strides = [1, 1]} : vector<8x512xf32> to vector<8x128xf32>
    %26 = arith.negf %25 : vector<8x128xf32>
    %27 = math.exp %26 : vector<8x128xf32>
    %cst_12 = arith.constant 1.000000e+00 : f32
    %28 = vector.broadcast %cst_12 : f32 to vector<8x128xf32>
    %29 = arith.addf %28, %27 : vector<8x128xf32>
    %30 = arith.divf %28, %29 : vector<8x128xf32>
    %31 = arith.mulf %22, %8 : vector<8x128xf32>
    %32 = arith.mulf %16, %24 : vector<8x128xf32>
    %33 = arith.addf %31, %32 : vector<8x128xf32>
    %34 = math.tanh %33 : vector<8x128xf32>
    %35 = arith.mulf %30, %34 : vector<8x128xf32>
    %c0_13 = arith.constant 0 : index
    %c0_14 = arith.constant 0 : index
    %36 = vector.load %arg9[%c0_13, %c0_14] : memref<64x128xf32, #tpu.memory_space<vmem>>, vector<8x128xf32>
    tpu.vector_store %arg9[%c0_13, %c0_14], %35 {strides = array<i32>} : memref<64x128xf32, #tpu.memory_space<vmem>>, vector<8x128xf32>,
    %cst_15 = arith.constant dense<0.000000e+00> : vector<8x512xf32>
    %37 = tpu.matmul %35, %6, %cst_15 {dimension_numbers = #tpu.dot_dimension_numbers<[1], [0], [0], [1], [0, 0, 1, 1], [], []>} : vector<8x128xf32>, vector<128x512xf32>, vector<8x512xf32> -> vector<8x512xf32>
    %38 = arith.addf %5, %37 : vector<8x512xf32>
    %39 = vector.extract_strided_slice %38 {offsets = [0, 0], sizes = [8, 128], strides = [1, 1]} : vector<8x512xf32> to vector<8x128xf32>
    %40 = arith.negf %39 : vector<8x128xf32>
    %41 = math.exp %40 : vector<8x128xf32>
    %cst_16 = arith.constant 1.000000e+00 : f32
    %42 = vector.broadcast %cst_16 : f32 to vector<8x128xf32>
    %43 = arith.addf %42, %41 : vector<8x128xf32>
    %44 = arith.divf %42, %43 : vector<8x128xf32>
    %45 = vector.extract_strided_slice %38 {offsets = [0, 128], sizes = [8, 128], strides = [1, 1]} : vector<8x512xf32> to vector<8x128xf32>
    %46 = arith.negf %45 : vector<8x128xf32>
    %47 = math.exp %46 : vector<8x128xf32>
    %cst_17 = arith.constant 1.000000e+00 : f32
    %48 = vector.broadcast %cst_17 : f32 to vector<8x128xf32>
    %49 = arith.addf %48, %47 : vector<8x128xf32>
    %50 = arith.divf %48, %49 : vector<8x128xf32>
    %51 = vector.extract_strided_slice %38 {offsets = [0, 256], sizes = [8, 128], strides = [1, 1]} : vector<8x512xf32> to vector<8x128xf32>
    %52 = math.tanh %51 : vector<8x128xf32>
    %53 = vector.extract_strided_slice %38 {offsets = [0, 384], sizes = [8, 128], strides = [1, 1]} : vector<8x512xf32> to vector<8x128xf32>
    %54 = arith.negf %53 : vector<8x128xf32>
    %55 = math.exp %54 : vector<8x128xf32>
    %cst_18 = arith.constant 1.000000e+00 : f32
    %56 = vector.broadcast %cst_18 : f32 to vector<8x128xf32>
    %57 = arith.addf %56, %55 : vector<8x128xf32>
    %58 = arith.divf %56, %57 : vector<8x128xf32>
    %59 = arith.mulf %50, %33 : vector<8x128xf32>
    %60 = arith.mulf %44, %52 : vector<8x128xf32>
    %61 = arith.addf %59, %60 : vector<8x128xf32>
    %62 = math.tanh %61 : vector<8x128xf32>
    %63 = arith.mulf %58, %62 : vector<8x128xf32>
    %c8 = arith.constant 8 : index
    %c0_19 = arith.constant 0 : index
    %64 = vector.load %arg9[%c8, %c0_19] : memref<64x128xf32, #tpu.memory_space<vmem>>, vector<8x128xf32>
    tpu.vector_store %arg9[%c8, %c0_19], %63 {strides = array<i32>} : memref<64x128xf32, #tpu.memory_space<vmem>>, vector<8x128xf32>,
    %cst_20 = arith.constant dense<0.000000e+00> : vector<8x512xf32>
    %65 = tpu.matmul %63, %6, %cst_20 {dimension_numbers = #tpu.dot_dimension_numbers<[1], [0], [0], [1], [0, 0, 1, 1], [], []>} : vector<8x128xf32>, vector<128x512xf32>, vector<8x512xf32> -> vector<8x512xf32>
    %66 = arith.addf %5, %65 : vector<8x512xf32>
    %67 = vector.extract_strided_slice %66 {offsets = [0, 0], sizes = [8, 128], strides = [1, 1]} : vector<8x512xf32> to vector<8x128xf32>
    %68 = arith.negf %67 : vector<8x128xf32>
    %69 = math.exp %68 : vector<8x128xf32>
    %cst_21 = arith.constant 1.000000e+00 : f32
    %70 = vector.broadcast %cst_21 : f32 to vector<8x128xf32>
    %71 = arith.addf %70, %69 : vector<8x128xf32>
    %72 = arith.divf %70, %71 : vector<8x128xf32>
    %73 = vector.extract_strided_slice %66 {offsets = [0, 128], sizes = [8, 128], strides = [1, 1]} : vector<8x512xf32> to vector<8x128xf32>
    %74 = arith.negf %73 : vector<8x128xf32>
    %75 = math.exp %74 : vector<8x128xf32>
    %cst_22 = arith.constant 1.000000e+00 : f32
    %76 = vector.broadcast %cst_22 : f32 to vector<8x128xf32>
    %77 = arith.addf %76, %75 : vector<8x128xf32>
    %78 = arith.divf %76, %77 : vector<8x128xf32>
    %79 = vector.extract_strided_slice %66 {offsets = [0, 256], sizes = [8, 128], strides = [1, 1]} : vector<8x512xf32> to vector<8x128xf32>
    %80 = math.tanh %79 : vector<8x128xf32>
    %81 = vector.extract_strided_slice %66 {offsets = [0, 384], sizes = [8, 128], strides = [1, 1]} : vector<8x512xf32> to vector<8x128xf32>
    %82 = arith.negf %81 : vector<8x128xf32>
    %83 = math.exp %82 : vector<8x128xf32>
    %cst_23 = arith.constant 1.000000e+00 : f32
    %84 = vector.broadcast %cst_23 : f32 to vector<8x128xf32>
    %85 = arith.addf %84, %83 : vector<8x128xf32>
    %86 = arith.divf %84, %85 : vector<8x128xf32>
    %87 = arith.mulf %78, %61 : vector<8x128xf32>
    %88 = arith.mulf %72, %80 : vector<8x128xf32>
    %89 = arith.addf %87, %88 : vector<8x128xf32>
    %90 = math.tanh %89 : vector<8x128xf32>
    %91 = arith.mulf %86, %90 : vector<8x128xf32>
    %c16 = arith.constant 16 : index
    %c0_24 = arith.constant 0 : index
    %92 = vector.load %arg9[%c16, %c0_24] : memref<64x128xf32, #tpu.memory_space<vmem>>, vector<8x128xf32>
    tpu.vector_store %arg9[%c16, %c0_24], %91 {strides = array<i32>} : memref<64x128xf32, #tpu.memory_space<vmem>>, vector<8x128xf32>,
    %cst_25 = arith.constant dense<0.000000e+00> : vector<8x512xf32>
    %93 = tpu.matmul %91, %6, %cst_25 {dimension_numbers = #tpu.dot_dimension_numbers<[1], [0], [0], [1], [0, 0, 1, 1], [], []>} : vector<8x128xf32>, vector<128x512xf32>, vector<8x512xf32> -> vector<8x512xf32>
    %94 = arith.addf %5, %93 : vector<8x512xf32>
    %95 = vector.extract_strided_slice %94 {offsets = [0, 0], sizes = [8, 128], strides = [1, 1]} : vector<8x512xf32> to vector<8x128xf32>
    %96 = arith.negf %95 : vector<8x128xf32>
    %97 = math.exp %96 : vector<8x128xf32>
    %cst_26 = arith.constant 1.000000e+00 : f32
    %98 = vector.broadcast %cst_26 : f32 to vector<8x128xf32>
    %99 = arith.addf %98, %97 : vector<8x128xf32>
    %100 = arith.divf %98, %99 : vector<8x128xf32>
    %101 = vector.extract_strided_slice %94 {offsets = [0, 128], sizes = [8, 128], strides = [1, 1]} : vector<8x512xf32> to vector<8x128xf32>
    %102 = arith.negf %101 : vector<8x128xf32>
    %103 = math.exp %102 : vector<8x128xf32>
    %cst_27 = arith.constant 1.000000e+00 : f32
    %104 = vector.broadcast %cst_27 : f32 to vector<8x128xf32>
    %105 = arith.addf %104, %103 : vector<8x128xf32>
    %106 = arith.divf %104, %105 : vector<8x128xf32>
    %107 = vector.extract_strided_slice %94 {offsets = [0, 256], sizes = [8, 128], strides = [1, 1]} : vector<8x512xf32> to vector<8x128xf32>
    %108 = math.tanh %107 : vector<8x128xf32>
    %109 = vector.extract_strided_slice %94 {offsets = [0, 384], sizes = [8, 128], strides = [1, 1]} : vector<8x512xf32> to vector<8x128xf32>
    %110 = arith.negf %109 : vector<8x128xf32>
    %111 = math.exp %110 : vector<8x128xf32>
    %cst_28 = arith.constant 1.000000e+00 : f32
    %112 = vector.broadcast %cst_28 : f32 to vector<8x128xf32>
    %113 = arith.addf %112, %111 : vector<8x128xf32>
    %114 = arith.divf %112, %113 : vector<8x128xf32>
    %115 = arith.mulf %106, %89 : vector<8x128xf32>
    %116 = arith.mulf %100, %108 : vector<8x128xf32>
    %117 = arith.addf %115, %116 : vector<8x128xf32>
    %118 = math.tanh %117 : vector<8x128xf32>
    %119 = arith.mulf %114, %118 : vector<8x128xf32>
    %c24 = arith.constant 24 : index
    %c0_29 = arith.constant 0 : index
    %120 = vector.load %arg9[%c24, %c0_29] : memref<64x128xf32, #tpu.memory_space<vmem>>, vector<8x128xf32>
    tpu.vector_store %arg9[%c24, %c0_29], %119 {strides = array<i32>} : memref<64x128xf32, #tpu.memory_space<vmem>>, vector<8x128xf32>,
    %cst_30 = arith.constant dense<0.000000e+00> : vector<8x512xf32>
    %121 = tpu.matmul %119, %6, %cst_30 {dimension_numbers = #tpu.dot_dimension_numbers<[1], [0], [0], [1], [0, 0, 1, 1], [], []>} : vector<8x128xf32>, vector<128x512xf32>, vector<8x512xf32> -> vector<8x512xf32>
    %122 = arith.addf %5, %121 : vector<8x512xf32>
    %123 = vector.extract_strided_slice %122 {offsets = [0, 0], sizes = [8, 128], strides = [1, 1]} : vector<8x512xf32> to vector<8x128xf32>
    %124 = arith.negf %123 : vector<8x128xf32>
    %125 = math.exp %124 : vector<8x128xf32>
    %cst_31 = arith.constant 1.000000e+00 : f32
    %126 = vector.broadcast %cst_31 : f32 to vector<8x128xf32>
    %127 = arith.addf %126, %125 : vector<8x128xf32>
    %128 = arith.divf %126, %127 : vector<8x128xf32>
    %129 = vector.extract_strided_slice %122 {offsets = [0, 128], sizes = [8, 128], strides = [1, 1]} : vector<8x512xf32> to vector<8x128xf32>
    %130 = arith.negf %129 : vector<8x128xf32>
    %131 = math.exp %130 : vector<8x128xf32>
    %cst_32 = arith.constant 1.000000e+00 : f32
    %132 = vector.broadcast %cst_32 : f32 to vector<8x128xf32>
    %133 = arith.addf %132, %131 : vector<8x128xf32>
    %134 = arith.divf %132, %133 : vector<8x128xf32>
    %135 = vector.extract_strided_slice %122 {offsets = [0, 256], sizes = [8, 128], strides = [1, 1]} : vector<8x512xf32> to vector<8x128xf32>
    %136 = math.tanh %135 : vector<8x128xf32>
    %137 = vector.extract_strided_slice %122 {offsets = [0, 384], sizes = [8, 128], strides = [1, 1]} : vector<8x512xf32> to vector<8x128xf32>
    %138 = arith.negf %137 : vector<8x128xf32>
    %139 = math.exp %138 : vector<8x128xf32>
    %cst_33 = arith.constant 1.000000e+00 : f32
    %140 = vector.broadcast %cst_33 : f32 to vector<8x128xf32>
    %141 = arith.addf %140, %139 : vector<8x128xf32>
    %142 = arith.divf %140, %141 : vector<8x128xf32>
    %143 = arith.mulf %134, %117 : vector<8x128xf32>
    %144 = arith.mulf %128, %136 : vector<8x128xf32>
    %145 = arith.addf %143, %144 : vector<8x128xf32>
    %146 = math.tanh %145 : vector<8x128xf32>
    %147 = arith.mulf %142, %146 : vector<8x128xf32>
    %c32 = arith.constant 32 : index
    %c0_34 = arith.constant 0 : index
    %148 = vector.load %arg9[%c32, %c0_34] : memref<64x128xf32, #tpu.memory_space<vmem>>, vector<8x128xf32>
    tpu.vector_store %arg9[%c32, %c0_34], %147 {strides = array<i32>} : memref<64x128xf32, #tpu.memory_space<vmem>>, vector<8x128xf32>,
    %cst_35 = arith.constant dense<0.000000e+00> : vector<8x512xf32>
    %149 = tpu.matmul %147, %6, %cst_35 {dimension_numbers = #tpu.dot_dimension_numbers<[1], [0], [0], [1], [0, 0, 1, 1], [], []>} : vector<8x128xf32>, vector<128x512xf32>, vector<8x512xf32> -> vector<8x512xf32>
    %150 = arith.addf %5, %149 : vector<8x512xf32>
    %151 = vector.extract_strided_slice %150 {offsets = [0, 0], sizes = [8, 128], strides = [1, 1]} : vector<8x512xf32> to vector<8x128xf32>
    %152 = arith.negf %151 : vector<8x128xf32>
    %153 = math.exp %152 : vector<8x128xf32>
    %cst_36 = arith.constant 1.000000e+00 : f32
    %154 = vector.broadcast %cst_36 : f32 to vector<8x128xf32>
    %155 = arith.addf %154, %153 : vector<8x128xf32>
    %156 = arith.divf %154, %155 : vector<8x128xf32>
    %157 = vector.extract_strided_slice %150 {offsets = [0, 128], sizes = [8, 128], strides = [1, 1]} : vector<8x512xf32> to vector<8x128xf32>
    %158 = arith.negf %157 : vector<8x128xf32>
    %159 = math.exp %158 : vector<8x128xf32>
    %cst_37 = arith.constant 1.000000e+00 : f32
    %160 = vector.broadcast %cst_37 : f32 to vector<8x128xf32>
    %161 = arith.addf %160, %159 : vector<8x128xf32>
    %162 = arith.divf %160, %161 : vector<8x128xf32>
    %163 = vector.extract_strided_slice %150 {offsets = [0, 256], sizes = [8, 128], strides = [1, 1]} : vector<8x512xf32> to vector<8x128xf32>
    %164 = math.tanh %163 : vector<8x128xf32>
    %165 = vector.extract_strided_slice %150 {offsets = [0, 384], sizes = [8, 128], strides = [1, 1]} : vector<8x512xf32> to vector<8x128xf32>
    %166 = arith.negf %165 : vector<8x128xf32>
    %167 = math.exp %166 : vector<8x128xf32>
    %cst_38 = arith.constant 1.000000e+00 : f32
    %168 = vector.broadcast %cst_38 : f32 to vector<8x128xf32>
    %169 = arith.addf %168, %167 : vector<8x128xf32>
    %170 = arith.divf %168, %169 : vector<8x128xf32>
    %171 = arith.mulf %162, %145 : vector<8x128xf32>
    %172 = arith.mulf %156, %164 : vector<8x128xf32>
    %173 = arith.addf %171, %172 : vector<8x128xf32>
    %174 = math.tanh %173 : vector<8x128xf32>
    %175 = arith.mulf %170, %174 : vector<8x128xf32>
    %c40 = arith.constant 40 : index
    %c0_39 = arith.constant 0 : index
    %176 = vector.load %arg9[%c40, %c0_39] : memref<64x128xf32, #tpu.memory_space<vmem>>, vector<8x128xf32>
    tpu.vector_store %arg9[%c40, %c0_39], %175 {strides = array<i32>} : memref<64x128xf32, #tpu.memory_space<vmem>>, vector<8x128xf32>,
    %cst_40 = arith.constant dense<0.000000e+00> : vector<8x512xf32>
    %177 = tpu.matmul %175, %6, %cst_40 {dimension_numbers = #tpu.dot_dimension_numbers<[1], [0], [0], [1], [0, 0, 1, 1], [], []>} : vector<8x128xf32>, vector<128x512xf32>, vector<8x512xf32> -> vector<8x512xf32>
    %178 = arith.addf %5, %177 : vector<8x512xf32>
    %179 = vector.extract_strided_slice %178 {offsets = [0, 0], sizes = [8, 128], strides = [1, 1]} : vector<8x512xf32> to vector<8x128xf32>
    %180 = arith.negf %179 : vector<8x128xf32>
    %181 = math.exp %180 : vector<8x128xf32>
    %cst_41 = arith.constant 1.000000e+00 : f32
    %182 = vector.broadcast %cst_41 : f32 to vector<8x128xf32>
    %183 = arith.addf %182, %181 : vector<8x128xf32>
    %184 = arith.divf %182, %183 : vector<8x128xf32>
    %185 = vector.extract_strided_slice %178 {offsets = [0, 128], sizes = [8, 128], strides = [1, 1]} : vector<8x512xf32> to vector<8x128xf32>
    %186 = arith.negf %185 : vector<8x128xf32>
    %187 = math.exp %186 : vector<8x128xf32>
    %cst_42 = arith.constant 1.000000e+00 : f32
    %188 = vector.broadcast %cst_42 : f32 to vector<8x128xf32>
    %189 = arith.addf %188, %187 : vector<8x128xf32>
    %190 = arith.divf %188, %189 : vector<8x128xf32>
    %191 = vector.extract_strided_slice %178 {offsets = [0, 256], sizes = [8, 128], strides = [1, 1]} : vector<8x512xf32> to vector<8x128xf32>
    %192 = math.tanh %191 : vector<8x128xf32>
    %193 = vector.extract_strided_slice %178 {offsets = [0, 384], sizes = [8, 128], strides = [1, 1]} : vector<8x512xf32> to vector<8x128xf32>
    %194 = arith.negf %193 : vector<8x128xf32>
    %195 = math.exp %194 : vector<8x128xf32>
    %cst_43 = arith.constant 1.000000e+00 : f32
    %196 = vector.broadcast %cst_43 : f32 to vector<8x128xf32>
    %197 = arith.addf %196, %195 : vector<8x128xf32>
    %198 = arith.divf %196, %197 : vector<8x128xf32>
    %199 = arith.mulf %190, %173 : vector<8x128xf32>
    %200 = arith.mulf %184, %192 : vector<8x128xf32>
    %201 = arith.addf %199, %200 : vector<8x128xf32>
    %202 = math.tanh %201 : vector<8x128xf32>
    %203 = arith.mulf %198, %202 : vector<8x128xf32>
    %c48 = arith.constant 48 : index
    %c0_44 = arith.constant 0 : index
    %204 = vector.load %arg9[%c48, %c0_44] : memref<64x128xf32, #tpu.memory_space<vmem>>, vector<8x128xf32>
    tpu.vector_store %arg9[%c48, %c0_44], %203 {strides = array<i32>} : memref<64x128xf32, #tpu.memory_space<vmem>>, vector<8x128xf32>,
    %cst_45 = arith.constant dense<0.000000e+00> : vector<8x512xf32>
    %205 = tpu.matmul %203, %6, %cst_45 {dimension_numbers = #tpu.dot_dimension_numbers<[1], [0], [0], [1], [0, 0, 1, 1], [], []>} : vector<8x128xf32>, vector<128x512xf32>, vector<8x512xf32> -> vector<8x512xf32>
    %206 = arith.addf %5, %205 : vector<8x512xf32>
    %207 = vector.extract_strided_slice %206 {offsets = [0, 0], sizes = [8, 128], strides = [1, 1]} : vector<8x512xf32> to vector<8x128xf32>
    %208 = arith.negf %207 : vector<8x128xf32>
    %209 = math.exp %208 : vector<8x128xf32>
    %cst_46 = arith.constant 1.000000e+00 : f32
    %210 = vector.broadcast %cst_46 : f32 to vector<8x128xf32>
    %211 = arith.addf %210, %209 : vector<8x128xf32>
    %212 = arith.divf %210, %211 : vector<8x128xf32>
    %213 = vector.extract_strided_slice %206 {offsets = [0, 128], sizes = [8, 128], strides = [1, 1]} : vector<8x512xf32> to vector<8x128xf32>
    %214 = arith.negf %213 : vector<8x128xf32>
    %215 = math.exp %214 : vector<8x128xf32>
    %cst_47 = arith.constant 1.000000e+00 : f32
    %216 = vector.broadcast %cst_47 : f32 to vector<8x128xf32>
    %217 = arith.addf %216, %215 : vector<8x128xf32>
    %218 = arith.divf %216, %217 : vector<8x128xf32>
    %219 = vector.extract_strided_slice %206 {offsets = [0, 256], sizes = [8, 128], strides = [1, 1]} : vector<8x512xf32> to vector<8x128xf32>
    %220 = math.tanh %219 : vector<8x128xf32>
    %221 = vector.extract_strided_slice %206 {offsets = [0, 384], sizes = [8, 128], strides = [1, 1]} : vector<8x512xf32> to vector<8x128xf32>
    %222 = arith.negf %221 : vector<8x128xf32>
    %223 = math.exp %222 : vector<8x128xf32>
    %cst_48 = arith.constant 1.000000e+00 : f32
    %224 = vector.broadcast %cst_48 : f32 to vector<8x128xf32>
    %225 = arith.addf %224, %223 : vector<8x128xf32>
    %226 = arith.divf %224, %225 : vector<8x128xf32>
    %227 = arith.mulf %218, %201 : vector<8x128xf32>
    %228 = arith.mulf %212, %220 : vector<8x128xf32>
    %229 = arith.addf %227, %228 : vector<8x128xf32>
    %230 = math.tanh %229 : vector<8x128xf32>
    %231 = arith.mulf %226, %230 : vector<8x128xf32>
    %c56 = arith.constant 56 : index
    %c0_49 = arith.constant 0 : index
    %232 = vector.load %arg9[%c56, %c0_49] : memref<64x128xf32, #tpu.memory_space<vmem>>, vector<8x128xf32>
    tpu.vector_store %arg9[%c56, %c0_49], %231 {strides = array<i32>} : memref<64x128xf32, #tpu.memory_space<vmem>>, vector<8x128xf32>,
    %c0_50 = arith.constant 0 : index
    %c0_51 = arith.constant 0 : index
    %233 = vector.load %arg9[%c0_50, %c0_51] : memref<64x128xf32, #tpu.memory_space<vmem>>, vector<64x128xf32>
    %c0_52 = arith.constant 0 : index
    %c0_53 = arith.constant 0 : index
    %234 = vector.load %arg4[%c0_52, %c0_53] : memref<128x512xf32, #tpu.memory_space<vmem>>, vector<128x512xf32>
    %cst_54 = arith.constant dense<0.000000e+00> : vector<64x512xf32>
    %235 = tpu.matmul %233, %234, %cst_54 {dimension_numbers = #tpu.dot_dimension_numbers<[1], [0], [0], [1], [0, 0, 1, 1], [], []>} : vector<64x128xf32>, vector<128x512xf32>, vector<64x512xf32> -> vector<64x512xf32>
    %c0_55 = arith.constant 0 : index
    %c0_56 = arith.constant 0 : index
    %236 = vector.load %arg6[%c0_55, %c0_56] : memref<1x512xf32, #tpu.memory_space<vmem>>, vector<1x512xf32>
    %237 = vector.broadcast %236 : vector<1x512xf32> to vector<64x512xf32>
    %238 = arith.addf %235, %237 : vector<64x512xf32>
    %c0_57 = arith.constant 0 : index
    %c0_58 = arith.constant 0 : index
    %239 = vector.load %arg10[%c0_57, %c0_58] : memref<64x512xf32, #tpu.memory_space<vmem>>, vector<64x512xf32>
    tpu.vector_store %arg10[%c0_57, %c0_58], %238 {strides = array<i32>} : memref<64x512xf32, #tpu.memory_space<vmem>>, vector<64x512xf32>,
    %c0_59 = arith.constant 0 : index
    %c0_60 = arith.constant 0 : index
    %240 = vector.load %arg5[%c0_59, %c0_60] : memref<128x512xf32, #tpu.memory_space<vmem>>, vector<128x512xf32>
    %cst_61 = arith.constant dense<0.000000e+00> : vector<64x512xf32>
    %241 = tpu.matmul %233, %240, %cst_61 {dimension_numbers = #tpu.dot_dimension_numbers<[1], [0], [0], [1], [0, 0, 1, 1], [], []>} : vector<64x128xf32>, vector<128x512xf32>, vector<64x512xf32> -> vector<64x512xf32>
    %c0_62 = arith.constant 0 : index
    %c0_63 = arith.constant 0 : index
    %242 = vector.load %arg11[%c0_62, %c0_63] : memref<64x512xf32, #tpu.memory_space<vmem>>, vector<64x512xf32>
    tpu.vector_store %arg11[%c0_62, %c0_63], %241 {strides = array<i32>} : memref<64x512xf32, #tpu.memory_space<vmem>>, vector<64x512xf32>,
    %c0_64 = arith.constant 0 : index
    %c0_65 = arith.constant 0 : index
    %243 = vector.load %arg7[%c0_64, %c0_65] : memref<128x512xf32, #tpu.memory_space<vmem>>, vector<128x512xf32>
    %cst_66 = arith.constant 0.000000e+00 : f32
    %244 = vector.broadcast %cst_66 : f32 to vector<8x128xf32>
    %cst_67 = arith.constant 0.000000e+00 : f32
    %245 = vector.broadcast %cst_67 : f32 to vector<8x128xf32>
    %c0_68 = arith.constant 0 : index
    %c0_69 = arith.constant 0 : index
    %246 = vector.load %arg10[%c0_68, %c0_69] : memref<64x512xf32, #tpu.memory_space<vmem>>, vector<8x512xf32>
    %c56_70 = arith.constant 56 : index
    %c0_71 = arith.constant 0 : index
    %247 = vector.load %arg11[%c56_70, %c0_71] : memref<64x512xf32, #tpu.memory_space<vmem>>, vector<8x512xf32>
    %248 = arith.addf %246, %247 : vector<8x512xf32>
    %cst_72 = arith.constant dense<0.000000e+00> : vector<8x512xf32>
    %249 = tpu.matmul %244, %243, %cst_72 {dimension_numbers = #tpu.dot_dimension_numbers<[1], [0], [0], [1], [0, 0, 1, 1], [], []>} : vector<8x128xf32>, vector<128x512xf32>, vector<8x512xf32> -> vector<8x512xf32>
    %250 = arith.addf %248, %249 : vector<8x512xf32>
    %251 = vector.extract_strided_slice %250 {offsets = [0, 0], sizes = [8, 128], strides = [1, 1]} : vector<8x512xf32> to vector<8x128xf32>
    %252 = arith.negf %251 : vector<8x128xf32>
    %253 = math.exp %252 : vector<8x128xf32>
    %cst_73 = arith.constant 1.000000e+00 : f32
    %254 = vector.broadcast %cst_73 : f32 to vector<8x128xf32>
    %255 = arith.addf %254, %253 : vector<8x128xf32>
    %256 = arith.divf %254, %255 : vector<8x128xf32>
    %257 = vector.extract_strided_slice %250 {offsets = [0, 128], sizes = [8, 128], strides = [1, 1]} : vector<8x512xf32> to vector<8x128xf32>
    %258 = arith.negf %257 : vector<8x128xf32>
    %259 = math.exp %258 : vector<8x128xf32>
    %cst_74 = arith.constant 1.000000e+00 : f32
    %260 = vector.broadcast %cst_74 : f32 to vector<8x128xf32>
    %261 = arith.addf %260, %259 : vector<8x128xf32>
    %262 = arith.divf %260, %261 : vector<8x128xf32>
    %263 = vector.extract_strided_slice %250 {offsets = [0, 256], sizes = [8, 128], strides = [1, 1]} : vector<8x512xf32> to vector<8x128xf32>
    %264 = math.tanh %263 : vector<8x128xf32>
    %265 = vector.extract_strided_slice %250 {offsets = [0, 384], sizes = [8, 128], strides = [1, 1]} : vector<8x512xf32> to vector<8x128xf32>
    %266 = arith.negf %265 : vector<8x128xf32>
    %267 = math.exp %266 : vector<8x128xf32>
    %cst_75 = arith.constant 1.000000e+00 : f32
    %268 = vector.broadcast %cst_75 : f32 to vector<8x128xf32>
    %269 = arith.addf %268, %267 : vector<8x128xf32>
    %270 = arith.divf %268, %269 : vector<8x128xf32>
    %271 = arith.mulf %262, %245 : vector<8x128xf32>
    %272 = arith.mulf %256, %264 : vector<8x128xf32>
    %273 = arith.addf %271, %272 : vector<8x128xf32>
    %274 = math.tanh %273 : vector<8x128xf32>
    %275 = arith.mulf %270, %274 : vector<8x128xf32>
    %276 = vector.extract_strided_slice %275 {offsets = [0, 0], sizes = [8, 1], strides = [1, 1]} : vector<8x128xf32> to vector<8x1xf32>
    %277 = vector.extract_strided_slice %275 {offsets = [0, 64], sizes = [8, 1], strides = [1, 1]} : vector<8x128xf32> to vector<8x1xf32>
    %c8_76 = arith.constant 8 : index
    %c0_77 = arith.constant 0 : index
    %278 = vector.load %arg10[%c8_76, %c0_77] : memref<64x512xf32, #tpu.memory_space<vmem>>, vector<8x512xf32>
    %c48_78 = arith.constant 48 : index
    %c0_79 = arith.constant 0 : index
    %279 = vector.load %arg11[%c48_78, %c0_79] : memref<64x512xf32, #tpu.memory_space<vmem>>, vector<8x512xf32>
    %280 = arith.addf %278, %279 : vector<8x512xf32>
    %cst_80 = arith.constant dense<0.000000e+00> : vector<8x512xf32>
    %281 = tpu.matmul %275, %243, %cst_80 {dimension_numbers = #tpu.dot_dimension_numbers<[1], [0], [0], [1], [0, 0, 1, 1], [], []>} : vector<8x128xf32>, vector<128x512xf32>, vector<8x512xf32> -> vector<8x512xf32>
    %282 = arith.addf %280, %281 : vector<8x512xf32>
    %283 = vector.extract_strided_slice %282 {offsets = [0, 0], sizes = [8, 128], strides = [1, 1]} : vector<8x512xf32> to vector<8x128xf32>
    %284 = arith.negf %283 : vector<8x128xf32>
    %285 = math.exp %284 : vector<8x128xf32>
    %cst_81 = arith.constant 1.000000e+00 : f32
    %286 = vector.broadcast %cst_81 : f32 to vector<8x128xf32>
    %287 = arith.addf %286, %285 : vector<8x128xf32>
    %288 = arith.divf %286, %287 : vector<8x128xf32>
    %289 = vector.extract_strided_slice %282 {offsets = [0, 128], sizes = [8, 128], strides = [1, 1]} : vector<8x512xf32> to vector<8x128xf32>
    %290 = arith.negf %289 : vector<8x128xf32>
    %291 = math.exp %290 : vector<8x128xf32>
    %cst_82 = arith.constant 1.000000e+00 : f32
    %292 = vector.broadcast %cst_82 : f32 to vector<8x128xf32>
    %293 = arith.addf %292, %291 : vector<8x128xf32>
    %294 = arith.divf %292, %293 : vector<8x128xf32>
    %295 = vector.extract_strided_slice %282 {offsets = [0, 256], sizes = [8, 128], strides = [1, 1]} : vector<8x512xf32> to vector<8x128xf32>
    %296 = math.tanh %295 : vector<8x128xf32>
    %297 = vector.extract_strided_slice %282 {offsets = [0, 384], sizes = [8, 128], strides = [1, 1]} : vector<8x512xf32> to vector<8x128xf32>
    %298 = arith.negf %297 : vector<8x128xf32>
    %299 = math.exp %298 : vector<8x128xf32>
    %cst_83 = arith.constant 1.000000e+00 : f32
    %300 = vector.broadcast %cst_83 : f32 to vector<8x128xf32>
    %301 = arith.addf %300, %299 : vector<8x128xf32>
    %302 = arith.divf %300, %301 : vector<8x128xf32>
    %303 = arith.mulf %294, %273 : vector<8x128xf32>
    %304 = arith.mulf %288, %296 : vector<8x128xf32>
    %305 = arith.addf %303, %304 : vector<8x128xf32>
    %306 = math.tanh %305 : vector<8x128xf32>
    %307 = arith.mulf %302, %306 : vector<8x128xf32>
    %308 = vector.extract_strided_slice %307 {offsets = [0, 0], sizes = [8, 1], strides = [1, 1]} : vector<8x128xf32> to vector<8x1xf32>
    %309 = vector.extract_strided_slice %307 {offsets = [0, 64], sizes = [8, 1], strides = [1, 1]} : vector<8x128xf32> to vector<8x1xf32>
    %c16_84 = arith.constant 16 : index
    %c0_85 = arith.constant 0 : index
    %310 = vector.load %arg10[%c16_84, %c0_85] : memref<64x512xf32, #tpu.memory_space<vmem>>, vector<8x512xf32>
    %c40_86 = arith.constant 40 : index
    %c0_87 = arith.constant 0 : index
    %311 = vector.load %arg11[%c40_86, %c0_87] : memref<64x512xf32, #tpu.memory_space<vmem>>, vector<8x512xf32>
    %312 = arith.addf %310, %311 : vector<8x512xf32>
    %cst_88 = arith.constant dense<0.000000e+00> : vector<8x512xf32>
    %313 = tpu.matmul %307, %243, %cst_88 {dimension_numbers = #tpu.dot_dimension_numbers<[1], [0], [0], [1], [0, 0, 1, 1], [], []>} : vector<8x128xf32>, vector<128x512xf32>, vector<8x512xf32> -> vector<8x512xf32>
    %314 = arith.addf %312, %313 : vector<8x512xf32>
    %315 = vector.extract_strided_slice %314 {offsets = [0, 0], sizes = [8, 128], strides = [1, 1]} : vector<8x512xf32> to vector<8x128xf32>
    %316 = arith.negf %315 : vector<8x128xf32>
    %317 = math.exp %316 : vector<8x128xf32>
    %cst_89 = arith.constant 1.000000e+00 : f32
    %318 = vector.broadcast %cst_89 : f32 to vector<8x128xf32>
    %319 = arith.addf %318, %317 : vector<8x128xf32>
    %320 = arith.divf %318, %319 : vector<8x128xf32>
    %321 = vector.extract_strided_slice %314 {offsets = [0, 128], sizes = [8, 128], strides = [1, 1]} : vector<8x512xf32> to vector<8x128xf32>
    %322 = arith.negf %321 : vector<8x128xf32>
    %323 = math.exp %322 : vector<8x128xf32>
    %cst_90 = arith.constant 1.000000e+00 : f32
    %324 = vector.broadcast %cst_90 : f32 to vector<8x128xf32>
    %325 = arith.addf %324, %323 : vector<8x128xf32>
    %326 = arith.divf %324, %325 : vector<8x128xf32>
    %327 = vector.extract_strided_slice %314 {offsets = [0, 256], sizes = [8, 128], strides = [1, 1]} : vector<8x512xf32> to vector<8x128xf32>
    %328 = math.tanh %327 : vector<8x128xf32>
    %329 = vector.extract_strided_slice %314 {offsets = [0, 384], sizes = [8, 128], strides = [1, 1]} : vector<8x512xf32> to vector<8x128xf32>
    %330 = arith.negf %329 : vector<8x128xf32>
    %331 = math.exp %330 : vector<8x128xf32>
    %cst_91 = arith.constant 1.000000e+00 : f32
    %332 = vector.broadcast %cst_91 : f32 to vector<8x128xf32>
    %333 = arith.addf %332, %331 : vector<8x128xf32>
    %334 = arith.divf %332, %333 : vector<8x128xf32>
    %335 = arith.mulf %326, %305 : vector<8x128xf32>
    %336 = arith.mulf %320, %328 : vector<8x128xf32>
    %337 = arith.addf %335, %336 : vector<8x128xf32>
    %338 = math.tanh %337 : vector<8x128xf32>
    %339 = arith.mulf %334, %338 : vector<8x128xf32>
    %340 = vector.extract_strided_slice %339 {offsets = [0, 0], sizes = [8, 1], strides = [1, 1]} : vector<8x128xf32> to vector<8x1xf32>
    %341 = vector.extract_strided_slice %339 {offsets = [0, 64], sizes = [8, 1], strides = [1, 1]} : vector<8x128xf32> to vector<8x1xf32>
    %c24_92 = arith.constant 24 : index
    %c0_93 = arith.constant 0 : index
    %342 = vector.load %arg10[%c24_92, %c0_93] : memref<64x512xf32, #tpu.memory_space<vmem>>, vector<8x512xf32>
    %c32_94 = arith.constant 32 : index
    %c0_95 = arith.constant 0 : index
    %343 = vector.load %arg11[%c32_94, %c0_95] : memref<64x512xf32, #tpu.memory_space<vmem>>, vector<8x512xf32>
    %344 = arith.addf %342, %343 : vector<8x512xf32>
    %cst_96 = arith.constant dense<0.000000e+00> : vector<8x512xf32>
    %345 = tpu.matmul %339, %243, %cst_96 {dimension_numbers = #tpu.dot_dimension_numbers<[1], [0], [0], [1], [0, 0, 1, 1], [], []>} : vector<8x128xf32>, vector<128x512xf32>, vector<8x512xf32> -> vector<8x512xf32>
    %346 = arith.addf %344, %345 : vector<8x512xf32>
    %347 = vector.extract_strided_slice %346 {offsets = [0, 0], sizes = [8, 128], strides = [1, 1]} : vector<8x512xf32> to vector<8x128xf32>
    %348 = arith.negf %347 : vector<8x128xf32>
    %349 = math.exp %348 : vector<8x128xf32>
    %cst_97 = arith.constant 1.000000e+00 : f32
    %350 = vector.broadcast %cst_97 : f32 to vector<8x128xf32>
    %351 = arith.addf %350, %349 : vector<8x128xf32>
    %352 = arith.divf %350, %351 : vector<8x128xf32>
    %353 = vector.extract_strided_slice %346 {offsets = [0, 128], sizes = [8, 128], strides = [1, 1]} : vector<8x512xf32> to vector<8x128xf32>
    %354 = arith.negf %353 : vector<8x128xf32>
    %355 = math.exp %354 : vector<8x128xf32>
    %cst_98 = arith.constant 1.000000e+00 : f32
    %356 = vector.broadcast %cst_98 : f32 to vector<8x128xf32>
    %357 = arith.addf %356, %355 : vector<8x128xf32>
    %358 = arith.divf %356, %357 : vector<8x128xf32>
    %359 = vector.extract_strided_slice %346 {offsets = [0, 256], sizes = [8, 128], strides = [1, 1]} : vector<8x512xf32> to vector<8x128xf32>
    %360 = math.tanh %359 : vector<8x128xf32>
    %361 = vector.extract_strided_slice %346 {offsets = [0, 384], sizes = [8, 128], strides = [1, 1]} : vector<8x512xf32> to vector<8x128xf32>
    %362 = arith.negf %361 : vector<8x128xf32>
    %363 = math.exp %362 : vector<8x128xf32>
    %cst_99 = arith.constant 1.000000e+00 : f32
    %364 = vector.broadcast %cst_99 : f32 to vector<8x128xf32>
    %365 = arith.addf %364, %363 : vector<8x128xf32>
    %366 = arith.divf %364, %365 : vector<8x128xf32>
    %367 = arith.mulf %358, %337 : vector<8x128xf32>
    %368 = arith.mulf %352, %360 : vector<8x128xf32>
    %369 = arith.addf %367, %368 : vector<8x128xf32>
    %370 = math.tanh %369 : vector<8x128xf32>
    %371 = arith.mulf %366, %370 : vector<8x128xf32>
    %372 = vector.extract_strided_slice %371 {offsets = [0, 0], sizes = [8, 1], strides = [1, 1]} : vector<8x128xf32> to vector<8x1xf32>
    %373 = vector.extract_strided_slice %371 {offsets = [0, 64], sizes = [8, 1], strides = [1, 1]} : vector<8x128xf32> to vector<8x1xf32>
    %c32_100 = arith.constant 32 : index
    %c0_101 = arith.constant 0 : index
    %374 = vector.load %arg10[%c32_100, %c0_101] : memref<64x512xf32, #tpu.memory_space<vmem>>, vector<8x512xf32>
    %c24_102 = arith.constant 24 : index
    %c0_103 = arith.constant 0 : index
    %375 = vector.load %arg11[%c24_102, %c0_103] : memref<64x512xf32, #tpu.memory_space<vmem>>, vector<8x512xf32>
    %376 = arith.addf %374, %375 : vector<8x512xf32>
    %cst_104 = arith.constant dense<0.000000e+00> : vector<8x512xf32>
    %377 = tpu.matmul %371, %243, %cst_104 {dimension_numbers = #tpu.dot_dimension_numbers<[1], [0], [0], [1], [0, 0, 1, 1], [], []>} : vector<8x128xf32>, vector<128x512xf32>, vector<8x512xf32> -> vector<8x512xf32>
    %378 = arith.addf %376, %377 : vector<8x512xf32>
    %379 = vector.extract_strided_slice %378 {offsets = [0, 0], sizes = [8, 128], strides = [1, 1]} : vector<8x512xf32> to vector<8x128xf32>
    %380 = arith.negf %379 : vector<8x128xf32>
    %381 = math.exp %380 : vector<8x128xf32>
    %cst_105 = arith.constant 1.000000e+00 : f32
    %382 = vector.broadcast %cst_105 : f32 to vector<8x128xf32>
    %383 = arith.addf %382, %381 : vector<8x128xf32>
    %384 = arith.divf %382, %383 : vector<8x128xf32>
    %385 = vector.extract_strided_slice %378 {offsets = [0, 128], sizes = [8, 128], strides = [1, 1]} : vector<8x512xf32> to vector<8x128xf32>
    %386 = arith.negf %385 : vector<8x128xf32>
    %387 = math.exp %386 : vector<8x128xf32>
    %cst_106 = arith.constant 1.000000e+00 : f32
    %388 = vector.broadcast %cst_106 : f32 to vector<8x128xf32>
    %389 = arith.addf %388, %387 : vector<8x128xf32>
    %390 = arith.divf %388, %389 : vector<8x128xf32>
    %391 = vector.extract_strided_slice %378 {offsets = [0, 256], sizes = [8, 128], strides = [1, 1]} : vector<8x512xf32> to vector<8x128xf32>
    %392 = math.tanh %391 : vector<8x128xf32>
    %393 = vector.extract_strided_slice %378 {offsets = [0, 384], sizes = [8, 128], strides = [1, 1]} : vector<8x512xf32> to vector<8x128xf32>
    %394 = arith.negf %393 : vector<8x128xf32>
    %395 = math.exp %394 : vector<8x128xf32>
    %cst_107 = arith.constant 1.000000e+00 : f32
    %396 = vector.broadcast %cst_107 : f32 to vector<8x128xf32>
    %397 = arith.addf %396, %395 : vector<8x128xf32>
    %398 = arith.divf %396, %397 : vector<8x128xf32>
    %399 = arith.mulf %390, %369 : vector<8x128xf32>
    %400 = arith.mulf %384, %392 : vector<8x128xf32>
    %401 = arith.addf %399, %400 : vector<8x128xf32>
    %402 = math.tanh %401 : vector<8x128xf32>
    %403 = arith.mulf %398, %402 : vector<8x128xf32>
    %404 = vector.extract_strided_slice %403 {offsets = [0, 0], sizes = [8, 1], strides = [1, 1]} : vector<8x128xf32> to vector<8x1xf32>
    %405 = vector.extract_strided_slice %403 {offsets = [0, 64], sizes = [8, 1], strides = [1, 1]} : vector<8x128xf32> to vector<8x1xf32>
    %c40_108 = arith.constant 40 : index
    %c0_109 = arith.constant 0 : index
    %406 = vector.load %arg10[%c40_108, %c0_109] : memref<64x512xf32, #tpu.memory_space<vmem>>, vector<8x512xf32>
    %c16_110 = arith.constant 16 : index
    %c0_111 = arith.constant 0 : index
    %407 = vector.load %arg11[%c16_110, %c0_111] : memref<64x512xf32, #tpu.memory_space<vmem>>, vector<8x512xf32>
    %408 = arith.addf %406, %407 : vector<8x512xf32>
    %cst_112 = arith.constant dense<0.000000e+00> : vector<8x512xf32>
    %409 = tpu.matmul %403, %243, %cst_112 {dimension_numbers = #tpu.dot_dimension_numbers<[1], [0], [0], [1], [0, 0, 1, 1], [], []>} : vector<8x128xf32>, vector<128x512xf32>, vector<8x512xf32> -> vector<8x512xf32>
    %410 = arith.addf %408, %409 : vector<8x512xf32>
    %411 = vector.extract_strided_slice %410 {offsets = [0, 0], sizes = [8, 128], strides = [1, 1]} : vector<8x512xf32> to vector<8x128xf32>
    %412 = arith.negf %411 : vector<8x128xf32>
    %413 = math.exp %412 : vector<8x128xf32>
    %cst_113 = arith.constant 1.000000e+00 : f32
    %414 = vector.broadcast %cst_113 : f32 to vector<8x128xf32>
    %415 = arith.addf %414, %413 : vector<8x128xf32>
    %416 = arith.divf %414, %415 : vector<8x128xf32>
    %417 = vector.extract_strided_slice %410 {offsets = [0, 128], sizes = [8, 128], strides = [1, 1]} : vector<8x512xf32> to vector<8x128xf32>
    %418 = arith.negf %417 : vector<8x128xf32>
    %419 = math.exp %418 : vector<8x128xf32>
    %cst_114 = arith.constant 1.000000e+00 : f32
    %420 = vector.broadcast %cst_114 : f32 to vector<8x128xf32>
    %421 = arith.addf %420, %419 : vector<8x128xf32>
    %422 = arith.divf %420, %421 : vector<8x128xf32>
    %423 = vector.extract_strided_slice %410 {offsets = [0, 256], sizes = [8, 128], strides = [1, 1]} : vector<8x512xf32> to vector<8x128xf32>
    %424 = math.tanh %423 : vector<8x128xf32>
    %425 = vector.extract_strided_slice %410 {offsets = [0, 384], sizes = [8, 128], strides = [1, 1]} : vector<8x512xf32> to vector<8x128xf32>
    %426 = arith.negf %425 : vector<8x128xf32>
    %427 = math.exp %426 : vector<8x128xf32>
    %cst_115 = arith.constant 1.000000e+00 : f32
    %428 = vector.broadcast %cst_115 : f32 to vector<8x128xf32>
    %429 = arith.addf %428, %427 : vector<8x128xf32>
    %430 = arith.divf %428, %429 : vector<8x128xf32>
    %431 = arith.mulf %422, %401 : vector<8x128xf32>
    %432 = arith.mulf %416, %424 : vector<8x128xf32>
    %433 = arith.addf %431, %432 : vector<8x128xf32>
    %434 = math.tanh %433 : vector<8x128xf32>
    %435 = arith.mulf %430, %434 : vector<8x128xf32>
    %436 = vector.extract_strided_slice %435 {offsets = [0, 0], sizes = [8, 1], strides = [1, 1]} : vector<8x128xf32> to vector<8x1xf32>
    %437 = vector.extract_strided_slice %435 {offsets = [0, 64], sizes = [8, 1], strides = [1, 1]} : vector<8x128xf32> to vector<8x1xf32>
    %c48_116 = arith.constant 48 : index
    %c0_117 = arith.constant 0 : index
    %438 = vector.load %arg10[%c48_116, %c0_117] : memref<64x512xf32, #tpu.memory_space<vmem>>, vector<8x512xf32>
    %c8_118 = arith.constant 8 : index
    %c0_119 = arith.constant 0 : index
    %439 = vector.load %arg11[%c8_118, %c0_119] : memref<64x512xf32, #tpu.memory_space<vmem>>, vector<8x512xf32>
    %440 = arith.addf %438, %439 : vector<8x512xf32>
    %cst_120 = arith.constant dense<0.000000e+00> : vector<8x512xf32>
    %441 = tpu.matmul %435, %243, %cst_120 {dimension_numbers = #tpu.dot_dimension_numbers<[1], [0], [0], [1], [0, 0, 1, 1], [], []>} : vector<8x128xf32>, vector<128x512xf32>, vector<8x512xf32> -> vector<8x512xf32>
    %442 = arith.addf %440, %441 : vector<8x512xf32>
    %443 = vector.extract_strided_slice %442 {offsets = [0, 0], sizes = [8, 128], strides = [1, 1]} : vector<8x512xf32> to vector<8x128xf32>
    %444 = arith.negf %443 : vector<8x128xf32>
    %445 = math.exp %444 : vector<8x128xf32>
    %cst_121 = arith.constant 1.000000e+00 : f32
    %446 = vector.broadcast %cst_121 : f32 to vector<8x128xf32>
    %447 = arith.addf %446, %445 : vector<8x128xf32>
    %448 = arith.divf %446, %447 : vector<8x128xf32>
    %449 = vector.extract_strided_slice %442 {offsets = [0, 128], sizes = [8, 128], strides = [1, 1]} : vector<8x512xf32> to vector<8x128xf32>
    %450 = arith.negf %449 : vector<8x128xf32>
    %451 = math.exp %450 : vector<8x128xf32>
    %cst_122 = arith.constant 1.000000e+00 : f32
    %452 = vector.broadcast %cst_122 : f32 to vector<8x128xf32>
    %453 = arith.addf %452, %451 : vector<8x128xf32>
    %454 = arith.divf %452, %453 : vector<8x128xf32>
    %455 = vector.extract_strided_slice %442 {offsets = [0, 256], sizes = [8, 128], strides = [1, 1]} : vector<8x512xf32> to vector<8x128xf32>
    %456 = math.tanh %455 : vector<8x128xf32>
    %457 = vector.extract_strided_slice %442 {offsets = [0, 384], sizes = [8, 128], strides = [1, 1]} : vector<8x512xf32> to vector<8x128xf32>
    %458 = arith.negf %457 : vector<8x128xf32>
    %459 = math.exp %458 : vector<8x128xf32>
    %cst_123 = arith.constant 1.000000e+00 : f32
    %460 = vector.broadcast %cst_123 : f32 to vector<8x128xf32>
    %461 = arith.addf %460, %459 : vector<8x128xf32>
    %462 = arith.divf %460, %461 : vector<8x128xf32>
    %463 = arith.mulf %454, %433 : vector<8x128xf32>
    %464 = arith.mulf %448, %456 : vector<8x128xf32>
    %465 = arith.addf %463, %464 : vector<8x128xf32>
    %466 = math.tanh %465 : vector<8x128xf32>
    %467 = arith.mulf %462, %466 : vector<8x128xf32>
    %468 = vector.extract_strided_slice %467 {offsets = [0, 0], sizes = [8, 1], strides = [1, 1]} : vector<8x128xf32> to vector<8x1xf32>
    %469 = vector.extract_strided_slice %467 {offsets = [0, 64], sizes = [8, 1], strides = [1, 1]} : vector<8x128xf32> to vector<8x1xf32>
    %c56_124 = arith.constant 56 : index
    %c0_125 = arith.constant 0 : index
    %470 = vector.load %arg10[%c56_124, %c0_125] : memref<64x512xf32, #tpu.memory_space<vmem>>, vector<8x512xf32>
    %c0_126 = arith.constant 0 : index
    %c0_127 = arith.constant 0 : index
    %471 = vector.load %arg11[%c0_126, %c0_127] : memref<64x512xf32, #tpu.memory_space<vmem>>, vector<8x512xf32>
    %472 = arith.addf %470, %471 : vector<8x512xf32>
    %cst_128 = arith.constant dense<0.000000e+00> : vector<8x512xf32>
    %473 = tpu.matmul %467, %243, %cst_128 {dimension_numbers = #tpu.dot_dimension_numbers<[1], [0], [0], [1], [0, 0, 1, 1], [], []>} : vector<8x128xf32>, vector<128x512xf32>, vector<8x512xf32> -> vector<8x512xf32>
    %474 = arith.addf %472, %473 : vector<8x512xf32>
    %475 = vector.extract_strided_slice %474 {offsets = [0, 0], sizes = [8, 128], strides = [1, 1]} : vector<8x512xf32> to vector<8x128xf32>
    %476 = arith.negf %475 : vector<8x128xf32>
    %477 = math.exp %476 : vector<8x128xf32>
    %cst_129 = arith.constant 1.000000e+00 : f32
    %478 = vector.broadcast %cst_129 : f32 to vector<8x128xf32>
    %479 = arith.addf %478, %477 : vector<8x128xf32>
    %480 = arith.divf %478, %479 : vector<8x128xf32>
    %481 = vector.extract_strided_slice %474 {offsets = [0, 128], sizes = [8, 128], strides = [1, 1]} : vector<8x512xf32> to vector<8x128xf32>
    %482 = arith.negf %481 : vector<8x128xf32>
    %483 = math.exp %482 : vector<8x128xf32>
    %cst_130 = arith.constant 1.000000e+00 : f32
    %484 = vector.broadcast %cst_130 : f32 to vector<8x128xf32>
    %485 = arith.addf %484, %483 : vector<8x128xf32>
    %486 = arith.divf %484, %485 : vector<8x128xf32>
    %487 = vector.extract_strided_slice %474 {offsets = [0, 256], sizes = [8, 128], strides = [1, 1]} : vector<8x512xf32> to vector<8x128xf32>
    %488 = math.tanh %487 : vector<8x128xf32>
    %489 = vector.extract_strided_slice %474 {offsets = [0, 384], sizes = [8, 128], strides = [1, 1]} : vector<8x512xf32> to vector<8x128xf32>
    %490 = arith.negf %489 : vector<8x128xf32>
    %491 = math.exp %490 : vector<8x128xf32>
    %cst_131 = arith.constant 1.000000e+00 : f32
    %492 = vector.broadcast %cst_131 : f32 to vector<8x128xf32>
    %493 = arith.addf %492, %491 : vector<8x128xf32>
    %494 = arith.divf %492, %493 : vector<8x128xf32>
    %495 = arith.mulf %486, %465 : vector<8x128xf32>
    %496 = arith.mulf %480, %488 : vector<8x128xf32>
    %497 = arith.addf %495, %496 : vector<8x128xf32>
    %498 = math.tanh %497 : vector<8x128xf32>
    %499 = arith.mulf %494, %498 : vector<8x128xf32>
    %500 = vector.extract_strided_slice %499 {offsets = [0, 0], sizes = [8, 1], strides = [1, 1]} : vector<8x128xf32> to vector<8x1xf32>
    %501 = vector.extract_strided_slice %499 {offsets = [0, 64], sizes = [8, 1], strides = [1, 1]} : vector<8x128xf32> to vector<8x1xf32>
    %502 = arith.addf %276, %501 : vector<8x1xf32>
    %c0_132 = arith.constant 0 : index
    %c0_133 = arith.constant 0 : index
    %503 = vector.load %arg8[%c0_132, %c0_133] : memref<8x8xf32, #tpu.memory_space<vmem>>, vector<8x1xf32>
    tpu.vector_store %arg8[%c0_132, %c0_133], %502 {strides = array<i32>} : memref<8x8xf32, #tpu.memory_space<vmem>>, vector<8x1xf32>,
    %504 = arith.addf %308, %469 : vector<8x1xf32>
    %c0_134 = arith.constant 0 : index
    %c1 = arith.constant 1 : index
    %505 = vector.load %arg8[%c0_134, %c1] : memref<8x8xf32, #tpu.memory_space<vmem>>, vector<8x1xf32>
    tpu.vector_store %arg8[%c0_134, %c1], %504 {strides = array<i32>} : memref<8x8xf32, #tpu.memory_space<vmem>>, vector<8x1xf32>,
    %506 = arith.addf %340, %437 : vector<8x1xf32>
    %c0_135 = arith.constant 0 : index
    %c2 = arith.constant 2 : index
    %507 = vector.load %arg8[%c0_135, %c2] : memref<8x8xf32, #tpu.memory_space<vmem>>, vector<8x1xf32>
    tpu.vector_store %arg8[%c0_135, %c2], %506 {strides = array<i32>} : memref<8x8xf32, #tpu.memory_space<vmem>>, vector<8x1xf32>,
    %508 = arith.addf %372, %405 : vector<8x1xf32>
    %c0_136 = arith.constant 0 : index
    %c3 = arith.constant 3 : index
    %509 = vector.load %arg8[%c0_136, %c3] : memref<8x8xf32, #tpu.memory_space<vmem>>, vector<8x1xf32>
    tpu.vector_store %arg8[%c0_136, %c3], %508 {strides = array<i32>} : memref<8x8xf32, #tpu.memory_space<vmem>>, vector<8x1xf32>,
    %510 = arith.addf %404, %373 : vector<8x1xf32>
    %c0_137 = arith.constant 0 : index
    %c4 = arith.constant 4 : index
    %511 = vector.load %arg8[%c0_137, %c4] : memref<8x8xf32, #tpu.memory_space<vmem>>, vector<8x1xf32>
    tpu.vector_store %arg8[%c0_137, %c4], %510 {strides = array<i32>} : memref<8x8xf32, #tpu.memory_space<vmem>>, vector<8x1xf32>,
    %512 = arith.addf %436, %341 : vector<8x1xf32>
    %c0_138 = arith.constant 0 : index
    %c5 = arith.constant 5 : index
    %513 = vector.load %arg8[%c0_138, %c5] : memref<8x8xf32, #tpu.memory_space<vmem>>, vector<8x1xf32>
    tpu.vector_store %arg8[%c0_138, %c5], %512 {strides = array<i32>} : memref<8x8xf32, #tpu.memory_space<vmem>>, vector<8x1xf32>,
    %514 = arith.addf %468, %309 : vector<8x1xf32>
    %c0_139 = arith.constant 0 : index
    %c6 = arith.constant 6 : index
    %515 = vector.load %arg8[%c0_139, %c6] : memref<8x8xf32, #tpu.memory_space<vmem>>, vector<8x1xf32>
    tpu.vector_store %arg8[%c0_139, %c6], %514 {strides = array<i32>} : memref<8x8xf32, #tpu.memory_space<vmem>>, vector<8x1xf32>,
    %516 = arith.addf %500, %277 : vector<8x1xf32>
    %c0_140 = arith.constant 0 : index
    %c7 = arith.constant 7 : index
    %517 = vector.load %arg8[%c0_140, %c7] : memref<8x8xf32, #tpu.memory_space<vmem>>, vector<8x1xf32>
    tpu.vector_store %arg8[%c0_140, %c7], %516 {strides = array<i32>} : memref<8x8xf32, #tpu.memory_space<vmem>>, vector<8x1xf32>,
    return
  }
}

</mosaic_0001>

<bundles_post_ra>
// kernel: decoder_forward.1
= control target key start
LH: loop header
LB: loop body
LE: loop exit
PB: predicated region body
PF: predicated region fallthrough
CT: control target
= control target key end

     0   :  { %13 = vsyncpa [#allocation6], 0  ;;  %s6668_s0 = inlined_call_operand.vmem [shape: f32[8,8], index: 0, kind: input, shape index: {}]   ;;  %s6669_s1 = inlined_call_operand.hbm [shape: f32[8,512], index: 1, kind: input, shape index: {}]   ;;  %s6670_s2 = inlined_call_operand.vmem [shape: f32[1,512], index: 2, kind: input, shape index: {}]   ;;  %s6671_s3 = inlined_call_operand.hbm [shape: f32[128,512], index: 3, kind: input, shape index: {}]   ;;  %s6672_s4 = inlined_call_operand.hbm [shape: f32[128,512], index: 4, kind: input, shape index: {}]   ;;  %s6673_s5 = inlined_call_operand.hbm [shape: f32[128,512], index: 5, kind: input, shape index: {}]   ;;  %s6674_s6 = inlined_call_operand.vmem [shape: f32[1,512], index: 6, kind: input, shape index: {}]   ;;  %s6675_s7 = inlined_call_operand.hbm [shape: f32[128,512], index: 7, kind: input, shape index: {}]   ;;  %s6676_s8 = inlined_call_operand.vmem [shape: f32[8,8], index: 8, kind: output, shape index: {}]  }
   0x1   :  { %14 = vsyncpa [#allocation8], 0 }
   0x2   :  { %15 = vsyncpa [#allocation11], 0  ;;  %s4541_s27 = smov [#allocation7]  }
   0x3   :  { %s35_s28 = sshll.u32 %s4541_s27, 4  ;;  %s36_s28 = int_to_ptr.vmem [resolvable:$true] %s35_s28 }
   0x4   :  { %s4443_s29 = scalar_lea.vmem %s36_s28, 8192  ;;  %p4448_p1 = scmp.lt.s32.totalorder %s36_s28, %s36_s28 }
   0x5   :  { %p4444_p0 = scmp.ne.s32.totalorder %s36_s28, %s4443_s29  ;;  %p4449_p2 = scmp.lt.s32.totalorder %s4443_s29, %s4443_s29 }
   0x7   :  { %p4450_p3 = por %p4449_p2, %p4448_p1 }
   0x9   :  { %p4451_p4 = pnand %p4450_p3, %p4444_p0 }
   0xb   :  { %4454 = shalt.err (!%p4451_p4)
}
   0xc   :  { %s4542_s30 = smov 512   ;;  %s4543_s9 = smov 32  }
   0xd   :  { %41 = dma.hbm_to_vmem [thread:$0]  %s6671_s3, 8192, %s36_s28, [#allocation8], %s4542_s30, %s4542_s30, %s4543_s9  }
   0xe   :  { %s4544_s12 = smov [#allocation10]   ;;  %s4545_s14 = smov [#allocation5]  }
   0xf   :  { %s59_s13 = sshll.u32 %s4544_s12, 4  ;;  %s24_s15 = sshll.u32 %s4545_s14, 4  ;;  %s60_s13 = int_to_ptr.vmem [resolvable:$true] %s59_s13  ;;  %s25_s15 = int_to_ptr.vmem [resolvable:$true] %s24_s15 }
  0x10   :  { %s4463_s16 = scalar_lea.vmem %s60_s13, 8192  ;;  %p4468_p6 = scmp.lt.s32.totalorder %s60_s13, %s60_s13 }
  0x11   :  { %p4464_p5 = scmp.ne.s32.totalorder %s60_s13, %s4463_s16  ;;  %p4469_p7 = scmp.lt.s32.totalorder %s4463_s16, %s4463_s16 }
  0x13   :  { %p4470_p8 = por %p4469_p7, %p4468_p6 }
  0x15   :  { %p4471_p9 = pnand %p4470_p8, %p4464_p5 }
  0x17   :  { %4474 = shalt.err (!%p4471_p9)
}
  0x18   :  { %65 = dma.hbm_to_vmem [thread:$0]  %s6673_s5, 8192, %s60_s13, [#allocation11], %s4542_s30, %s4542_s30, %s4543_s9  }
  0x19   :  { %s4483_s3 = scalar_lea.vmem %s25_s15, 512  ;;  %p4488_p11 = scmp.lt.s32.totalorder %s25_s15, %s25_s15 }
  0x1a   :  { %p4484_p10 = scmp.ne.s32.totalorder %s25_s15, %s4483_s3  ;;  %p4489_p12 = scmp.lt.s32.totalorder %s4483_s3, %s4483_s3 }
  0x1c   :  { %p4490_p13 = por %p4489_p12, %p4488_p11 }
  0x1e   :  { %p4491_p0 = pnand %p4490_p13, %p4484_p10 }
  0x20   :  { %4494 = shalt.err (!%p4491_p0)
}
  0x21   :  { %27 = dma.hbm_to_vmem [thread:$0]  %s6669_s1, 512, %s25_s15, [#allocation6]  }
  0x22   :  { %s4546_s21 = smov [#allocation9]   ;;  %s4547_s23 = smov [#allocation12]  }
  0x23   :  { %s47_s22 = sshll.u32 %s4546_s21, 4  ;;  %s73_s24 = sshll.u32 %s4547_s23, 4  ;;  %s48_s22 = int_to_ptr.vmem [resolvable:$true] %s47_s22  ;;  %s74_s24 = int_to_ptr.vmem [resolvable:$true] %s73_s24 }
  0x24   :  { %s4503_s25 = scalar_lea.vmem %s48_s22, 8192  ;;  %p4508_p2 = scmp.lt.s32.totalorder %s48_s22, %s48_s22 }
  0x25   :  { %p4504_p1 = scmp.ne.s32.totalorder %s48_s22, %s4503_s25  ;;  %p4509_p3 = scmp.lt.s32.totalorder %s4503_s25, %s4503_s25 }
  0x27   :  { %p4510_p4 = por %p4509_p3, %p4508_p2 }
  0x29   :  { %p4511_p5 = pnand %p4510_p4, %p4504_p1 }
  0x2b   :  { %4514 = shalt.err (!%p4511_p5)
}
  0x2c   :  { %53 = dma.hbm_to_vmem [thread:$0]  %s6672_s4, 8192, %s48_s22, [#allocation8], %s4542_s30, %s4542_s30, %s4543_s9  }
  0x2d   :  { %s4523_s1 = scalar_lea.vmem %s74_s24, 8192  ;;  %p4528_p7 = scmp.lt.s32.totalorder %s74_s24, %s74_s24 }
  0x2e   :  { %p4524_p6 = scmp.ne.s32.totalorder %s74_s24, %s4523_s1  ;;  %p4529_p8 = scmp.lt.s32.totalorder %s4523_s1, %s4523_s1 }
  0x30   :  { %p4530_p9 = por %p4529_p8, %p4528_p7 }
  0x32   :  { %p4531_p10 = pnand %p4530_p9, %p4524_p6 }
  0x34   :  { %4534 = shalt.err (!%p4531_p10)
}
  0x35   :  { %79 = dma.hbm_to_vmem [thread:$0]  %s6675_s7, 8192, %s74_s24, [#allocation11], %s4542_s30, %s4542_s30, %s4543_s9  }
  0x36   :  { %4535 = dma.done.wait [#allocation6], 512  }
  0x37   :  { %4536 = vsyncadd [#allocation6], 4294966784 }
  0x38   :  { %4537 = dma.done.wait [#allocation8], 16384  }
  0x39   :  { %4538 = vsyncadd [#allocation8], 4294950912 }
  0x3a   :  { %4539 = dma.done.wait [#allocation11], 16384  }
  0x3b   :  { %4540 = vsyncadd [#allocation11], 4294950912  ;;  %v6677_v0 = vmov 0.0   ;;  %v97_v1 = vld [vmem:[#allocation5 + $0x8] sm:$0xff]  ;;  %v99_v2 = vld [vmem:[#allocation5 + $0x18] sm:$0xff]  ;;  %vm122_vm0 = vcmask 64512  }
  0x3c   :  { %190 = vmatprep.mubr.f32.mxu0 %v6677_v0  ;;  %261 = vmatprep.mubr.f32.mxu1 %v6677_v0  ;;  %v96_v3 = vld [vmem:[#allocation5] sm:$0xff]  ;;  %v98_v4 = vld [vmem:[#allocation5 + $0x10] sm:$0xff]  ;;  %v4634_v6 = vld [vmem:[#allocation7 + $0x1e8] sm:$0xff]  ;;  %s4550_s9 = smov 2   ;;  %s4551_s10 = smov 3   ;;  %vm3899_vm1 = vcmask 7168  }
  0x3d   :  { %156 = vmatprep.subr.mxu0 %v97_v1  ;;  %227 = vmatprep.subr.mxu1 %v99_v2  ;;  %v95_v5 = vld [vmem:[%s6668_s0] sm:$0xff]  ;;  %6925 = vst [vmem:[#allocation16_spill] sm:$0xff] %v4634_v6  ;;  %v4636_v7 = vld [vmem:[#allocation7 + $0x1f8] sm:$0xff]  ;;  %v4640_v9 = vld [vmem:[#allocation7 + $0x1f0] sm:$0xff]  ;;  %s4552_s11 = smov 1   ;;  %s4553_s12 = smov 5  }
  0x3e   :  { %157 = vmatpush1.msra.mxu0 %v96_v3  ;;  %228 = vmatpush1.msra.mxu1 %v98_v4  ;;  %6926 = vst [vmem:[#allocation17_spill] sm:$0xff] %v4636_v7  ;;  %v4638_v8 = vld [vmem:[#allocation7 + $0x1e0] sm:$0xff]  ;;  %v4644_v10 = vld [vmem:[#allocation7 + $0x1c8] sm:$0xff]  ;;  %v4646_v11 = vld [vmem:[#allocation7 + $0x1d8] sm:$0xff]  ;;  %s4554_s13 = smov 7   ;;  %s4555_s14 = smov 4  }
  0x3f   :  { %3985 = vmatmul.mubr.msk.f32.vlgmr.msra.gmra.mxu0 %vm122_vm0, %v95_v5  ;;  %332 = vmatprep.subr.mxu0 %v4634_v6  ;;  %v4650_v12 = vld [vmem:[#allocation7 + $0x1c0] sm:$0xff]  ;;  %v4652_v13 = vld [vmem:[#allocation7 + $0x1d0] sm:$0xff]  ;;  %v4656_v14 = vld [vmem:[#allocation7 + $0x1a8] sm:$0xff]  ;;  %s4556_s15 = smov 6   ;;  %vm3910_vm2 = vcmask 15368   ;;  %vm3921_vm3 = vcmask 23568  }
  0x40   :  { %403 = vmatprep.subr.mxu1 %v4636_v7  ;;  %3986 = vmatmul.mubr.msk.f32.vlgmr.msra.gmra.mxu1 %vm122_vm0, %v95_v5  ;;  %v4658_v15 = vld [vmem:[#allocation7 + $0x1b8] sm:$0xff]  ;;  %v4662_v16 = vld [vmem:[#allocation7 + $0x1a0] sm:$0xff]  ;;  %v4664_v17 = vld [vmem:[#allocation7 + $0x1b0] sm:$0xff]  ;;  %vm3932_vm4 = vcmask 31768   ;;  %vm3943_vm5 = vcmask 39968   ;;  %vm3954_vm6 = vcmask 48168  }
  0x41   :  { %333 = vmatpush1.msra.mxu0 %v4638_v8  ;;  %404 = vmatpush1.msra.mxu1 %v4640_v9  ;;  %v4668_v18 = vld [vmem:[#allocation7 + $0x188] sm:$0xff]  ;;  %v4670_v19 = vld [vmem:[#allocation7 + $0x198] sm:$0xff]  ;;  %v4674_v20 = vld [vmem:[#allocation7 + $0x180] sm:$0xff]  ;;  %vm3965_vm7 = vcmask 56368   ;;  %vm3976_vm8 = vcmask 64568  }
  0x42   :  { %334 = vmatprep.subr.mxu0 %v4644_v10  ;;  %405 = vmatprep.subr.mxu1 %v4646_v11  ;;  %v4676_v21 = vld [vmem:[#allocation7 + $0x190] sm:$0xff]  ;;  %v4680_v22 = vld [vmem:[#allocation7 + $0x168] sm:$0xff]  ;;  %v4682_v23 = vld [vmem:[#allocation7 + $0x178] sm:$0xff] }
  0x43   :  { %335 = vmatpush1.msra.mxu0 %v4650_v12  ;;  %406 = vmatpush1.msra.mxu1 %v4652_v13  ;;  %v4686_v24 = vld [vmem:[#allocation7 + $0x160] sm:$0xff]  ;;  %v4688_v25 = vld [vmem:[#allocation7 + $0x170] sm:$0xff]  ;;  %v4692_v26 = vld [vmem:[#allocation7 + $0x148] sm:$0xff] }
  0x44   :  { %336 = vmatprep.subr.mxu0 %v4656_v14  ;;  %407 = vmatprep.subr.mxu1 %v4658_v15  ;;  %v4694_v27 = vld [vmem:[#allocation7 + $0x158] sm:$0xff]  ;;  %v4698_v28 = vld [vmem:[#allocation7 + $0x140] sm:$0xff]  ;;  %v4700_v29 = vld [vmem:[#allocation7 + $0x150] sm:$0xff] }
  0x45   :  { %337 = vmatpush1.msra.mxu0 %v4662_v16  ;;  %408 = vmatpush1.msra.mxu1 %v4664_v17  ;;  %v4704_v30 = vld [vmem:[#allocation7 + $0x128] sm:$0xff]  ;;  %v4706_v31 = vld [vmem:[#allocation7 + $0x138] sm:$0xff]  ;;  %v4710_v32 = vld [vmem:[#allocation7 + $0x120] sm:$0xff] }
  0x46   :  { %338 = vmatprep.subr.mxu0 %v4668_v18  ;;  %409 = vmatprep.subr.mxu1 %v4670_v19  ;;  %v4712_v33 = vld [vmem:[#allocation7 + $0x130] sm:$0xff]  ;;  %v4716_v34 = vld [vmem:[#allocation7 + $0x108] sm:$0xff]  ;;  %v4718_v35 = vld [vmem:[#allocation7 + $0x118] sm:$0xff] }
  0x47   :  { %339 = vmatpush1.msra.mxu0 %v4674_v20  ;;  %410 = vmatpush1.msra.mxu1 %v4676_v21  ;;  %v4722_v36 = vld [vmem:[#allocation7 + $0x100] sm:$0xff]  ;;  %v4724_v37 = vld [vmem:[#allocation7 + $0x110] sm:$0xff]  ;;  %v4728_v38 = vld [vmem:[#allocation7 + $0xe8] sm:$0xff] }
  0x48   :  { %340 = vmatprep.subr.mxu0 %v4680_v22  ;;  %411 = vmatprep.subr.mxu1 %v4682_v23  ;;  %v4730_v39 = vld [vmem:[#allocation7 + $0xf8] sm:$0xff]  ;;  %v4734_v40 = vld [vmem:[#allocation7 + $0xe0] sm:$0xff]  ;;  %v4736_v41 = vld [vmem:[#allocation7 + $0xf0] sm:$0xff] }
  0x49   :  { %341 = vmatpush1.msra.mxu0 %v4686_v24  ;;  %412 = vmatpush1.msra.mxu1 %v4688_v25  ;;  %v4740_v42 = vld [vmem:[#allocation7 + $0xc8] sm:$0xff]  ;;  %v4742_v43 = vld [vmem:[#allocation7 + $0xd8] sm:$0xff]  ;;  %v4746_v44 = vld [vmem:[#allocation7 + $0xc0] sm:$0xff] }
  0x4a   :  { %342 = vmatprep.subr.mxu0 %v4692_v26  ;;  %413 = vmatprep.subr.mxu1 %v4694_v27  ;;  %v4748_v45 = vld [vmem:[#allocation7 + $0xd0] sm:$0xff]  ;;  %v4752_v46 = vld [vmem:[#allocation7 + $0xa8] sm:$0xff]  ;;  %v4754_v47 = vld [vmem:[#allocation7 + $0xb8] sm:$0xff] }
  0x4b   :  { %343 = vmatpush1.msra.mxu0 %v4698_v28  ;;  %414 = vmatpush1.msra.mxu1 %v4700_v29  ;;  %v4758_v48 = vld [vmem:[#allocation7 + $0xa0] sm:$0xff]  ;;  %v4760_v49 = vld [vmem:[#allocation7 + $0xb0] sm:$0xff]  ;;  %v4764_v50 = vld [vmem:[#allocation7 + $0x88] sm:$0xff] }
  0x4c   :  { %344 = vmatprep.subr.mxu0 %v4704_v30  ;;  %415 = vmatprep.subr.mxu1 %v4706_v31  ;;  %6927 = vst [vmem:[#allocation18_spill] sm:$0xff] %v4764_v50  ;;  %v4766_v51 = vld [vmem:[#allocation7 + $0x98] sm:$0xff]  ;;  %v4770_v52 = vld [vmem:[#allocation7 + $0x80] sm:$0xff]  ;;  %v4772_v53 = vld [vmem:[#allocation7 + $0x90] sm:$0xff] }
  0x4d   :  { %345 = vmatpush1.msra.mxu0 %v4710_v32  ;;  %416 = vmatpush1.msra.mxu1 %v4712_v33  ;;  %6928 = vst [vmem:[#allocation19_spill] sm:$0xff] %v4772_v53  ;;  %v4776_v54 = vld [vmem:[#allocation7 + $0x68] sm:$0xff]  ;;  %v4778_v55 = vld [vmem:[#allocation7 + $0x78] sm:$0xff]  ;;  %v4782_v56 = vld [vmem:[#allocation7 + $0x60] sm:$0xff] }
  0x4e   :  { %346 = vmatprep.subr.mxu0 %v4716_v34  ;;  %417 = vmatprep.subr.mxu1 %v4718_v35  ;;  %6929 = vst [vmem:[#allocation20_spill] sm:$0xff] %v4776_v54  ;;  %6930 = vst [vmem:[#allocation21_spill] sm:$0xff] %v4778_v55  ;;  %v4784_v57 = vld [vmem:[#allocation7 + $0x70] sm:$0xff]  ;;  %v4788_v58 = vld [vmem:[#allocation7 + $0x48] sm:$0xff] }
  0x4f   :  { %347 = vmatpush1.msra.mxu0 %v4722_v36  ;;  %418 = vmatpush1.msra.mxu1 %v4724_v37  ;;  %6931 = vst [vmem:[#allocation22_spill] sm:$0xff] %v4782_v56  ;;  %6932 = vst [vmem:[#allocation23_spill] sm:$0xff] %v4784_v57  ;;  %v4790_v59 = vld [vmem:[#allocation7 + $0x58] sm:$0xff]  ;;  %v4794_v60 = vld [vmem:[#allocation7 + $0x40] sm:$0xff] }
  0x50   :  { %348 = vmatprep.subr.mxu0 %v4728_v38  ;;  %419 = vmatprep.subr.mxu1 %v4730_v39  ;;  %6933 = vst [vmem:[#allocation24_spill] sm:$0xff] %v4788_v58  ;;  %6934 = vst [vmem:[#allocation25_spill] sm:$0xff] %v4790_v59  ;;  %v4796_v61 = vld [vmem:[#allocation7 + $0x50] sm:$0xff]  ;;  %v4800_v62 = vld [vmem:[#allocation7 + $0x28] sm:$0xff] }
  0x51   :  { %349 = vmatpush1.msra.mxu0 %v4734_v40  ;;  %420 = vmatpush1.msra.mxu1 %v4736_v41  ;;  %6935 = vst [vmem:[#allocation26_spill] sm:$0xff] %v4794_v60  ;;  %6936 = vst [vmem:[#allocation27_spill] sm:$0xff] %v4796_v61  ;;  %v4802_v63 = vld [vmem:[#allocation7 + $0x38] sm:$0xff]  ;;  %v4806_v1 = vld [vmem:[#allocation7 + $0x20] sm:$0xff] }
  0x52   :  { %350 = vmatprep.subr.mxu0 %v4740_v42  ;;  %421 = vmatprep.subr.mxu1 %v4742_v43  ;;  %6937 = vst [vmem:[#allocation28_spill] sm:$0xff] %v4800_v62  ;;  %6938 = vst [vmem:[#allocation29_spill] sm:$0xff] %v4802_v63  ;;  %v4808_v2 = vld [vmem:[#allocation7 + $0x30] sm:$0xff]  ;;  %v4812_v3 = vld [vmem:[#allocation7 + $0x8] sm:$0xff] }
  0x53   :  { %351 = vmatpush1.msra.mxu0 %v4746_v44  ;;  %422 = vmatpush1.msra.mxu1 %v4748_v45  ;;  %6939 = vst [vmem:[#allocation30_spill] sm:$0xff] %v4806_v1  ;;  %6940 = vst [vmem:[#allocation31_spill] sm:$0xff] %v4808_v2  ;;  %v4814_v4 = vld [vmem:[#allocation7 + $0x18] sm:$0xff]  ;;  %v4818_v5 = vld [vmem:[#allocation7] sm:$0xff] }
  0x54   :  { %352 = vmatprep.subr.mxu0 %v4752_v46  ;;  %423 = vmatprep.subr.mxu1 %v4754_v47  ;;  %6941 = vst [vmem:[#allocation32_spill] sm:$0xff] %v4812_v3  ;;  %6942 = vst [vmem:[#allocation33_spill] sm:$0xff] %v4814_v4  ;;  %v4822_v0 = vld [vmem:[#allocation7 + $0x10] sm:$0xff] }
  0x55   :  { %353 = vmatpush1.msra.mxu0 %v4758_v48  ;;  %424 = vmatpush1.msra.mxu1 %v4760_v49  ;;  %6943 = vst [vmem:[#allocation34_spill] sm:$0xff] %v4818_v5  ;;  %6944 = vst [vmem:[#allocation35_spill] sm:$0xff] %v4822_v0 }
  0x56   :  { %354 = vmatprep.subr.mxu0 %v4764_v50  ;;  %425 = vmatprep.subr.mxu1 %v4766_v51 }
  0x57   :  { %355 = vmatpush1.msra.mxu0 %v4770_v52  ;;  %426 = vmatpush1.msra.mxu1 %v4772_v53 }
  0x58   :  { %356 = vmatprep.subr.mxu0 %v4776_v54  ;;  %427 = vmatprep.subr.mxu1 %v4778_v55 }
  0x59   :  { %357 = vmatpush1.msra.mxu0 %v4782_v56  ;;  %428 = vmatpush1.msra.mxu1 %v4784_v57 }
  0x5a   :  { %358 = vmatprep.subr.mxu0 %v4788_v58  ;;  %429 = vmatprep.subr.mxu1 %v4790_v59 }
  0x5b   :  { %359 = vmatpush1.msra.mxu0 %v4794_v60  ;;  %430 = vmatpush1.msra.mxu1 %v4796_v61  ;;  %v6945_v61 = vmov 0.0  }
  0x5c   :  { %360 = vmatprep.subr.mxu0 %v4800_v62  ;;  %431 = vmatprep.subr.mxu1 %v4802_v63 }
  0x5d   :  { %361 = vmatpush1.msra.mxu0 %v4806_v1  ;;  %432 = vmatpush1.msra.mxu1 %v4808_v2 }
  0x5e   :  { %362 = vmatprep.subr.mxu0 %v4812_v3  ;;  %433 = vmatprep.subr.mxu1 %v4814_v4 }
  0x5f   :  { %363 = vmatpush1.msra.mxu0 %v4818_v5  ;;  %396 = vmatprep.mubr.f32.mxu0 %v6945_v61 }
  0x60   :  { %434 = vmatpush1.msra.mxu1 %v4822_v0  ;;  %467 = vmatprep.mubr.f32.mxu1 %v6945_v61 }
  0x61   :  { %397 = vmatmul.mubr.f32.vlgmr.msra.gmra.mxu0 %v6945_v61  ;;  %468 = vmatmul.mubr.f32.vlgmr.msra.gmra.mxu1 %v6945_v61 }
  0x62   :  { %503 = vmatprep.subr.mxu0 %v4634_v6  ;;  %574 = vmatprep.subr.mxu1 %v4636_v7 }
  0x63   :  { %504 = vmatpush1.msra.mxu0 %v4638_v8  ;;  %575 = vmatpush1.msra.mxu1 %v4640_v9 }
  0x64   :  { %505 = vmatprep.subr.mxu0 %v4644_v10  ;;  %576 = vmatprep.subr.mxu1 %v4646_v11 }
  0x65   :  { %506 = vmatpush1.msra.mxu0 %v4650_v12  ;;  %577 = vmatpush1.msra.mxu1 %v4652_v13 }
  0x66   :  { %507 = vmatprep.subr.mxu0 %v4656_v14  ;;  %578 = vmatprep.subr.mxu1 %v4658_v15 }
  0x67   :  { %508 = vmatpush1.msra.mxu0 %v4662_v16  ;;  %579 = vmatpush1.msra.mxu1 %v4664_v17 }
  0x68   :  { %509 = vmatprep.subr.mxu0 %v4668_v18  ;;  %580 = vmatprep.subr.mxu1 %v4670_v19 }
  0x69   :  { %510 = vmatpush1.msra.mxu0 %v4674_v20  ;;  %581 = vmatpush1.msra.mxu1 %v4676_v21 }
  0x6a   :  { %511 = vmatprep.subr.mxu0 %v4680_v22  ;;  %582 = vmatprep.subr.mxu1 %v4682_v23 }
  0x6b   :  { %512 = vmatpush1.msra.mxu0 %v4686_v24  ;;  %583 = vmatpush1.msra.mxu1 %v4688_v25 }
  0x6c   :  { %513 = vmatprep.subr.mxu0 %v4692_v26  ;;  %584 = vmatprep.subr.mxu1 %v4694_v27 }
  0x6d   :  { %514 = vmatpush1.msra.mxu0 %v4698_v28  ;;  %585 = vmatpush1.msra.mxu1 %v4700_v29 }
  0x6e   :  { %515 = vmatprep.subr.mxu0 %v4704_v30  ;;  %586 = vmatprep.subr.mxu1 %v4706_v31 }
  0x6f   :  { %516 = vmatpush1.msra.mxu0 %v4710_v32  ;;  %587 = vmatpush1.msra.mxu1 %v4712_v33 }
  0x70   :  { %517 = vmatprep.subr.mxu0 %v4716_v34  ;;  %588 = vmatprep.subr.mxu1 %v4718_v35 }
  0x71   :  { %518 = vmatpush1.msra.mxu0 %v4722_v36  ;;  %589 = vmatpush1.msra.mxu1 %v4724_v37 }
  0x72   :  { %519 = vmatprep.subr.mxu0 %v4728_v38  ;;  %590 = vmatprep.subr.mxu1 %v4730_v39 }
  0x73   :  { %520 = vmatpush1.msra.mxu0 %v4734_v40  ;;  %591 = vmatpush1.msra.mxu1 %v4736_v41 }
  0x74   :  { %521 = vmatprep.subr.mxu0 %v4740_v42  ;;  %592 = vmatprep.subr.mxu1 %v4742_v43 }
  0x75   :  { %522 = vmatpush1.msra.mxu0 %v4746_v44  ;;  %593 = vmatpush1.msra.mxu1 %v4748_v45 }
  0x76   :  { %523 = vmatprep.subr.mxu0 %v4752_v46  ;;  %594 = vmatprep.subr.mxu1 %v4754_v47 }
  0x77   :  { %524 = vmatpush1.msra.mxu0 %v4758_v48  ;;  %595 = vmatpush1.msra.mxu1 %v4760_v49 }
  0x78   :  { %525 = vmatprep.subr.mxu0 %v4764_v50  ;;  %596 = vmatprep.subr.mxu1 %v4766_v51  ;;  %v6946_v50 = vld [vmem:[#allocation27_spill] sm:$0xff] }
  0x79   :  { %526 = vmatpush1.msra.mxu0 %v4770_v52  ;;  %597 = vmatpush1.msra.mxu1 %v4772_v53 }
  0x7a   :  { %527 = vmatprep.subr.mxu0 %v4776_v54  ;;  %598 = vmatprep.subr.mxu1 %v4778_v55 }
  0x7b   :  { %528 = vmatpush1.msra.mxu0 %v4782_v56  ;;  %599 = vmatpush1.msra.mxu1 %v4784_v57 }
  0x7c   :  { %529 = vmatprep.subr.mxu0 %v4788_v58  ;;  %600 = vmatprep.subr.mxu1 %v4790_v59 }
  0x7d   :  { %530 = vmatpush1.msra.mxu0 %v4794_v60  ;;  %601 = vmatpush1.msra.mxu1 %v6946_v50 }
  0x7e   :  { %531 = vmatprep.subr.mxu0 %v4800_v62  ;;  %602 = vmatprep.subr.mxu1 %v4802_v63  ;;  %v102_v63 = vlaneseq }
  0x7f   :  { %532 = vmatpush1.msra.mxu0 %v4806_v1  ;;  %603 = vmatpush1.msra.mxu1 %v4808_v2 }
  0x80   :  { %533 = vmatprep.subr.mxu0 %v4812_v3  ;;  %604 = vmatprep.subr.mxu1 %v4814_v4  ;;  %v4900_v1 = vshrl.u32 %v102_v63, 7  ;;  %v100_v4 = vld [vmem:[%s6670_s2] sm:$0xf] }
  0x81   :  { %534 = vmatpush1.msra.mxu0 %v4818_v5  ;;  %567 = vmatprep.mubr.f32.mxu0 %v6945_v61 }
  0x82   :  { %605 = vmatpush1.msra.mxu1 %v4822_v0  ;;  %638 = vmatprep.mubr.f32.mxu1 %v6945_v61  ;;  %6947 = vst [vmem:[#allocation36_spill] sm:$0xff] %v4900_v1  ;;  %v6716_v2 = vsub.s32 0, %v4900_v1  ;;  %v6719_v5 = vsub.s32 1, %v4900_v1  ;;  %v6724_v59 = vsub.s32 3, %v4900_v1 }
  0x83   :  { %674 = vmatprep.subr.mxu0 %v4634_v6  ;;  %745 = vmatprep.subr.mxu1 %v4636_v7 }
  0x84   :  { %v105_v0 = vrot.slane %v100_v4, %v6716_v2  ;;  %v109_v6 = vrot.slane %v100_v4, %v6719_v5 }
  0xff   :  { %v192_v3 = vpop.f32.mrf.mxu0 }
 0x100   :  { %v4911_v7 = vadd.f32 %v192_v3, %v105_v0  ;;  %v263_v63 = vpop.f32.mrf.mxu1  ;;  %v117_v0 = vrot.slane %v100_v4, %v6724_v59  ;;  %v6727_v3 = vsub.s32 2, %v4900_v1 }
 0x101   :  { %v194_v61 = vpop.f32.mrf.mxu0 }
 0x102   :  { %6948 = vst [vmem:[#allocation37_spill] sm:$0xff] %v4911_v7  ;;  %v4913_v50 = vadd.f32 %v194_v61, %v109_v6  ;;  %v265_v57 = vpop.f32.mrf.mxu1 }
 0x103   :  { %v4921_v61 = vadd.f32 %v265_v57, %v117_v0 }
 0x104   :  { %6949 = vst [vmem:[#allocation38_spill] sm:$0xff] %v4913_v50 }
 0x121   :  { %v398_v62 = vpop.f32.mrf.mxu0  ;;  %v469_v2 = vpop.f32.mrf.mxu1 }
 0x122   :  { %v474_v60 = vadd.f32 %v398_v62, %v4911_v7  ;;  %v113_v62 = vrot.slane %v100_v4, %v6727_v3 }
 0x123   :  { %v400_v58 = vpop.f32.mrf.mxu0  ;;  %v471_v6 = vpop.f32.mrf.mxu1 }
 0x124   :  { %v3987_v56 = vmul.f32 -1.442695, %v474_v60  ;;  %v475_v55 = vadd.f32 %v400_v58, %v4913_v50  ;;  %v477_v5 = vadd.f32 %v471_v6, %v4921_v61  ;;  %v4926_v60 = vadd.f32 %v263_v63, %v113_v62 }
 0x126   :  { %4051 = vpow2.f32 %v3987_v56  ;;  %v3988_v54 = vmul.f32 -1.442695, %v475_v55  ;;  %v3989_v58 = vmul.f32 -1.442695, %v477_v5  ;;  %v476_v55 = vadd.f32 %v469_v2, %v4926_v60 }
 0x128   :  { %4053 = vpow2.f32 %v3988_v54 }
 0x129   :  { %4055 = vpow2.f32 %v3989_v58  ;;  %v6956_v58 = vld [vmem:[#allocation24_spill] sm:$0xff] }
 0x133   :  { %v4052_v56 = vpop.eup %4051 }
 0x134   :  { %v481_v50 = vadd.f32 1.0, %v4052_v56  ;;  %v6957_v56 = vld [vmem:[#allocation25_spill] sm:$0xff] }
 0x135   :  { %v4054_v7 = vpop.eup %4053 }
 0x136   :  { %4057 = vrcp.f32 %v481_v50  ;;  %v487_v54 = vadd.f32 1.0, %v4054_v7  ;;  %v4056_v57 = vpop.eup %4055  ;;  %v6951_v7 = vld [vmem:[#allocation18_spill] sm:$0xff]  ;;  %v6952_v50 = vld [vmem:[#allocation20_spill] sm:$0xff] }
 0x137   :  { %4059 = vtanh.f32 %v476_v55  ;;  %v494_v4 = vadd.f32 1.0, %v4056_v57  ;;  %v6958_v55 = vld [vmem:[#allocation26_spill] sm:$0xff]  ;;  %v6960_v57 = vld [vmem:[#allocation28_spill] sm:$0xff] }
 0x138   :  { %4061 = vrcp.f32 %v487_v54  ;;  %v6959_v54 = vld [vmem:[#allocation27_spill] sm:$0xff] }
 0x139   :  { %4063 = vrcp.f32 %v494_v4  ;;  %v6962_v4 = vld [vmem:[#allocation30_spill] sm:$0xff] }
 0x143   :  { %v4058_v0 = vpop.eup %4057 }
 0x144   :  { %v4060_v59 = vpop.eup %4059 }
 0x145   :  { %v4062_v1 = vpop.eup %4061  ;;  %v498_v6 = vmul.f32 %v4060_v59, %v4058_v0  ;;  %v6953_v59 = vld [vmem:[#allocation21_spill] sm:$0xff] }
 0x146   :  { %v497_v3 = vmul.f32 0.0, %v4062_v1  ;;  %v4064_v2 = vpop.eup %4063  ;;  %v6954_v1 = vld [vmem:[#allocation22_spill] sm:$0xff]  ;;  %v6961_v0 = vld [vmem:[#allocation29_spill] sm:$0xff] }
 0x148   :  { %v4929_v63 = vadd.f32 %v498_v6, %v497_v3  ;;  %v6955_v3 = vld [vmem:[#allocation23_spill] sm:$0xff] }
 0x149   :  { %v6963_v6 = vld [vmem:[#allocation31_spill] sm:$0xff] }
 0x14a   :  { %4065 = vtanh.f32 %v4929_v63 }
 0x157   :  { %v4066_v5 = vpop.eup %4065 }
 0x158   :  { %v4932_v62 = vmul.f32 %v4066_v5, %v4064_v2  ;;  %v6964_v2 = vld [vmem:[#allocation32_spill] sm:$0xff]  ;;  %v6965_v5 = vld [vmem:[#allocation33_spill] sm:$0xff] }
 0x15a   :  { %6950 = vst [vmem:[#allocation39_spill] sm:$0xff] %v4932_v62  ;;  %568 = vmatmul.mubr.f32.vlgmr.msra.gmra.mxu0 %v4932_v62  ;;  %639 = vmatmul.mubr.f32.vlgmr.msra.gmra.mxu1 %v4932_v62  ;;  %v6966_v62 = vld [vmem:[#allocation34_spill] sm:$0xff] }
 0x15b   :  { %675 = vmatpush1.msra.mxu0 %v4638_v8  ;;  %746 = vmatpush1.msra.mxu1 %v4640_v9 }
 0x15c   :  { %676 = vmatprep.subr.mxu0 %v4644_v10  ;;  %747 = vmatprep.subr.mxu1 %v4646_v11 }
 0x15d   :  { %677 = vmatpush1.msra.mxu0 %v4650_v12  ;;  %748 = vmatpush1.msra.mxu1 %v4652_v13 }
 0x15e   :  { %678 = vmatprep.subr.mxu0 %v4656_v14  ;;  %749 = vmatprep.subr.mxu1 %v4658_v15 }
 0x15f   :  { %679 = vmatpush1.msra.mxu0 %v4662_v16  ;;  %750 = vmatpush1.msra.mxu1 %v4664_v17 }
 0x160   :  { %680 = vmatprep.subr.mxu0 %v4668_v18  ;;  %751 = vmatprep.subr.mxu1 %v4670_v19 }
 0x161   :  { %681 = vmatpush1.msra.mxu0 %v4674_v20  ;;  %752 = vmatpush1.msra.mxu1 %v4676_v21 }
 0x162   :  { %682 = vmatprep.subr.mxu0 %v4680_v22  ;;  %753 = vmatprep.subr.mxu1 %v4682_v23 }
 0x163   :  { %683 = vmatpush1.msra.mxu0 %v4686_v24  ;;  %754 = vmatpush1.msra.mxu1 %v4688_v25 }
 0x164   :  { %684 = vmatprep.subr.mxu0 %v4692_v26  ;;  %755 = vmatprep.subr.mxu1 %v4694_v27 }
 0x165   :  { %685 = vmatpush1.msra.mxu0 %v4698_v28  ;;  %756 = vmatpush1.msra.mxu1 %v4700_v29 }
 0x166   :  { %686 = vmatprep.subr.mxu0 %v4704_v30  ;;  %757 = vmatprep.subr.mxu1 %v4706_v31 }
 0x167   :  { %687 = vmatpush1.msra.mxu0 %v4710_v32  ;;  %758 = vmatpush1.msra.mxu1 %v4712_v33 }
 0x168   :  { %688 = vmatprep.subr.mxu0 %v4716_v34  ;;  %759 = vmatprep.subr.mxu1 %v4718_v35 }
 0x169   :  { %689 = vmatpush1.msra.mxu0 %v4722_v36  ;;  %760 = vmatpush1.msra.mxu1 %v4724_v37 }
 0x16a   :  { %690 = vmatprep.subr.mxu0 %v4728_v38  ;;  %761 = vmatprep.subr.mxu1 %v4730_v39 }
 0x16b   :  { %691 = vmatpush1.msra.mxu0 %v4734_v40  ;;  %762 = vmatpush1.msra.mxu1 %v4736_v41 }
 0x16c   :  { %692 = vmatprep.subr.mxu0 %v4740_v42  ;;  %763 = vmatprep.subr.mxu1 %v4742_v43 }
 0x16d   :  { %693 = vmatpush1.msra.mxu0 %v4746_v44  ;;  %764 = vmatpush1.msra.mxu1 %v4748_v45 }
 0x16e   :  { %694 = vmatprep.subr.mxu0 %v4752_v46  ;;  %765 = vmatprep.subr.mxu1 %v4754_v47 }
 0x16f   :  { %695 = vmatpush1.msra.mxu0 %v4758_v48  ;;  %766 = vmatpush1.msra.mxu1 %v4760_v49 }
 0x170   :  { %696 = vmatprep.subr.mxu0 %v6951_v7  ;;  %767 = vmatprep.subr.mxu1 %v4766_v51 }
 0x171   :  { %697 = vmatpush1.msra.mxu0 %v4770_v52  ;;  %768 = vmatpush1.msra.mxu1 %v4772_v53 }
 0x172   :  { %698 = vmatprep.subr.mxu0 %v6952_v50  ;;  %769 = vmatprep.subr.mxu1 %v6953_v59 }
 0x173   :  { %699 = vmatpush1.msra.mxu0 %v6954_v1  ;;  %770 = vmatpush1.msra.mxu1 %v6955_v3 }
 0x174   :  { %700 = vmatprep.subr.mxu0 %v6956_v58  ;;  %771 = vmatprep.subr.mxu1 %v6957_v56  ;;  %v6967_v58 = vmov 0.0   ;;  %v6968_v56 = vld [vmem:[#allocation35_spill] sm:$0xff] }
 0x175   :  { %701 = vmatpush1.msra.mxu0 %v6958_v55  ;;  %772 = vmatpush1.msra.mxu1 %v6959_v54  ;;  %v6969_v54 = vld [vmem:[#allocation16_spill] sm:$0xff] }
 0x176   :  { %702 = vmatprep.subr.mxu0 %v6960_v57  ;;  %773 = vmatprep.subr.mxu1 %v6961_v0  ;;  %v6970_v57 = vld [vmem:[#allocation17_spill] sm:$0xff] }
 0x177   :  { %703 = vmatpush1.msra.mxu0 %v6962_v4  ;;  %774 = vmatpush1.msra.mxu1 %v6963_v6  ;;  %v6971_v4 = vld [vmem:[#allocation37_spill] sm:$0xff] }
 0x178   :  { %704 = vmatprep.subr.mxu0 %v6964_v2  ;;  %775 = vmatprep.subr.mxu1 %v6965_v5  ;;  %v6972_v2 = vld [vmem:[#allocation38_spill] sm:$0xff] }
 0x179   :  { %705 = vmatpush1.msra.mxu0 %v6966_v62  ;;  %738 = vmatprep.mubr.f32.mxu0 %v6967_v58 }
 0x17a   :  { %776 = vmatpush1.msra.mxu1 %v6968_v56  ;;  %809 = vmatprep.mubr.f32.mxu1 %v6967_v58 }
 0x17b   :  { %845 = vmatprep.subr.mxu0 %v6969_v54  ;;  %916 = vmatprep.subr.mxu1 %v6970_v57 }
 0x21a   :  { %v569_v0 = vpop.f32.mrf.mxu0  ;;  %v640_v5 = vpop.f32.mrf.mxu1 }
 0x21b   :  { %v645_v55 = vadd.f32 %v569_v0, %v6971_v4  ;;  %v647_v54 = vadd.f32 %v640_v5, %v4926_v60  ;;  %v6980_v5 = vld [vmem:[#allocation25_spill] sm:$0xff] }
 0x21c   :  { %v571_v6 = vpop.f32.mrf.mxu0  ;;  %v642_v59 = vpop.f32.mrf.mxu1 }
 0x21d   :  { %v3990_v3 = vmul.f32 -1.442695, %v645_v55  ;;  %v646_v1 = vadd.f32 %v571_v6, %v6972_v2  ;;  %v648_v56 = vadd.f32 %v642_v59, %v4921_v61 }
 0x21f   :  { %4067 = vpow2.f32 %v3990_v3  ;;  %v3991_v62 = vmul.f32 -1.442695, %v646_v1  ;;  %v3992_v50 = vmul.f32 -1.442695, %v648_v56 }
 0x221   :  { %4069 = vpow2.f32 %v3991_v62 }
 0x222   :  { %4071 = vpow2.f32 %v3992_v50 }
 0x22c   :  { %v4068_v58 = vpop.eup %4067 }
 0x22d   :  { %v652_v53 = vadd.f32 1.0, %v4068_v58 }
 0x22e   :  { %v4070_v57 = vpop.eup %4069 }
 0x22f   :  { %4073 = vrcp.f32 %v652_v53  ;;  %v658_v0 = vadd.f32 1.0, %v4070_v57  ;;  %v4072_v55 = vpop.eup %4071  ;;  %v6974_v53 = vld [vmem:[#allocation19_spill] sm:$0xff]  ;;  %v6977_v57 = vld [vmem:[#allocation22_spill] sm:$0xff] }
 0x230   :  { %4075 = vtanh.f32 %v647_v54  ;;  %v665_v1 = vadd.f32 1.0, %v4072_v55  ;;  %v6976_v54 = vld [vmem:[#allocation21_spill] sm:$0xff]  ;;  %v6982_v55 = vld [vmem:[#allocation27_spill] sm:$0xff] }
 0x231   :  { %4077 = vrcp.f32 %v658_v0  ;;  %v6981_v0 = vld [vmem:[#allocation26_spill] sm:$0xff] }
 0x232   :  { %4079 = vrcp.f32 %v665_v1  ;;  %v6985_v1 = vld [vmem:[#allocation30_spill] sm:$0xff] }
 0x23c   :  { %v4074_v6 = vpop.eup %4073 }
 0x23d   :  { %v4076_v3 = vpop.eup %4075 }
 0x23e   :  { %v4078_v2 = vpop.eup %4077  ;;  %v669_v62 = vmul.f32 %v4076_v3, %v4074_v6  ;;  %v6983_v6 = vld [vmem:[#allocation28_spill] sm:$0xff]  ;;  %v6984_v3 = vld [vmem:[#allocation29_spill] sm:$0xff] }
 0x23f   :  { %v668_v4 = vmul.f32 %v4078_v2, %v4929_v63  ;;  %v4080_v58 = vpop.eup %4079  ;;  %v6975_v63 = vld [vmem:[#allocation20_spill] sm:$0xff] }
 0x240   :  { %v6979_v2 = vld [vmem:[#allocation24_spill] sm:$0xff] }
 0x241   :  { %v5007_v59 = vadd.f32 %v669_v62, %v668_v4  ;;  %v6978_v4 = vld [vmem:[#allocation23_spill] sm:$0xff] }
 0x242   :  { %v6986_v62 = vld [vmem:[#allocation31_spill] sm:$0xff] }
 0x243   :  { %4081 = vtanh.f32 %v5007_v59 }
 0x250   :  { %v4082_v56 = vpop.eup %4081 }
 0x251   :  { %v5010_v50 = vmul.f32 %v4082_v56, %v4080_v58  ;;  %v6987_v58 = vld [vmem:[#allocation32_spill] sm:$0xff]  ;;  %v6988_v56 = vld [vmem:[#allocation33_spill] sm:$0xff] }
 0x253   :  { %6973 = vst [vmem:[#allocation18_spill] sm:$0xff] %v5010_v50  ;;  %739 = vmatmul.mubr.f32.vlgmr.msra.gmra.mxu0 %v5010_v50  ;;  %810 = vmatmul.mubr.f32.vlgmr.msra.gmra.mxu1 %v5010_v50  ;;  %v6989_v50 = vld [vmem:[#allocation34_spill] sm:$0xff] }
 0x254   :  { %846 = vmatpush1.msra.mxu0 %v4638_v8  ;;  %917 = vmatpush1.msra.mxu1 %v4640_v9 }
 0x255   :  { %847 = vmatprep.subr.mxu0 %v4644_v10  ;;  %918 = vmatprep.subr.mxu1 %v4646_v11 }
 0x256   :  { %848 = vmatpush1.msra.mxu0 %v4650_v12  ;;  %919 = vmatpush1.msra.mxu1 %v4652_v13 }
 0x257   :  { %849 = vmatprep.subr.mxu0 %v4656_v14  ;;  %920 = vmatprep.subr.mxu1 %v4658_v15 }
 0x258   :  { %850 = vmatpush1.msra.mxu0 %v4662_v16  ;;  %921 = vmatpush1.msra.mxu1 %v4664_v17 }
 0x259   :  { %851 = vmatprep.subr.mxu0 %v4668_v18  ;;  %922 = vmatprep.subr.mxu1 %v4670_v19 }
 0x25a   :  { %852 = vmatpush1.msra.mxu0 %v4674_v20  ;;  %923 = vmatpush1.msra.mxu1 %v4676_v21 }
 0x25b   :  { %853 = vmatprep.subr.mxu0 %v4680_v22  ;;  %924 = vmatprep.subr.mxu1 %v4682_v23 }
 0x25c   :  { %854 = vmatpush1.msra.mxu0 %v4686_v24  ;;  %925 = vmatpush1.msra.mxu1 %v4688_v25 }
 0x25d   :  { %855 = vmatprep.subr.mxu0 %v4692_v26  ;;  %926 = vmatprep.subr.mxu1 %v4694_v27 }
 0x25e   :  { %856 = vmatpush1.msra.mxu0 %v4698_v28  ;;  %927 = vmatpush1.msra.mxu1 %v4700_v29 }
 0x25f   :  { %857 = vmatprep.subr.mxu0 %v4704_v30  ;;  %928 = vmatprep.subr.mxu1 %v4706_v31 }
 0x260   :  { %858 = vmatpush1.msra.mxu0 %v4710_v32  ;;  %929 = vmatpush1.msra.mxu1 %v4712_v33 }
 0x261   :  { %859 = vmatprep.subr.mxu0 %v4716_v34  ;;  %930 = vmatprep.subr.mxu1 %v4718_v35 }
 0x262   :  { %860 = vmatpush1.msra.mxu0 %v4722_v36  ;;  %931 = vmatpush1.msra.mxu1 %v4724_v37 }
 0x263   :  { %861 = vmatprep.subr.mxu0 %v4728_v38  ;;  %932 = vmatprep.subr.mxu1 %v4730_v39 }
 0x264   :  { %862 = vmatpush1.msra.mxu0 %v4734_v40  ;;  %933 = vmatpush1.msra.mxu1 %v4736_v41 }
 0x265   :  { %863 = vmatprep.subr.mxu0 %v4740_v42  ;;  %934 = vmatprep.subr.mxu1 %v4742_v43 }
 0x266   :  { %864 = vmatpush1.msra.mxu0 %v4746_v44  ;;  %935 = vmatpush1.msra.mxu1 %v4748_v45 }
 0x267   :  { %865 = vmatprep.subr.mxu0 %v4752_v46  ;;  %936 = vmatprep.subr.mxu1 %v4754_v47 }
 0x268   :  { %866 = vmatpush1.msra.mxu0 %v4758_v48  ;;  %937 = vmatpush1.msra.mxu1 %v4760_v49 }
 0x269   :  { %867 = vmatprep.subr.mxu0 %v6951_v7  ;;  %938 = vmatprep.subr.mxu1 %v4766_v51 }
 0x26a   :  { %868 = vmatpush1.msra.mxu0 %v4770_v52  ;;  %939 = vmatpush1.msra.mxu1 %v6974_v53 }
 0x26b   :  { %869 = vmatprep.subr.mxu0 %v6975_v63  ;;  %940 = vmatprep.subr.mxu1 %v6976_v54 }
 0x26c   :  { %870 = vmatpush1.msra.mxu0 %v6977_v57  ;;  %941 = vmatpush1.msra.mxu1 %v6978_v4 }
 0x26d   :  { %871 = vmatprep.subr.mxu0 %v6979_v2  ;;  %942 = vmatprep.subr.mxu1 %v6980_v5  ;;  %v6990_v2 = vmov 0.0   ;;  %v6991_v5 = vld [vmem:[#allocation35_spill] sm:$0xff] }
 0x26e   :  { %872 = vmatpush1.msra.mxu0 %v6981_v0  ;;  %943 = vmatpush1.msra.mxu1 %v6982_v55  ;;  %v6992_v55 = vld [vmem:[#allocation16_spill] sm:$0xff] }
 0x26f   :  { %873 = vmatprep.subr.mxu0 %v6983_v6  ;;  %944 = vmatprep.subr.mxu1 %v6984_v3  ;;  %v6993_v6 = vld [vmem:[#allocation17_spill] sm:$0xff] }
 0x270   :  { %874 = vmatpush1.msra.mxu0 %v6985_v1  ;;  %945 = vmatpush1.msra.mxu1 %v6986_v62  ;;  %v6994_v1 = vld [vmem:[#allocation37_spill] sm:$0xff] }
 0x271   :  { %875 = vmatprep.subr.mxu0 %v6987_v58  ;;  %946 = vmatprep.subr.mxu1 %v6988_v56  ;;  %v6995_v58 = vld [vmem:[#allocation38_spill] sm:$0xff] }
 0x272   :  { %876 = vmatpush1.msra.mxu0 %v6989_v50  ;;  %909 = vmatprep.mubr.f32.mxu0 %v6990_v2 }
 0x273   :  { %947 = vmatpush1.msra.mxu1 %v6991_v5  ;;  %980 = vmatprep.mubr.f32.mxu1 %v6990_v2 }
 0x274   :  { %1016 = vmatprep.subr.mxu0 %v6992_v55  ;;  %1087 = vmatprep.subr.mxu1 %v6993_v6 }
 0x313   :  { %v740_v3 = vpop.f32.mrf.mxu0  ;;  %v811_v56 = vpop.f32.mrf.mxu1 }
 0x314   :  { %v816_v0 = vadd.f32 %v740_v3, %v6994_v1  ;;  %v818_v55 = vadd.f32 %v811_v56, %v4926_v60  ;;  %v5177_v56 = vld [vmem:[#allocation7 + $0x1f0] sm:$0xff] }
 0x315   :  { %v742_v62 = vpop.f32.mrf.mxu0  ;;  %v813_v54 = vpop.f32.mrf.mxu1 }
 0x316   :  { %v3993_v4 = vmul.f32 -1.442695, %v816_v0  ;;  %v817_v57 = vadd.f32 %v742_v62, %v6995_v58  ;;  %v819_v5 = vadd.f32 %v813_v54, %v4921_v61 }
 0x318   :  { %4083 = vpow2.f32 %v3993_v4  ;;  %v3994_v50 = vmul.f32 -1.442695, %v817_v57  ;;  %v3995_v63 = vmul.f32 -1.442695, %v819_v5 }
 0x31a   :  { %4085 = vpow2.f32 %v3994_v50 }
 0x31b   :  { %4087 = vpow2.f32 %v3995_v63 }
 0x325   :  { %v4084_v2 = vpop.eup %4083 }
 0x326   :  { %v823_v53 = vadd.f32 1.0, %v4084_v2 }
 0x327   :  { %v4086_v6 = vpop.eup %4085 }
 0x328   :  { %4089 = vrcp.f32 %v823_v53  ;;  %v829_v3 = vadd.f32 1.0, %v4086_v6  ;;  %v4088_v0 = vpop.eup %4087  ;;  %v5183_v6 = vld [vmem:[#allocation7 + $0x1d8] sm:$0xff] }
 0x329   :  { %4091 = vtanh.f32 %v818_v55  ;;  %v836_v57 = vadd.f32 1.0, %v4088_v0  ;;  %v5180_v55 = vld [vmem:[#allocation7 + $0x1c8] sm:$0xff]  ;;  %v5189_v0 = vld [vmem:[#allocation7 + $0x1d0] sm:$0xff] }
 0x32a   :  { %4093 = vrcp.f32 %v829_v3  ;;  %v5186_v3 = vld [vmem:[#allocation7 + $0x1c0] sm:$0xff] }
 0x32b   :  { %4095 = vrcp.f32 %v836_v57  ;;  %v5198_v57 = vld [vmem:[#allocation7 + $0x1a0] sm:$0xff] }
 0x335   :  { %v4090_v62 = vpop.eup %4089 }
 0x336   :  { %v4092_v4 = vpop.eup %4091 }
 0x337   :  { %v4094_v58 = vpop.eup %4093  ;;  %v840_v50 = vmul.f32 %v4092_v4, %v4090_v62  ;;  %v5192_v62 = vld [vmem:[#allocation7 + $0x1a8] sm:$0xff]  ;;  %v5195_v4 = vld [vmem:[#allocation7 + $0x1b8] sm:$0xff] }
 0x338   :  { %v839_v1 = vmul.f32 %v4094_v58, %v5007_v59  ;;  %v4096_v2 = vpop.eup %4095  ;;  %v5174_v58 = vld [vmem:[#allocation7 + $0x1e0] sm:$0xff] }
 0x33a   :  { %v5085_v54 = vadd.f32 %v840_v50, %v839_v1  ;;  %v5201_v50 = vld [vmem:[#allocation7 + $0x1b0] sm:$0xff] }
 0x33c   :  { %4097 = vtanh.f32 %v5085_v54 }
 0x349   :  { %v4098_v5 = vpop.eup %4097 }
 0x34a   :  { %v5088_v63 = vmul.f32 %v4098_v5, %v4096_v2  ;;  %v5207_v2 = vld [vmem:[#allocation7 + $0x198] sm:$0xff]  ;;  %v5210_v5 = vld [vmem:[#allocation7 + $0x180] sm:$0xff] }
 0x34c   :  { %6996 = vst [vmem:[#allocation16_spill] sm:$0xff] %v5088_v63  ;;  %910 = vmatmul.mubr.f32.vlgmr.msra.gmra.mxu0 %v5088_v63  ;;  %981 = vmatmul.mubr.f32.vlgmr.msra.gmra.mxu1 %v5088_v63  ;;  %v5303_v63 = vld [vmem:[#allocation7 + $0x98] sm:$0xff] }
 0x34d   :  { %1017 = vmatpush1.msra.mxu0 %v4638_v8  ;;  %1088 = vmatpush1.msra.mxu1 %v4640_v9  ;;  %v6997_v8 = vld [vmem:[#allocation19_spill] sm:$0xff]  ;;  %v6998_v9 = vld [vmem:[#allocation20_spill] sm:$0xff] }
 0x34e   :  { %1018 = vmatprep.subr.mxu0 %v4644_v10  ;;  %1089 = vmatprep.subr.mxu1 %v4646_v11  ;;  %v6999_v10 = vld [vmem:[#allocation21_spill] sm:$0xff]  ;;  %v7000_v11 = vld [vmem:[#allocation22_spill] sm:$0xff] }
 0x34f   :  { %1019 = vmatpush1.msra.mxu0 %v4650_v12  ;;  %1090 = vmatpush1.msra.mxu1 %v4652_v13  ;;  %v7001_v12 = vld [vmem:[#allocation23_spill] sm:$0xff]  ;;  %v7002_v13 = vld [vmem:[#allocation24_spill] sm:$0xff] }
 0x350   :  { %1020 = vmatprep.subr.mxu0 %v4656_v14  ;;  %1091 = vmatprep.subr.mxu1 %v4658_v15  ;;  %v7003_v14 = vld [vmem:[#allocation25_spill] sm:$0xff]  ;;  %v7004_v15 = vld [vmem:[#allocation26_spill] sm:$0xff] }
 0x351   :  { %1021 = vmatpush1.msra.mxu0 %v4662_v16  ;;  %1092 = vmatpush1.msra.mxu1 %v4664_v17  ;;  %v7005_v16 = vld [vmem:[#allocation27_spill] sm:$0xff]  ;;  %v7006_v17 = vld [vmem:[#allocation28_spill] sm:$0xff]  ;;  %7025 = vst [vmem:[#allocation26_spill] sm:$0xff] %v5303_v63 }
 0x352   :  { %1022 = vmatprep.subr.mxu0 %v4668_v18  ;;  %1093 = vmatprep.subr.mxu1 %v4670_v19  ;;  %v7007_v18 = vld [vmem:[#allocation29_spill] sm:$0xff]  ;;  %v7008_v19 = vld [vmem:[#allocation30_spill] sm:$0xff] }
 0x353   :  { %1023 = vmatpush1.msra.mxu0 %v4674_v20  ;;  %1094 = vmatpush1.msra.mxu1 %v4676_v21  ;;  %v7009_v20 = vld [vmem:[#allocation31_spill] sm:$0xff]  ;;  %v7010_v21 = vld [vmem:[#allocation32_spill] sm:$0xff] }
 0x354   :  { %1024 = vmatprep.subr.mxu0 %v4680_v22  ;;  %1095 = vmatprep.subr.mxu1 %v4682_v23  ;;  %v7011_v22 = vld [vmem:[#allocation33_spill] sm:$0xff]  ;;  %v7012_v23 = vld [vmem:[#allocation34_spill] sm:$0xff] }
 0x355   :  { %1025 = vmatpush1.msra.mxu0 %v4686_v24  ;;  %1096 = vmatpush1.msra.mxu1 %v4688_v25  ;;  %v7013_v24 = vmov 0.0   ;;  %v7014_v25 = vld [vmem:[#allocation35_spill] sm:$0xff] }
 0x356   :  { %1026 = vmatprep.subr.mxu0 %v4692_v26  ;;  %1097 = vmatprep.subr.mxu1 %v4694_v27  ;;  %v5156_v26 = vld [vmem:[#allocation7 + $0x1e8] sm:$0xff]  ;;  %v5159_v27 = vld [vmem:[#allocation7 + $0x1f8] sm:$0xff] }
 0x357   :  { %1027 = vmatpush1.msra.mxu0 %v4698_v28  ;;  %1098 = vmatpush1.msra.mxu1 %v4700_v29  ;;  %7015 = vst [vmem:[#allocation17_spill] sm:$0xff] %v5156_v26  ;;  %7016 = vst [vmem:[#allocation19_spill] sm:$0xff] %v5159_v27  ;;  %v7017_v29 = vld [vmem:[#allocation37_spill] sm:$0xff] }
 0x358   :  { %1028 = vmatprep.subr.mxu0 %v4704_v30  ;;  %1099 = vmatprep.subr.mxu1 %v4706_v31 }
 0x359   :  { %1029 = vmatpush1.msra.mxu0 %v4710_v32  ;;  %1100 = vmatpush1.msra.mxu1 %v4712_v33  ;;  %v7018_v33 = vld [vmem:[#allocation38_spill] sm:$0xff] }
 0x35a   :  { %1030 = vmatprep.subr.mxu0 %v4716_v34  ;;  %1101 = vmatprep.subr.mxu1 %v4718_v35 }
 0x35b   :  { %1031 = vmatpush1.msra.mxu0 %v4722_v36  ;;  %1102 = vmatpush1.msra.mxu1 %v4724_v37 }
 0x35c   :  { %1032 = vmatprep.subr.mxu0 %v4728_v38  ;;  %1103 = vmatprep.subr.mxu1 %v4730_v39 }
 0x35d   :  { %1033 = vmatpush1.msra.mxu0 %v4734_v40  ;;  %1104 = vmatpush1.msra.mxu1 %v4736_v41 }
 0x35e   :  { %1034 = vmatprep.subr.mxu0 %v4740_v42  ;;  %1105 = vmatprep.subr.mxu1 %v4742_v43 }
 0x35f   :  { %1035 = vmatpush1.msra.mxu0 %v4746_v44  ;;  %1106 = vmatpush1.msra.mxu1 %v4748_v45 }
 0x360   :  { %1036 = vmatprep.subr.mxu0 %v4752_v46  ;;  %1107 = vmatprep.subr.mxu1 %v4754_v47 }
 0x361   :  { %1037 = vmatpush1.msra.mxu0 %v4758_v48  ;;  %1108 = vmatpush1.msra.mxu1 %v4760_v49 }
 0x362   :  { %1038 = vmatprep.subr.mxu0 %v6951_v7  ;;  %1109 = vmatprep.subr.mxu1 %v4766_v51 }
 0x363   :  { %1039 = vmatpush1.msra.mxu0 %v4770_v52  ;;  %1110 = vmatpush1.msra.mxu1 %v6997_v8  ;;  %v5213_v8 = vld [vmem:[#allocation7 + $0x190] sm:$0xff] }
 0x364   :  { %1040 = vmatprep.subr.mxu0 %v6998_v9  ;;  %1111 = vmatprep.subr.mxu1 %v6999_v10  ;;  %v5216_v9 = vld [vmem:[#allocation7 + $0x168] sm:$0xff]  ;;  %v5219_v10 = vld [vmem:[#allocation7 + $0x178] sm:$0xff] }
 0x365   :  { %1041 = vmatpush1.msra.mxu0 %v7000_v11  ;;  %1112 = vmatpush1.msra.mxu1 %v7001_v12  ;;  %v5222_v11 = vld [vmem:[#allocation7 + $0x160] sm:$0xff]  ;;  %v5225_v12 = vld [vmem:[#allocation7 + $0x170] sm:$0xff] }
 0x366   :  { %1042 = vmatprep.subr.mxu0 %v7002_v13  ;;  %1113 = vmatprep.subr.mxu1 %v7003_v14 }
 0x367   :  { %1043 = vmatpush1.msra.mxu0 %v7004_v15  ;;  %1114 = vmatpush1.msra.mxu1 %v7005_v16 }
 0x368   :  { %1044 = vmatprep.subr.mxu0 %v7006_v17  ;;  %1115 = vmatprep.subr.mxu1 %v7007_v18 }
 0x369   :  { %1045 = vmatpush1.msra.mxu0 %v7008_v19  ;;  %1116 = vmatpush1.msra.mxu1 %v7009_v20 }
 0x36a   :  { %1046 = vmatprep.subr.mxu0 %v7010_v21  ;;  %1117 = vmatprep.subr.mxu1 %v7011_v22 }
 0x36b   :  { %1047 = vmatpush1.msra.mxu0 %v7012_v23  ;;  %1080 = vmatprep.mubr.f32.mxu0 %v7013_v24 }
 0x36c   :  { %1118 = vmatpush1.msra.mxu1 %v7014_v25  ;;  %1151 = vmatprep.mubr.f32.mxu1 %v7013_v24 }
 0x36d   :  { %1187 = vmatprep.subr.mxu0 %v5156_v26  ;;  %1258 = vmatprep.subr.mxu1 %v5159_v27 }
 0x40c   :  { %v911_v28 = vpop.f32.mrf.mxu0  ;;  %v982_v35 = vpop.f32.mrf.mxu1 }
 0x40d   :  { %v987_v30 = vadd.f32 %v911_v28, %v7017_v29  ;;  %v989_v41 = vadd.f32 %v982_v35, %v4926_v60  ;;  %v5228_v28 = vld [vmem:[#allocation7 + $0x148] sm:$0xff]  ;;  %v5243_v35 = vld [vmem:[#allocation7 + $0x138] sm:$0xff] }
 0x40e   :  { %v913_v31 = vpop.f32.mrf.mxu0  ;;  %v984_v37 = vpop.f32.mrf.mxu1 }
 0x40f   :  { %v3996_v32 = vmul.f32 -1.442695, %v987_v30  ;;  %v988_v34 = vadd.f32 %v913_v31, %v7018_v33  ;;  %v990_v38 = vadd.f32 %v984_v37, %v4921_v61  ;;  %v5231_v30 = vld [vmem:[#allocation7 + $0x158] sm:$0xff]  ;;  %v5234_v31 = vld [vmem:[#allocation7 + $0x140] sm:$0xff]  ;;  %v5249_v37 = vld [vmem:[#allocation7 + $0x130] sm:$0xff] }
 0x411   :  { %4099 = vpow2.f32 %v3996_v32  ;;  %v3997_v36 = vmul.f32 -1.442695, %v988_v34  ;;  %v3998_v39 = vmul.f32 -1.442695, %v990_v38  ;;  %v5237_v32 = vld [vmem:[#allocation7 + $0x150] sm:$0xff]  ;;  %v5240_v34 = vld [vmem:[#allocation7 + $0x128] sm:$0xff] }
 0x412   :  { %v5252_v38 = vld [vmem:[#allocation7 + $0x108] sm:$0xff] }
 0x413   :  { %4101 = vpow2.f32 %v3997_v36  ;;  %v5246_v36 = vld [vmem:[#allocation7 + $0x120] sm:$0xff] }
 0x414   :  { %4103 = vpow2.f32 %v3998_v39  ;;  %v5255_v39 = vld [vmem:[#allocation7 + $0x118] sm:$0xff] }
 0x41e   :  { %v4100_v40 = vpop.eup %4099 }
 0x41f   :  { %v994_v42 = vadd.f32 1.0, %v4100_v40  ;;  %v5258_v40 = vld [vmem:[#allocation7 + $0x100] sm:$0xff] }
 0x420   :  { %v4102_v43 = vpop.eup %4101 }
 0x421   :  { %4105 = vrcp.f32 %v994_v42  ;;  %v1000_v44 = vadd.f32 1.0, %v4102_v43  ;;  %v4104_v45 = vpop.eup %4103  ;;  %v5264_v42 = vld [vmem:[#allocation7 + $0xe8] sm:$0xff]  ;;  %v5267_v43 = vld [vmem:[#allocation7 + $0xf8] sm:$0xff] }
 0x422   :  { %4107 = vtanh.f32 %v989_v41  ;;  %v1007_v49 = vadd.f32 1.0, %v4104_v45  ;;  %v5261_v41 = vld [vmem:[#allocation7 + $0x110] sm:$0xff] }
 0x423   :  { %4109 = vrcp.f32 %v1000_v44  ;;  %v5270_v44 = vld [vmem:[#allocation7 + $0xe0] sm:$0xff]  ;;  %v5273_v45 = vld [vmem:[#allocation7 + $0xf0] sm:$0xff] }
 0x424   :  { %4111 = vrcp.f32 %v1007_v49  ;;  %v5285_v49 = vld [vmem:[#allocation7 + $0xd0] sm:$0xff] }
 0x42e   :  { %v4106_v46 = vpop.eup %4105 }
 0x42f   :  { %v4108_v47 = vpop.eup %4107 }
 0x430   :  { %v4110_v48 = vpop.eup %4109  ;;  %v1011_v51 = vmul.f32 %v4108_v47, %v4106_v46  ;;  %v5276_v46 = vld [vmem:[#allocation7 + $0xc8] sm:$0xff]  ;;  %v5279_v47 = vld [vmem:[#allocation7 + $0xd8] sm:$0xff] }
 0x431   :  { %v1010_v52 = vmul.f32 %v4110_v48, %v5085_v54  ;;  %v4112_v59 = vpop.eup %4111  ;;  %v5204_v54 = vld [vmem:[#allocation7 + $0x188] sm:$0xff]  ;;  %v5282_v48 = vld [vmem:[#allocation7 + $0xc0] sm:$0xff] }
 0x433   :  { %v5167_v7 = vadd.f32 %v1011_v51, %v1010_v52  ;;  %v5288_v51 = vld [vmem:[#allocation7 + $0xa8] sm:$0xff]  ;;  %v5291_v52 = vld [vmem:[#allocation7 + $0xb8] sm:$0xff] }
 0x434   :  { %7020 = vst [vmem:[#allocation21_spill] sm:$0xff] %v5288_v51  ;;  %7021 = vst [vmem:[#allocation22_spill] sm:$0xff] %v5291_v52 }
 0x435   :  { %4113 = vtanh.f32 %v5167_v7 }
 0x442   :  { %v4114_v53 = vpop.eup %4113 }
 0x443   :  { %v5170_v1 = vmul.f32 %v4114_v53, %v4112_v59  ;;  %v5294_v59 = vld [vmem:[#allocation7 + $0xa0] sm:$0xff]  ;;  %v5297_v53 = vld [vmem:[#allocation7 + $0xb0] sm:$0xff] }
 0x444   :  { %7022 = vst [vmem:[#allocation23_spill] sm:$0xff] %v5294_v59  ;;  %7023 = vst [vmem:[#allocation24_spill] sm:$0xff] %v5297_v53 }
 0x445   :  { %7019 = vst [vmem:[#allocation20_spill] sm:$0xff] %v5170_v1  ;;  %1081 = vmatmul.mubr.f32.vlgmr.msra.gmra.mxu0 %v5170_v1  ;;  %1152 = vmatmul.mubr.f32.vlgmr.msra.gmra.mxu1 %v5170_v1  ;;  %v5300_v1 = vld [vmem:[#allocation7 + $0x88] sm:$0xff] }
 0x446   :  { %1188 = vmatpush1.msra.mxu0 %v5174_v58  ;;  %1259 = vmatpush1.msra.mxu1 %v5177_v56  ;;  %7024 = vst [vmem:[#allocation25_spill] sm:$0xff] %v5300_v1 }
 0x447   :  { %1189 = vmatprep.subr.mxu0 %v5180_v55  ;;  %1260 = vmatprep.subr.mxu1 %v5183_v6 }
 0x448   :  { %1190 = vmatpush1.msra.mxu0 %v5186_v3  ;;  %1261 = vmatpush1.msra.mxu1 %v5189_v0 }
 0x449   :  { %1191 = vmatprep.subr.mxu0 %v5192_v62  ;;  %1262 = vmatprep.subr.mxu1 %v5195_v4 }
 0x44a   :  { %1192 = vmatpush1.msra.mxu0 %v5198_v57  ;;  %1263 = vmatpush1.msra.mxu1 %v5201_v50 }
 0x44b   :  { %1193 = vmatprep.subr.mxu0 %v5204_v54  ;;  %1264 = vmatprep.subr.mxu1 %v5207_v2 }
 0x44c   :  { %1194 = vmatpush1.msra.mxu0 %v5210_v5  ;;  %1265 = vmatpush1.msra.mxu1 %v5213_v8 }
 0x44d   :  { %1195 = vmatprep.subr.mxu0 %v5216_v9  ;;  %1266 = vmatprep.subr.mxu1 %v5219_v10 }
 0x44e   :  { %1196 = vmatpush1.msra.mxu0 %v5222_v11  ;;  %1267 = vmatpush1.msra.mxu1 %v5225_v12 }
 0x44f   :  { %1197 = vmatprep.subr.mxu0 %v5228_v28  ;;  %1268 = vmatprep.subr.mxu1 %v5231_v30 }
 0x450   :  { %1198 = vmatpush1.msra.mxu0 %v5234_v31  ;;  %1269 = vmatpush1.msra.mxu1 %v5237_v32 }
 0x451   :  { %1199 = vmatprep.subr.mxu0 %v5240_v34  ;;  %1270 = vmatprep.subr.mxu1 %v5243_v35 }
 0x452   :  { %1200 = vmatpush1.msra.mxu0 %v5246_v36  ;;  %1271 = vmatpush1.msra.mxu1 %v5249_v37 }
 0x453   :  { %1201 = vmatprep.subr.mxu0 %v5252_v38  ;;  %1272 = vmatprep.subr.mxu1 %v5255_v39 }
 0x454   :  { %1202 = vmatpush1.msra.mxu0 %v5258_v40  ;;  %1273 = vmatpush1.msra.mxu1 %v5261_v41 }
 0x455   :  { %1203 = vmatprep.subr.mxu0 %v5264_v42  ;;  %1274 = vmatprep.subr.mxu1 %v5267_v43 }
 0x456   :  { %1204 = vmatpush1.msra.mxu0 %v5270_v44  ;;  %1275 = vmatpush1.msra.mxu1 %v5273_v45 }
 0x457   :  { %1205 = vmatprep.subr.mxu0 %v5276_v46  ;;  %1276 = vmatprep.subr.mxu1 %v5279_v47 }
 0x458   :  { %1206 = vmatpush1.msra.mxu0 %v5282_v48  ;;  %1277 = vmatpush1.msra.mxu1 %v5285_v49 }
 0x459   :  { %1207 = vmatprep.subr.mxu0 %v5288_v51  ;;  %1278 = vmatprep.subr.mxu1 %v5291_v52  ;;  %v5306_v51 = vld [vmem:[#allocation7 + $0x80] sm:$0xff]  ;;  %v5309_v52 = vld [vmem:[#allocation7 + $0x90] sm:$0xff] }
 0x45a   :  { %1208 = vmatpush1.msra.mxu0 %v5294_v59  ;;  %1279 = vmatpush1.msra.mxu1 %v5297_v53  ;;  %7026 = vst [vmem:[#allocation27_spill] sm:$0xff] %v5309_v52  ;;  %v5312_v59 = vld [vmem:[#allocation7 + $0x68] sm:$0xff]  ;;  %v5315_v53 = vld [vmem:[#allocation7 + $0x78] sm:$0xff] }
 0x45b   :  { %1209 = vmatprep.subr.mxu0 %v5300_v1  ;;  %1280 = vmatprep.subr.mxu1 %v5303_v63  ;;  %7027 = vst [vmem:[#allocation28_spill] sm:$0xff] %v5312_v59  ;;  %7028 = vst [vmem:[#allocation29_spill] sm:$0xff] %v5315_v53  ;;  %v5318_v1 = vld [vmem:[#allocation7 + $0x60] sm:$0xff]  ;;  %v5321_v63 = vld [vmem:[#allocation7 + $0x70] sm:$0xff] }
 0x45c   :  { %1210 = vmatpush1.msra.mxu0 %v5306_v51  ;;  %1281 = vmatpush1.msra.mxu1 %v5309_v52  ;;  %7029 = vst [vmem:[#allocation30_spill] sm:$0xff] %v5318_v1  ;;  %7030 = vst [vmem:[#allocation31_spill] sm:$0xff] %v5321_v63 }
 0x45d   :  { %1211 = vmatprep.subr.mxu0 %v5312_v59  ;;  %1282 = vmatprep.subr.mxu1 %v5315_v53 }
 0x45e   :  { %1212 = vmatpush1.msra.mxu0 %v5318_v1  ;;  %1283 = vmatpush1.msra.mxu1 %v5321_v63 }
 0x45f   :  { %1213 = vmatprep.subr.mxu0 %v7002_v13  ;;  %1284 = vmatprep.subr.mxu1 %v7003_v14 }
 0x460   :  { %1214 = vmatpush1.msra.mxu0 %v7004_v15  ;;  %1285 = vmatpush1.msra.mxu1 %v7005_v16 }
 0x461   :  { %1215 = vmatprep.subr.mxu0 %v7006_v17  ;;  %1286 = vmatprep.subr.mxu1 %v7007_v18 }
 0x462   :  { %1216 = vmatpush1.msra.mxu0 %v7008_v19  ;;  %1287 = vmatpush1.msra.mxu1 %v7009_v20 }
 0x463   :  { %1217 = vmatprep.subr.mxu0 %v7010_v21  ;;  %1288 = vmatprep.subr.mxu1 %v7011_v22 }
 0x464   :  { %1218 = vmatpush1.msra.mxu0 %v7012_v23  ;;  %1251 = vmatprep.mubr.f32.mxu0 %v7013_v24 }
 0x465   :  { %1289 = vmatpush1.msra.mxu1 %v7014_v25  ;;  %1322 = vmatprep.mubr.f32.mxu1 %v7013_v24 }
 0x466   :  { %1358 = vmatprep.subr.mxu0 %v5156_v26  ;;  %1429 = vmatprep.subr.mxu1 %v5159_v27 }
 0x505   :  { %v1082_v13 = vpop.f32.mrf.mxu0  ;;  %v1153_v18 = vpop.f32.mrf.mxu1 }
 0x506   :  { %v1158_v14 = vadd.f32 %v1082_v13, %v7017_v29  ;;  %v1160_v25 = vadd.f32 %v1153_v18, %v4926_v60 }
 0x507   :  { %v1084_v15 = vpop.f32.mrf.mxu0  ;;  %v1155_v20 = vpop.f32.mrf.mxu1 }
 0x508   :  { %v3999_v16 = vmul.f32 -1.442695, %v1158_v14  ;;  %v1159_v17 = vadd.f32 %v1084_v15, %v7018_v33  ;;  %v1161_v21 = vadd.f32 %v1155_v20, %v4921_v61 }
 0x50a   :  { %4115 = vpow2.f32 %v3999_v16  ;;  %v4000_v19 = vmul.f32 -1.442695, %v1159_v17  ;;  %v4001_v22 = vmul.f32 -1.442695, %v1161_v21 }
 0x50c   :  { %4117 = vpow2.f32 %v4000_v19 }
 0x50d   :  { %4119 = vpow2.f32 %v4001_v22 }
 0x517   :  { %v4116_v23 = vpop.eup %4115 }
 0x518   :  { %v1165_v26 = vadd.f32 1.0, %v4116_v23  ;;  %v7037_v23 = vld [vmem:[#allocation26_spill] sm:$0xff] }
 0x519   :  { %v4118_v27 = vpop.eup %4117 }
 0x51a   :  { %4121 = vrcp.f32 %v1165_v26  ;;  %v1171_v13 = vadd.f32 1.0, %v4118_v27  ;;  %v4120_v14 = vpop.eup %4119  ;;  %v7032_v26 = vld [vmem:[#allocation21_spill] sm:$0xff]  ;;  %v7033_v27 = vld [vmem:[#allocation22_spill] sm:$0xff] }
 0x51b   :  { %4123 = vtanh.f32 %v1160_v25  ;;  %v1178_v17 = vadd.f32 1.0, %v4120_v14  ;;  %v5402_v25 = vld [vmem:[#allocation7 + $0x48] sm:$0xff]  ;;  %v5408_v14 = vld [vmem:[#allocation7 + $0x40] sm:$0xff] }
 0x51c   :  { %4125 = vrcp.f32 %v1171_v13  ;;  %7038 = vst [vmem:[#allocation33_spill] sm:$0xff] %v5402_v25  ;;  %v5405_v13 = vld [vmem:[#allocation7 + $0x58] sm:$0xff]  ;;  %7040 = vst [vmem:[#allocation35_spill] sm:$0xff] %v5408_v14 }
 0x51d   :  { %4127 = vrcp.f32 %v1178_v17  ;;  %7039 = vst [vmem:[#allocation34_spill] sm:$0xff] %v5405_v13  ;;  %v5417_v17 = vld [vmem:[#allocation7 + $0x38] sm:$0xff] }
 0x527   :  { %v4122_v15 = vpop.eup %4121 }
 0x528   :  { %v4124_v16 = vpop.eup %4123 }
 0x529   :  { %v4126_v33 = vpop.eup %4125  ;;  %v1182_v19 = vmul.f32 %v4124_v16, %v4122_v15  ;;  %v5411_v15 = vld [vmem:[#allocation7 + $0x50] sm:$0xff]  ;;  %v5414_v16 = vld [vmem:[#allocation7 + $0x28] sm:$0xff] }
 0x52a   :  { %v1181_v29 = vmul.f32 %v4126_v33, %v5167_v7  ;;  %v4128_v18 = vpop.eup %4127  ;;  %v7035_v33 = vld [vmem:[#allocation24_spill] sm:$0xff]  ;;  %v7036_v7 = vld [vmem:[#allocation25_spill] sm:$0xff]  ;;  %7041 = vst [vmem:[#allocation21_spill] sm:$0xff] %v5411_v15  ;;  %7042 = vst [vmem:[#allocation22_spill] sm:$0xff] %v5414_v16 }
 0x52c   :  { %v5345_v20 = vadd.f32 %v1182_v19, %v1181_v29  ;;  %v7034_v29 = vld [vmem:[#allocation23_spill] sm:$0xff]  ;;  %v5420_v19 = vld [vmem:[#allocation7 + $0x20] sm:$0xff] }
 0x52d   :  { %7043 = vst [vmem:[#allocation23_spill] sm:$0xff] %v5417_v17  ;;  %7044 = vst [vmem:[#allocation24_spill] sm:$0xff] %v5420_v19 }
 0x52e   :  { %4129 = vtanh.f32 %v5345_v20 }
 0x53b   :  { %v4130_v21 = vpop.eup %4129 }
 0x53c   :  { %v5348_v22 = vmul.f32 %v4130_v21, %v4128_v18  ;;  %v5423_v18 = vld [vmem:[#allocation7 + $0x30] sm:$0xff]  ;;  %v5426_v21 = vld [vmem:[#allocation7 + $0x8] sm:$0xff] }
 0x53d   :  { %7045 = vst [vmem:[#allocation25_spill] sm:$0xff] %v5423_v18  ;;  %7046 = vst [vmem:[#allocation26_spill] sm:$0xff] %v5426_v21 }
 0x53e   :  { %7031 = vst [vmem:[#allocation32_spill] sm:$0xff] %v5348_v22  ;;  %1252 = vmatmul.mubr.f32.vlgmr.msra.gmra.mxu0 %v5348_v22  ;;  %1323 = vmatmul.mubr.f32.vlgmr.msra.gmra.mxu1 %v5348_v22  ;;  %v5429_v22 = vld [vmem:[#allocation7 + $0x18] sm:$0xff] }
 0x53f   :  { %1359 = vmatpush1.msra.mxu0 %v5174_v58  ;;  %1430 = vmatpush1.msra.mxu1 %v5177_v56  ;;  %7047 = vst [vmem:[#allocation40_spill] sm:$0xff] %v5429_v22 }
 0x540   :  { %1360 = vmatprep.subr.mxu0 %v5180_v55  ;;  %1431 = vmatprep.subr.mxu1 %v5183_v6 }
 0x541   :  { %1361 = vmatpush1.msra.mxu0 %v5186_v3  ;;  %1432 = vmatpush1.msra.mxu1 %v5189_v0 }
 0x542   :  { %1362 = vmatprep.subr.mxu0 %v5192_v62  ;;  %1433 = vmatprep.subr.mxu1 %v5195_v4 }
 0x543   :  { %1363 = vmatpush1.msra.mxu0 %v5198_v57  ;;  %1434 = vmatpush1.msra.mxu1 %v5201_v50 }
 0x544   :  { %1364 = vmatprep.subr.mxu0 %v5204_v54  ;;  %1435 = vmatprep.subr.mxu1 %v5207_v2 }
 0x545   :  { %1365 = vmatpush1.msra.mxu0 %v5210_v5  ;;  %1436 = vmatpush1.msra.mxu1 %v5213_v8 }
 0x546   :  { %1366 = vmatprep.subr.mxu0 %v5216_v9  ;;  %1437 = vmatprep.subr.mxu1 %v5219_v10 }
 0x547   :  { %1367 = vmatpush1.msra.mxu0 %v5222_v11  ;;  %1438 = vmatpush1.msra.mxu1 %v5225_v12 }
 0x548   :  { %1368 = vmatprep.subr.mxu0 %v5228_v28  ;;  %1439 = vmatprep.subr.mxu1 %v5231_v30 }
 0x549   :  { %1369 = vmatpush1.msra.mxu0 %v5234_v31  ;;  %1440 = vmatpush1.msra.mxu1 %v5237_v32 }
 0x54a   :  { %1370 = vmatprep.subr.mxu0 %v5240_v34  ;;  %1441 = vmatprep.subr.mxu1 %v5243_v35 }
 0x54b   :  { %1371 = vmatpush1.msra.mxu0 %v5246_v36  ;;  %1442 = vmatpush1.msra.mxu1 %v5249_v37 }
 0x54c   :  { %1372 = vmatprep.subr.mxu0 %v5252_v38  ;;  %1443 = vmatprep.subr.mxu1 %v5255_v39 }
 0x54d   :  { %1373 = vmatpush1.msra.mxu0 %v5258_v40  ;;  %1444 = vmatpush1.msra.mxu1 %v5261_v41 }
 0x54e   :  { %1374 = vmatprep.subr.mxu0 %v5264_v42  ;;  %1445 = vmatprep.subr.mxu1 %v5267_v43 }
 0x54f   :  { %1375 = vmatpush1.msra.mxu0 %v5270_v44  ;;  %1446 = vmatpush1.msra.mxu1 %v5273_v45 }
 0x550   :  { %1376 = vmatprep.subr.mxu0 %v5276_v46  ;;  %1447 = vmatprep.subr.mxu1 %v5279_v47 }
 0x551   :  { %1377 = vmatpush1.msra.mxu0 %v5282_v48  ;;  %1448 = vmatpush1.msra.mxu1 %v5285_v49 }
 0x552   :  { %1378 = vmatprep.subr.mxu0 %v7032_v26  ;;  %1449 = vmatprep.subr.mxu1 %v7033_v27 }
 0x553   :  { %1379 = vmatpush1.msra.mxu0 %v7034_v29  ;;  %1450 = vmatpush1.msra.mxu1 %v7035_v33 }
 0x554   :  { %1380 = vmatprep.subr.mxu0 %v7036_v7  ;;  %1451 = vmatprep.subr.mxu1 %v7037_v23 }
 0x555   :  { %1381 = vmatpush1.msra.mxu0 %v5306_v51  ;;  %1452 = vmatpush1.msra.mxu1 %v5309_v52 }
 0x556   :  { %1382 = vmatprep.subr.mxu0 %v5312_v59  ;;  %1453 = vmatprep.subr.mxu1 %v5315_v53 }
 0x557   :  { %1383 = vmatpush1.msra.mxu0 %v5318_v1  ;;  %1454 = vmatpush1.msra.mxu1 %v5321_v63 }
 0x558   :  { %1384 = vmatprep.subr.mxu0 %v5402_v25  ;;  %1455 = vmatprep.subr.mxu1 %v5405_v13  ;;  %v7053_v25 = vld [vmem:[#allocation38_spill] sm:$0xff] }
 0x559   :  { %1385 = vmatpush1.msra.mxu0 %v5408_v14  ;;  %1456 = vmatpush1.msra.mxu1 %v5411_v15  ;;  %v7052_v15 = vld [vmem:[#allocation37_spill] sm:$0xff] }
 0x55a   :  { %1386 = vmatprep.subr.mxu0 %v5414_v16  ;;  %1457 = vmatprep.subr.mxu1 %v5417_v17  ;;  %v5432_v16 = vld [vmem:[#allocation7] sm:$0xff]  ;;  %v5436_v17 = vld [vmem:[#allocation7 + $0x10] sm:$0xff] }
 0x55b   :  { %1387 = vmatpush1.msra.mxu0 %v5420_v19  ;;  %1458 = vmatpush1.msra.mxu1 %v5423_v18  ;;  %7048 = vst [vmem:[#allocation41_spill] sm:$0xff] %v5432_v16  ;;  %7049 = vst [vmem:[#allocation42_spill] sm:$0xff] %v5436_v17  ;;  %v7050_v18 = vld [vmem:[#allocation17_spill] sm:$0xff]  ;;  %v7051_v19 = vld [vmem:[#allocation19_spill] sm:$0xff] }
 0x55c   :  { %1388 = vmatprep.subr.mxu0 %v5426_v21  ;;  %1459 = vmatprep.subr.mxu1 %v5429_v22 }
 0x55d   :  { %1389 = vmatpush1.msra.mxu0 %v5432_v16  ;;  %1422 = vmatprep.mubr.f32.mxu0 %v7013_v24 }
 0x55e   :  { %1460 = vmatpush1.msra.mxu1 %v5436_v17  ;;  %1493 = vmatprep.mubr.f32.mxu1 %v7013_v24 }
 0x55f   :  { %1529 = vmatprep.subr.mxu0 %v7050_v18  ;;  %1600 = vmatprep.subr.mxu1 %v7051_v19 }
 0x5fe   :  { %v1253_v21 = vpop.f32.mrf.mxu0  ;;  %v1324_v16 = vpop.f32.mrf.mxu1 }
 0x5ff   :  { %v1329_v14 = vadd.f32 %v1253_v21, %v7052_v15  ;;  %v1331_v18 = vadd.f32 %v1324_v16, %v4926_v60 }
 0x600   :  { %v1255_v22 = vpop.f32.mrf.mxu0  ;;  %v1326_v53 = vpop.f32.mrf.mxu1 }
 0x601   :  { %v4002_v13 = vmul.f32 -1.442695, %v1329_v14  ;;  %v1330_v63 = vadd.f32 %v1255_v22, %v7053_v25  ;;  %v1332_v17 = vadd.f32 %v1326_v53, %v4921_v61 }
 0x603   :  { %4131 = vpow2.f32 %v4002_v13  ;;  %v4003_v1 = vmul.f32 -1.442695, %v1330_v63  ;;  %v4004_v59 = vmul.f32 -1.442695, %v1332_v17  ;;  %v1770_v17 = vld [vmem:[#allocation9 + $0x1f0] sm:$0xff] }
 0x605   :  { %4133 = vpow2.f32 %v4003_v1 }
 0x606   :  { %4135 = vpow2.f32 %v4004_v59 }
 0x610   :  { %v4132_v24 = vpop.eup %4131 }
 0x611   :  { %v1336_v52 = vadd.f32 1.0, %v4132_v24 }
 0x612   :  { %v4134_v19 = vpop.eup %4133 }
 0x613   :  { %4137 = vrcp.f32 %v1336_v52  ;;  %v1342_v21 = vadd.f32 1.0, %v4134_v19  ;;  %v4136_v14 = vpop.eup %4135  ;;  %v1767_v19 = vld [vmem:[#allocation9 + $0x1d8] sm:$0xff] }
 0x614   :  { %4139 = vtanh.f32 %v1331_v18  ;;  %v1349_v63 = vadd.f32 1.0, %v4136_v14  ;;  %v1765_v18 = vld [vmem:[#allocation9 + $0x1c8] sm:$0xff]  ;;  %v1766_v14 = vld [vmem:[#allocation9 + $0x1d0] sm:$0xff] }
 0x615   :  { %4141 = vrcp.f32 %v1342_v21  ;;  %v1764_v21 = vld [vmem:[#allocation9 + $0x1c0] sm:$0xff] }
 0x616   :  { %4143 = vrcp.f32 %v1349_v63  ;;  %v1760_v63 = vld [vmem:[#allocation9 + $0x1a0] sm:$0xff] }
 0x620   :  { %v4138_v22 = vpop.eup %4137 }
 0x621   :  { %v4140_v13 = vpop.eup %4139 }
 0x622   :  { %v4142_v25 = vpop.eup %4141  ;;  %v1353_v1 = vmul.f32 %v4140_v13, %v4138_v22  ;;  %v1761_v22 = vld [vmem:[#allocation9 + $0x1a8] sm:$0xff]  ;;  %v1763_v13 = vld [vmem:[#allocation9 + $0x1b8] sm:$0xff] }
 0x623   :  { %v1352_v15 = vmul.f32 %v4142_v25, %v5345_v20  ;;  %v4144_v24 = vpop.eup %4143 }
 0x625   :  { %v5447_v53 = vadd.f32 %v1353_v1, %v1352_v15  ;;  %v1768_v15 = vld [vmem:[#allocation9 + $0x1e0] sm:$0xff]  ;;  %v1762_v1 = vld [vmem:[#allocation9 + $0x1b0] sm:$0xff] }
 0x627   :  { %4145 = vtanh.f32 %v5447_v53 }
 0x634   :  { %v4146_v16 = vpop.eup %4145 }
 0x635   :  { %v5450_v59 = vmul.f32 %v4146_v16, %v4144_v24  ;;  %v1759_v24 = vld [vmem:[#allocation9 + $0x198] sm:$0xff]  ;;  %v1756_v16 = vld [vmem:[#allocation9 + $0x180] sm:$0xff] }
 0x637   :  { %1423 = vmatmul.mubr.f32.vlgmr.msra.gmra.mxu0 %v5450_v59  ;;  %1494 = vmatmul.mubr.f32.vlgmr.msra.gmra.mxu1 %v5450_v59 }
 0x638   :  { %1530 = vmatpush1.msra.mxu0 %v5174_v58  ;;  %1601 = vmatpush1.msra.mxu1 %v5177_v56  ;;  %v7054_v58 = vld [vmem:[#allocation27_spill] sm:$0xff]  ;;  %v7055_v56 = vld [vmem:[#allocation28_spill] sm:$0xff] }
 0x639   :  { %1531 = vmatprep.subr.mxu0 %v5180_v55  ;;  %1602 = vmatprep.subr.mxu1 %v5183_v6  ;;  %v7056_v55 = vld [vmem:[#allocation29_spill] sm:$0xff]  ;;  %v7057_v6 = vld [vmem:[#allocation30_spill] sm:$0xff] }
 0x63a   :  { %1532 = vmatpush1.msra.mxu0 %v5186_v3  ;;  %1603 = vmatpush1.msra.mxu1 %v5189_v0  ;;  %v7058_v3 = vld [vmem:[#allocation31_spill] sm:$0xff]  ;;  %v7059_v0 = vld [vmem:[#allocation33_spill] sm:$0xff] }
 0x63b   :  { %1533 = vmatprep.subr.mxu0 %v5192_v62  ;;  %1604 = vmatprep.subr.mxu1 %v5195_v4  ;;  %v7060_v62 = vld [vmem:[#allocation34_spill] sm:$0xff]  ;;  %v7061_v4 = vld [vmem:[#allocation35_spill] sm:$0xff] }
 0x63c   :  { %1534 = vmatpush1.msra.mxu0 %v5198_v57  ;;  %1605 = vmatpush1.msra.mxu1 %v5201_v50  ;;  %v7062_v57 = vld [vmem:[#allocation21_spill] sm:$0xff]  ;;  %v7063_v50 = vld [vmem:[#allocation22_spill] sm:$0xff] }
 0x63d   :  { %1535 = vmatprep.subr.mxu0 %v5204_v54  ;;  %1606 = vmatprep.subr.mxu1 %v5207_v2  ;;  %v7064_v54 = vld [vmem:[#allocation23_spill] sm:$0xff]  ;;  %v7065_v2 = vld [vmem:[#allocation24_spill] sm:$0xff] }
 0x63e   :  { %1536 = vmatpush1.msra.mxu0 %v5210_v5  ;;  %1607 = vmatpush1.msra.mxu1 %v5213_v8  ;;  %v7066_v5 = vld [vmem:[#allocation25_spill] sm:$0xff]  ;;  %v7067_v8 = vld [vmem:[#allocation26_spill] sm:$0xff] }
 0x63f   :  { %1537 = vmatprep.subr.mxu0 %v5216_v9  ;;  %1608 = vmatprep.subr.mxu1 %v5219_v10  ;;  %v7068_v9 = vld [vmem:[#allocation40_spill] sm:$0xff]  ;;  %v7069_v10 = vld [vmem:[#allocation41_spill] sm:$0xff] }
 0x640   :  { %1538 = vmatpush1.msra.mxu0 %v5222_v11  ;;  %1609 = vmatpush1.msra.mxu1 %v5225_v12  ;;  %v7070_v11 = vld [vmem:[#allocation42_spill] sm:$0xff]  ;;  %v7071_v12 = vmov 0.0  }
 0x641   :  { %1539 = vmatprep.subr.mxu0 %v5228_v28  ;;  %1610 = vmatprep.subr.mxu1 %v5231_v30  ;;  %v1769_v28 = vld [vmem:[#allocation9 + $0x1e8] sm:$0xff]  ;;  %v1771_v30 = vld [vmem:[#allocation9 + $0x1f8] sm:$0xff] }
 0x642   :  { %1540 = vmatpush1.msra.mxu0 %v5234_v31  ;;  %1611 = vmatpush1.msra.mxu1 %v5237_v32  ;;  %v7072_v32 = vld [vmem:[#allocation37_spill] sm:$0xff] }
 0x643   :  { %1541 = vmatprep.subr.mxu0 %v5240_v34  ;;  %1612 = vmatprep.subr.mxu1 %v5243_v35 }
 0x644   :  { %1542 = vmatpush1.msra.mxu0 %v5246_v36  ;;  %1613 = vmatpush1.msra.mxu1 %v5249_v37  ;;  %v7073_v37 = vld [vmem:[#allocation38_spill] sm:$0xff] }
 0x645   :  { %1543 = vmatprep.subr.mxu0 %v5252_v38  ;;  %1614 = vmatprep.subr.mxu1 %v5255_v39 }
 0x646   :  { %1544 = vmatpush1.msra.mxu0 %v5258_v40  ;;  %1615 = vmatpush1.msra.mxu1 %v5261_v41 }
 0x647   :  { %1545 = vmatprep.subr.mxu0 %v5264_v42  ;;  %1616 = vmatprep.subr.mxu1 %v5267_v43 }
 0x648   :  { %1546 = vmatpush1.msra.mxu0 %v5270_v44  ;;  %1617 = vmatpush1.msra.mxu1 %v5273_v45 }
 0x649   :  { %1547 = vmatprep.subr.mxu0 %v5276_v46  ;;  %1618 = vmatprep.subr.mxu1 %v5279_v47 }
 0x64a   :  { %1548 = vmatpush1.msra.mxu0 %v5282_v48  ;;  %1619 = vmatpush1.msra.mxu1 %v5285_v49 }
 0x64b   :  { %1549 = vmatprep.subr.mxu0 %v7032_v26  ;;  %1620 = vmatprep.subr.mxu1 %v7033_v27 }
 0x64c   :  { %1550 = vmatpush1.msra.mxu0 %v7034_v29  ;;  %1621 = vmatpush1.msra.mxu1 %v7035_v33 }
 0x64d   :  { %1551 = vmatprep.subr.mxu0 %v7036_v7  ;;  %1622 = vmatprep.subr.mxu1 %v7037_v23 }
 0x64e   :  { %1552 = vmatpush1.msra.mxu0 %v5306_v51  ;;  %1623 = vmatpush1.msra.mxu1 %v7054_v58  ;;  %v1758_v58 = vld [vmem:[#allocation9 + $0x190] sm:$0xff] }
 0x64f   :  { %1553 = vmatprep.subr.mxu0 %v7055_v56  ;;  %1624 = vmatprep.subr.mxu1 %v7056_v55  ;;  %v1753_v56 = vld [vmem:[#allocation9 + $0x168] sm:$0xff]  ;;  %v1755_v55 = vld [vmem:[#allocation9 + $0x178] sm:$0xff] }
 0x650   :  { %1554 = vmatpush1.msra.mxu0 %v7057_v6  ;;  %1625 = vmatpush1.msra.mxu1 %v7058_v3  ;;  %v1752_v6 = vld [vmem:[#allocation9 + $0x160] sm:$0xff]  ;;  %v1754_v3 = vld [vmem:[#allocation9 + $0x170] sm:$0xff] }
 0x651   :  { %1555 = vmatprep.subr.mxu0 %v7059_v0  ;;  %1626 = vmatprep.subr.mxu1 %v7060_v62  ;;  %v1749_v0 = vld [vmem:[#allocation9 + $0x148] sm:$0xff]  ;;  %v1751_v62 = vld [vmem:[#allocation9 + $0x158] sm:$0xff] }
 0x652   :  { %1556 = vmatpush1.msra.mxu0 %v7061_v4  ;;  %1627 = vmatpush1.msra.mxu1 %v7062_v57  ;;  %v1748_v4 = vld [vmem:[#allocation9 + $0x140] sm:$0xff]  ;;  %v1750_v57 = vld [vmem:[#allocation9 + $0x150] sm:$0xff] }
 0x653   :  { %1557 = vmatprep.subr.mxu0 %v7063_v50  ;;  %1628 = vmatprep.subr.mxu1 %v7064_v54  ;;  %v1745_v50 = vld [vmem:[#allocation9 + $0x128] sm:$0xff]  ;;  %v1747_v54 = vld [vmem:[#allocation9 + $0x138] sm:$0xff] }
 0x654   :  { %1558 = vmatpush1.msra.mxu0 %v7065_v2  ;;  %1629 = vmatpush1.msra.mxu1 %v7066_v5  ;;  %v1744_v2 = vld [vmem:[#allocation9 + $0x120] sm:$0xff]  ;;  %v1746_v5 = vld [vmem:[#allocation9 + $0x130] sm:$0xff] }
 0x655   :  { %1559 = vmatprep.subr.mxu0 %v7067_v8  ;;  %1630 = vmatprep.subr.mxu1 %v7068_v9  ;;  %v1741_v8 = vld [vmem:[#allocation9 + $0x108] sm:$0xff]  ;;  %v1743_v9 = vld [vmem:[#allocation9 + $0x118] sm:$0xff] }
 0x656   :  { %1560 = vmatpush1.msra.mxu0 %v7069_v10  ;;  %1631 = vmatpush1.msra.mxu1 %v7070_v11  ;;  %v1740_v10 = vld [vmem:[#allocation9 + $0x100] sm:$0xff]  ;;  %v1742_v11 = vld [vmem:[#allocation9 + $0x110] sm:$0xff] }
 0x657   :  { %1593 = vmatprep.mubr.f32.mxu0 %v7071_v12  ;;  %1664 = vmatprep.mubr.f32.mxu1 %v7071_v12 }
 0x658   :  { %1794 = vmatprep.subr.mxu0 %v1769_v28  ;;  %1907 = vmatprep.subr.mxu1 %v1771_v30  ;;  %v1737_v28 = vld [vmem:[#allocation9 + $0xe8] sm:$0xff]  ;;  %v1739_v30 = vld [vmem:[#allocation9 + $0xf8] sm:$0xff] }
 0x6f7   :  { %v1424_v31 = vpop.f32.mrf.mxu0  ;;  %v1495_v39 = vpop.f32.mrf.mxu1 }
 0x6f8   :  { %v1500_v34 = vadd.f32 %v1424_v31, %v7072_v32  ;;  %v1502_v45 = vadd.f32 %v1495_v39, %v4926_v60  ;;  %v1736_v31 = vld [vmem:[#allocation9 + $0xe0] sm:$0xff]  ;;  %v1734_v39 = vld [vmem:[#allocation9 + $0xd0] sm:$0xff] }
 0x6f9   :  { %v1426_v35 = vpop.f32.mrf.mxu0  ;;  %v1497_v41 = vpop.f32.mrf.mxu1 }
 0x6fa   :  { %v4005_v36 = vmul.f32 -1.442695, %v1500_v34  ;;  %v1501_v38 = vadd.f32 %v1426_v35, %v7073_v37  ;;  %v1503_v42 = vadd.f32 %v1497_v41, %v4921_v61  ;;  %v1738_v34 = vld [vmem:[#allocation9 + $0xf0] sm:$0xff]  ;;  %v1733_v35 = vld [vmem:[#allocation9 + $0xc8] sm:$0xff]  ;;  %v1731_v41 = vld [vmem:[#allocation9 + $0xb8] sm:$0xff] }
 0x6fc   :  { %4147 = vpow2.f32 %v4005_v36  ;;  %v4006_v40 = vmul.f32 -1.442695, %v1501_v38  ;;  %v4007_v43 = vmul.f32 -1.442695, %v1503_v42  ;;  %v1735_v36 = vld [vmem:[#allocation9 + $0xd8] sm:$0xff]  ;;  %v1732_v38 = vld [vmem:[#allocation9 + $0xc0] sm:$0xff] }
 0x6fd   :  { %v1728_v42 = vld [vmem:[#allocation9 + $0xa0] sm:$0xff] }
 0x6fe   :  { %4149 = vpow2.f32 %v4006_v40  ;;  %v1729_v40 = vld [vmem:[#allocation9 + $0xa8] sm:$0xff] }
 0x6ff   :  { %4151 = vpow2.f32 %v4007_v43  ;;  %v1730_v43 = vld [vmem:[#allocation9 + $0xb0] sm:$0xff] }
 0x709   :  { %v4148_v44 = vpop.eup %4147 }
 0x70a   :  { %v1507_v46 = vadd.f32 1.0, %v4148_v44  ;;  %v1725_v44 = vld [vmem:[#allocation9 + $0x88] sm:$0xff] }
 0x70b   :  { %v4150_v47 = vpop.eup %4149 }
 0x70c   :  { %4153 = vrcp.f32 %v1507_v46  ;;  %v1513_v48 = vadd.f32 1.0, %v4150_v47  ;;  %v4152_v49 = vpop.eup %4151  ;;  %v1724_v46 = vld [vmem:[#allocation9 + $0x80] sm:$0xff]  ;;  %v1726_v47 = vld [vmem:[#allocation9 + $0x90] sm:$0xff] }
 0x70d   :  { %4155 = vtanh.f32 %v1502_v45  ;;  %v1520_v26 = vadd.f32 1.0, %v4152_v49  ;;  %v1727_v45 = vld [vmem:[#allocation9 + $0x98] sm:$0xff] }
 0x70e   :  { %4157 = vrcp.f32 %v1513_v48  ;;  %v1721_v48 = vld [vmem:[#allocation9 + $0x68] sm:$0xff]  ;;  %v1723_v49 = vld [vmem:[#allocation9 + $0x78] sm:$0xff] }
 0x70f   :  { %4159 = vrcp.f32 %v1520_v26  ;;  %v1719_v26 = vld [vmem:[#allocation9 + $0x58] sm:$0xff] }
 0x719   :  { %v4154_v51 = vpop.eup %4153 }
 0x71a   :  { %v4156_v52 = vpop.eup %4155 }
 0x71b   :  { %v4158_v20 = vpop.eup %4157  ;;  %v1524_v27 = vmul.f32 %v4156_v52, %v4154_v51  ;;  %v1720_v51 = vld [vmem:[#allocation9 + $0x60] sm:$0xff]  ;;  %v1722_v52 = vld [vmem:[#allocation9 + $0x70] sm:$0xff] }
 0x71c   :  { %v1523_v29 = vmul.f32 %v4158_v20, %v5447_v53  ;;  %v4160_v7 = vpop.eup %4159  ;;  %v1757_v53 = vld [vmem:[#allocation9 + $0x188] sm:$0xff] }
 0x71d   :  { %v1717_v20 = vld [vmem:[#allocation9 + $0x48] sm:$0xff] }
 0x71e   :  { %v5523_v33 = vadd.f32 %v1524_v27, %v1523_v29  ;;  %v1716_v27 = vld [vmem:[#allocation9 + $0x40] sm:$0xff]  ;;  %v1718_v29 = vld [vmem:[#allocation9 + $0x50] sm:$0xff] }
 0x720   :  { %4161 = vtanh.f32 %v5523_v33 }
 0x72d   :  { %v4162_v23 = vpop.eup %4161 }
 0x72e   :  { %v5526_v25 = vmul.f32 %v4162_v23, %v4160_v7  ;;  %v1713_v7 = vld [vmem:[#allocation9 + $0x28] sm:$0xff]  ;;  %v1715_v23 = vld [vmem:[#allocation9 + $0x38] sm:$0xff] }
 0x730   :  { %1594 = vmatmul.mubr.f32.vlgmr.msra.gmra.mxu0 %v5526_v25  ;;  %1665 = vmatmul.mubr.f32.vlgmr.msra.gmra.mxu1 %v5526_v25 }
 0x731   :  { %1795 = vmatpush1.msra.mxu0 %v1768_v15  ;;  %1908 = vmatpush1.msra.mxu1 %v1770_v17  ;;  %v1712_v15 = vld [vmem:[#allocation9 + $0x20] sm:$0xff]  ;;  %v1714_v17 = vld [vmem:[#allocation9 + $0x30] sm:$0xff] }
 0x732   :  { %1796 = vmatprep.subr.mxu0 %v1765_v18  ;;  %1909 = vmatprep.subr.mxu1 %v1767_v19  ;;  %v1709_v18 = vld [vmem:[#allocation9 + $0x8] sm:$0xff]  ;;  %v1711_v19 = vld [vmem:[#allocation9 + $0x18] sm:$0xff] }
 0x733   :  { %1797 = vmatpush1.msra.mxu0 %v1764_v21  ;;  %1910 = vmatpush1.msra.mxu1 %v1766_v14  ;;  %v1708_v21 = vld [vmem:[#allocation9] sm:$0xff]  ;;  %v1710_v14 = vld [vmem:[#allocation9 + $0x10] sm:$0xff] }
 0x734   :  { %1798 = vmatprep.subr.mxu0 %v1761_v22  ;;  %1911 = vmatprep.subr.mxu1 %v1763_v13  ;;  %v7074_v22 = vld [vmem:[#allocation39_spill] sm:$0xff]  ;;  %v7075_v13 = vld [vmem:[#allocation18_spill] sm:$0xff] }
 0x735   :  { %1799 = vmatpush1.msra.mxu0 %v1760_v63  ;;  %1912 = vmatpush1.msra.mxu1 %v1762_v1  ;;  %v7076_v63 = vld [vmem:[#allocation16_spill] sm:$0xff] }
 0x736   :  { %1800 = vmatprep.subr.mxu0 %v1757_v53  ;;  %1913 = vmatprep.subr.mxu1 %v1759_v24  ;;  %v7077_v1 = vld [vmem:[#allocation20_spill] sm:$0xff]  ;;  %v2113_v24 = vld [vmem:[#allocation10 + $0x1e8] sm:$0xff] }
 0x737   :  { %1801 = vmatpush1.msra.mxu0 %v1756_v16  ;;  %1914 = vmatpush1.msra.mxu1 %v1758_v58  ;;  %v7078_v53 = vld [vmem:[#allocation32_spill] sm:$0xff]  ;;  %v2115_v16 = vld [vmem:[#allocation10 + $0x1f8] sm:$0xff] }
 0x738   :  { %1802 = vmatprep.subr.mxu0 %v1753_v56  ;;  %1915 = vmatprep.subr.mxu1 %v1755_v55  ;;  %v2112_v58 = vld [vmem:[#allocation10 + $0x1e0] sm:$0xff]  ;;  %v2114_v56 = vld [vmem:[#allocation10 + $0x1f0] sm:$0xff]  ;;  %v2109_v55 = vld [vmem:[#allocation10 + $0x1c8] sm:$0xff] }
 0x739   :  { %1803 = vmatpush1.msra.mxu0 %v1752_v6  ;;  %1916 = vmatpush1.msra.mxu1 %v1754_v3  ;;  %v2111_v6 = vld [vmem:[#allocation10 + $0x1d8] sm:$0xff]  ;;  %v2108_v3 = vld [vmem:[#allocation10 + $0x1c0] sm:$0xff] }
 0x73a   :  { %1804 = vmatprep.subr.mxu0 %v1749_v0  ;;  %1917 = vmatprep.subr.mxu1 %v1751_v62  ;;  %v2110_v0 = vld [vmem:[#allocation10 + $0x1d0] sm:$0xff]  ;;  %v2105_v62 = vld [vmem:[#allocation10 + $0x1a8] sm:$0xff] }
 0x73b   :  { %1805 = vmatpush1.msra.mxu0 %v1748_v4  ;;  %1918 = vmatpush1.msra.mxu1 %v1750_v57  ;;  %v2107_v4 = vld [vmem:[#allocation10 + $0x1b8] sm:$0xff]  ;;  %v2104_v57 = vld [vmem:[#allocation10 + $0x1a0] sm:$0xff] }
 0x73c   :  { %1806 = vmatprep.subr.mxu0 %v1745_v50  ;;  %1919 = vmatprep.subr.mxu1 %v1747_v54  ;;  %v2106_v50 = vld [vmem:[#allocation10 + $0x1b0] sm:$0xff]  ;;  %v2101_v54 = vld [vmem:[#allocation10 + $0x188] sm:$0xff] }
 0x73d   :  { %1807 = vmatpush1.msra.mxu0 %v1744_v2  ;;  %1920 = vmatpush1.msra.mxu1 %v1746_v5  ;;  %v2103_v2 = vld [vmem:[#allocation10 + $0x198] sm:$0xff]  ;;  %v2100_v5 = vld [vmem:[#allocation10 + $0x180] sm:$0xff] }
 0x73e   :  { %1808 = vmatprep.subr.mxu0 %v1741_v8  ;;  %1921 = vmatprep.subr.mxu1 %v1743_v9  ;;  %v2102_v8 = vld [vmem:[#allocation10 + $0x190] sm:$0xff]  ;;  %v2097_v9 = vld [vmem:[#allocation10 + $0x168] sm:$0xff] }
 0x73f   :  { %1809 = vmatpush1.msra.mxu0 %v1740_v10  ;;  %1922 = vmatpush1.msra.mxu1 %v1742_v11  ;;  %v2099_v10 = vld [vmem:[#allocation10 + $0x178] sm:$0xff]  ;;  %v2096_v11 = vld [vmem:[#allocation10 + $0x160] sm:$0xff] }
 0x740   :  { %1810 = vmatprep.subr.mxu0 %v1737_v28  ;;  %1923 = vmatprep.subr.mxu1 %v1739_v30  ;;  %v2098_v28 = vld [vmem:[#allocation10 + $0x170] sm:$0xff]  ;;  %v2093_v30 = vld [vmem:[#allocation10 + $0x148] sm:$0xff] }
 0x741   :  { %1811 = vmatpush1.msra.mxu0 %v1736_v31  ;;  %1924 = vmatpush1.msra.mxu1 %v1738_v34  ;;  %v2095_v31 = vld [vmem:[#allocation10 + $0x158] sm:$0xff]  ;;  %v2092_v34 = vld [vmem:[#allocation10 + $0x140] sm:$0xff] }
 0x742   :  { %1812 = vmatprep.subr.mxu0 %v1733_v35  ;;  %1925 = vmatprep.subr.mxu1 %v1735_v36  ;;  %v2094_v35 = vld [vmem:[#allocation10 + $0x150] sm:$0xff]  ;;  %v2089_v36 = vld [vmem:[#allocation10 + $0x128] sm:$0xff] }
 0x743   :  { %1813 = vmatpush1.msra.mxu0 %v1732_v38  ;;  %1926 = vmatpush1.msra.mxu1 %v1734_v39  ;;  %v2091_v38 = vld [vmem:[#allocation10 + $0x138] sm:$0xff]  ;;  %v2088_v39 = vld [vmem:[#allocation10 + $0x120] sm:$0xff] }
 0x744   :  { %1814 = vmatprep.subr.mxu0 %v1729_v40  ;;  %1927 = vmatprep.subr.mxu1 %v1731_v41  ;;  %v2090_v40 = vld [vmem:[#allocation10 + $0x130] sm:$0xff]  ;;  %v2085_v41 = vld [vmem:[#allocation10 + $0x108] sm:$0xff] }
 0x745   :  { %1815 = vmatpush1.msra.mxu0 %v1728_v42  ;;  %1928 = vmatpush1.msra.mxu1 %v1730_v43  ;;  %v2087_v42 = vld [vmem:[#allocation10 + $0x118] sm:$0xff]  ;;  %v2084_v43 = vld [vmem:[#allocation10 + $0x100] sm:$0xff] }
 0x746   :  { %1816 = vmatprep.subr.mxu0 %v1725_v44  ;;  %1929 = vmatprep.subr.mxu1 %v1727_v45  ;;  %v2086_v44 = vld [vmem:[#allocation10 + $0x110] sm:$0xff]  ;;  %v2081_v45 = vld [vmem:[#allocation10 + $0xe8] sm:$0xff] }
 0x747   :  { %1817 = vmatpush1.msra.mxu0 %v1724_v46  ;;  %1930 = vmatpush1.msra.mxu1 %v1726_v47  ;;  %v2083_v46 = vld [vmem:[#allocation10 + $0xf8] sm:$0xff]  ;;  %v2080_v47 = vld [vmem:[#allocation10 + $0xe0] sm:$0xff] }
 0x748   :  { %1818 = vmatprep.subr.mxu0 %v1721_v48  ;;  %1931 = vmatprep.subr.mxu1 %v1723_v49  ;;  %v2082_v48 = vld [vmem:[#allocation10 + $0xf0] sm:$0xff]  ;;  %v2077_v49 = vld [vmem:[#allocation10 + $0xc8] sm:$0xff] }
 0x749   :  { %1819 = vmatpush1.msra.mxu0 %v1720_v51  ;;  %1932 = vmatpush1.msra.mxu1 %v1722_v52  ;;  %v2079_v51 = vld [vmem:[#allocation10 + $0xd8] sm:$0xff]  ;;  %v2076_v52 = vld [vmem:[#allocation10 + $0xc0] sm:$0xff] }
 0x74a   :  { %1820 = vmatprep.subr.mxu0 %v1717_v20  ;;  %1933 = vmatprep.subr.mxu1 %v1719_v26  ;;  %v2078_v20 = vld [vmem:[#allocation10 + $0xd0] sm:$0xff]  ;;  %v2073_v26 = vld [vmem:[#allocation10 + $0xa8] sm:$0xff] }
 0x74b   :  { %1821 = vmatpush1.msra.mxu0 %v1716_v27  ;;  %1934 = vmatpush1.msra.mxu1 %v1718_v29  ;;  %v2075_v27 = vld [vmem:[#allocation10 + $0xb8] sm:$0xff]  ;;  %v2072_v29 = vld [vmem:[#allocation10 + $0xa0] sm:$0xff] }
 0x74c   :  { %1822 = vmatprep.subr.mxu0 %v1713_v7  ;;  %1935 = vmatprep.subr.mxu1 %v1715_v23  ;;  %v2074_v7 = vld [vmem:[#allocation10 + $0xb0] sm:$0xff]  ;;  %v2069_v23 = vld [vmem:[#allocation10 + $0x88] sm:$0xff] }
 0x74d   :  { %1823 = vmatpush1.msra.mxu0 %v1712_v15  ;;  %1936 = vmatpush1.msra.mxu1 %v1714_v17  ;;  %v2071_v15 = vld [vmem:[#allocation10 + $0x98] sm:$0xff]  ;;  %v2068_v17 = vld [vmem:[#allocation10 + $0x80] sm:$0xff] }
 0x74e   :  { %1824 = vmatprep.subr.mxu0 %v1709_v18  ;;  %1937 = vmatprep.subr.mxu1 %v1711_v19  ;;  %v2070_v18 = vld [vmem:[#allocation10 + $0x90] sm:$0xff]  ;;  %v2065_v19 = vld [vmem:[#allocation10 + $0x68] sm:$0xff] }
 0x74f   :  { %1825 = vmatpush1.msra.mxu0 %v1708_v21  ;;  %1858 = vmatprep.mubr.f32.mxu0 %v7071_v12  ;;  %v2067_v21 = vld [vmem:[#allocation10 + $0x78] sm:$0xff] }
 0x750   :  { %1938 = vmatpush1.msra.mxu1 %v1710_v14  ;;  %1971 = vmatprep.mubr.f32.mxu1 %v7071_v12  ;;  %v2064_v14 = vld [vmem:[#allocation10 + $0x60] sm:$0xff] }
 0x751   :  { %1859 = vmatmul.mubr.f32.vlgmr.msra.gmra.mxu0 %v7074_v22  ;;  %1972 = vmatmul.mubr.f32.vlgmr.msra.gmra.mxu1 %v7074_v22 }
 0x752   :  { %1864 = vmatprep.mubr.f32.mxu0 %v7071_v12  ;;  %1977 = vmatprep.mubr.f32.mxu1 %v7071_v12 }
 0x753   :  { %2116 = vmatprep.subr.mxu0 %v2113_v24  ;;  %2229 = vmatprep.subr.mxu1 %v2115_v16  ;;  %v2066_v24 = vld [vmem:[#allocation10 + $0x70] sm:$0xff]  ;;  %v2061_v16 = vld [vmem:[#allocation10 + $0x48] sm:$0xff] }
 0x754   :  { %2117 = vmatpush1.msra.mxu0 %v2112_v58  ;;  %2230 = vmatpush1.msra.mxu1 %v2114_v56  ;;  %v2063_v58 = vld [vmem:[#allocation10 + $0x58] sm:$0xff]  ;;  %v2060_v56 = vld [vmem:[#allocation10 + $0x40] sm:$0xff] }
 0x755   :  { %1865 = vmatmul.mubr.f32.gmra.mxu0 %v7075_v13  ;;  %1978 = vmatmul.mubr.f32.gmra.mxu1 %v7075_v13 }
 0x756   :  { %1870 = vmatprep.mubr.f32.mxu0 %v7071_v12  ;;  %1983 = vmatprep.mubr.f32.mxu1 %v7071_v12 }
 0x757   :  { %2118 = vmatprep.subr.mxu0 %v2109_v55  ;;  %2231 = vmatprep.subr.mxu1 %v2111_v6  ;;  %v2062_v55 = vld [vmem:[#allocation10 + $0x50] sm:$0xff]  ;;  %v2057_v6 = vld [vmem:[#allocation10 + $0x28] sm:$0xff] }
 0x758   :  { %2119 = vmatpush1.msra.mxu0 %v2108_v3  ;;  %2232 = vmatpush1.msra.mxu1 %v2110_v0  ;;  %v2059_v3 = vld [vmem:[#allocation10 + $0x38] sm:$0xff]  ;;  %v2056_v0 = vld [vmem:[#allocation10 + $0x20] sm:$0xff] }
 0x759   :  { %1871 = vmatmul.mubr.f32.gmra.mxu0 %v7076_v63  ;;  %1984 = vmatmul.mubr.f32.gmra.mxu1 %v7076_v63 }
 0x75a   :  { %1876 = vmatprep.mubr.f32.mxu0 %v7071_v12  ;;  %1989 = vmatprep.mubr.f32.mxu1 %v7071_v12 }
 0x75b   :  { %2120 = vmatprep.subr.mxu0 %v2105_v62  ;;  %2233 = vmatprep.subr.mxu1 %v2107_v4  ;;  %v2058_v62 = vld [vmem:[#allocation10 + $0x30] sm:$0xff]  ;;  %v2053_v4 = vld [vmem:[#allocation10 + $0x8] sm:$0xff] }
 0x75c   :  { %2121 = vmatpush1.msra.mxu0 %v2104_v57  ;;  %2234 = vmatpush1.msra.mxu1 %v2106_v50  ;;  %v2052_v57 = vld [vmem:[#allocation10] sm:$0xff]  ;;  %v2055_v50 = vld [vmem:[#allocation10 + $0x18] sm:$0xff] }
 0x75d   :  { %1877 = vmatmul.mubr.f32.gmra.mxu0 %v7077_v1  ;;  %1990 = vmatmul.mubr.f32.gmra.mxu1 %v7077_v1 }
 0x75e   :  { %1882 = vmatprep.mubr.f32.mxu0 %v7071_v12  ;;  %1995 = vmatprep.mubr.f32.mxu1 %v7071_v12 }
 0x75f   :  { %2122 = vmatprep.subr.mxu0 %v2101_v54  ;;  %2235 = vmatprep.subr.mxu1 %v2103_v2  ;;  %v2054_v54 = vld [vmem:[#allocation10 + $0x10] sm:$0xff]  ;;  %v5560_v2 = vld [vmem:[#allocation12 + $0x1e8] sm:$0xff] }
 0x760   :  { %2123 = vmatpush1.msra.mxu0 %v2100_v5  ;;  %2236 = vmatpush1.msra.mxu1 %v2102_v8  ;;  %7079 = vst [vmem:[#allocation17_spill] sm:$0xff] %v5560_v2  ;;  %v5562_v5 = vld [vmem:[#allocation12 + $0x1f8] sm:$0xff] }
 0x761   :  { %1883 = vmatmul.mubr.f32.gmra.mxu0 %v7078_v53  ;;  %1996 = vmatmul.mubr.f32.gmra.mxu1 %v7078_v53  ;;  %7080 = vst [vmem:[#allocation19_spill] sm:$0xff] %v5562_v5 }
 0x762   :  { %1888 = vmatprep.mubr.f32.mxu0 %v7071_v12  ;;  %2001 = vmatprep.mubr.f32.mxu1 %v7071_v12 }
 0x763   :  { %2124 = vmatprep.subr.mxu0 %v2097_v9  ;;  %2237 = vmatprep.subr.mxu1 %v2099_v10 }
 0x764   :  { %2125 = vmatpush1.msra.mxu0 %v2096_v11  ;;  %2238 = vmatpush1.msra.mxu1 %v2098_v28 }
 0x765   :  { %1889 = vmatmul.mubr.f32.gmra.mxu0 %v5450_v59  ;;  %2002 = vmatmul.mubr.f32.gmra.mxu1 %v5450_v59 }
 0x766   :  { %1894 = vmatprep.mubr.f32.mxu0 %v7071_v12  ;;  %2007 = vmatprep.mubr.f32.mxu1 %v7071_v12 }
 0x767   :  { %2126 = vmatprep.subr.mxu0 %v2093_v30  ;;  %2239 = vmatprep.subr.mxu1 %v2095_v31 }
 0x768   :  { %2127 = vmatpush1.msra.mxu0 %v2092_v34  ;;  %2240 = vmatpush1.msra.mxu1 %v2094_v35 }
 0x769   :  { %1895 = vmatmul.mubr.f32.gmra.mxu0 %v5526_v25  ;;  %2008 = vmatmul.mubr.f32.gmra.mxu1 %v5526_v25 }
 0x76a   :  { %1900 = vmatprep.mubr.f32.mxu0 %v7071_v12  ;;  %2013 = vmatprep.mubr.f32.mxu1 %v7071_v12 }
 0x76b   :  { %2128 = vmatprep.subr.mxu0 %v2089_v36  ;;  %2241 = vmatprep.subr.mxu1 %v2091_v38 }
 0x76c   :  { %2129 = vmatpush1.msra.mxu0 %v2088_v39  ;;  %2242 = vmatpush1.msra.mxu1 %v2090_v40 }
 0x76d   :  { %2130 = vmatprep.subr.mxu0 %v2085_v41  ;;  %2243 = vmatprep.subr.mxu1 %v2087_v42 }
 0x76e   :  { %2131 = vmatpush1.msra.mxu0 %v2084_v43  ;;  %2244 = vmatpush1.msra.mxu1 %v2086_v44 }
 0x76f   :  { %2132 = vmatprep.subr.mxu0 %v2081_v45  ;;  %2245 = vmatprep.subr.mxu1 %v2083_v46 }
 0x770   :  { %2133 = vmatpush1.msra.mxu0 %v2080_v47  ;;  %2246 = vmatpush1.msra.mxu1 %v2082_v48 }
 0x771   :  { %2134 = vmatprep.subr.mxu0 %v2077_v49  ;;  %2247 = vmatprep.subr.mxu1 %v2079_v51  ;;  %v5577_v51 = vld [vmem:[#allocation12 + $0x1e0] sm:$0xff] }
 0x772   :  { %2135 = vmatpush1.msra.mxu0 %v2076_v52  ;;  %2248 = vmatpush1.msra.mxu1 %v2078_v20  ;;  %v5579_v52 = vld [vmem:[#allocation12 + $0x1f0] sm:$0xff]  ;;  %v5583_v20 = vld [vmem:[#allocation12 + $0x1d8] sm:$0xff] }
 0x773   :  { %2136 = vmatprep.subr.mxu0 %v2073_v26  ;;  %2249 = vmatprep.subr.mxu1 %v2075_v27  ;;  %v5587_v26 = vld [vmem:[#allocation12 + $0x1c0] sm:$0xff]  ;;  %v5591_v27 = vld [vmem:[#allocation12 + $0x1a8] sm:$0xff] }
 0x774   :  { %2137 = vmatpush1.msra.mxu0 %v2072_v29  ;;  %2250 = vmatpush1.msra.mxu1 %v2074_v7  ;;  %v5595_v29 = vld [vmem:[#allocation12 + $0x1d0] sm:$0xff]  ;;  %v5599_v7 = vld [vmem:[#allocation12 + $0x1a0] sm:$0xff] }
 0x775   :  { %2138 = vmatprep.subr.mxu0 %v2069_v23  ;;  %2251 = vmatprep.subr.mxu1 %v2071_v15  ;;  %v5605_v23 = vld [vmem:[#allocation12 + $0x188] sm:$0xff]  ;;  %v5609_v15 = vld [vmem:[#allocation12 + $0x1b0] sm:$0xff] }
 0x776   :  { %2139 = vmatpush1.msra.mxu0 %v2068_v17  ;;  %2252 = vmatpush1.msra.mxu1 %v2070_v18  ;;  %v5611_v17 = vld [vmem:[#allocation12 + $0x180] sm:$0xff]  ;;  %v5615_v18 = vld [vmem:[#allocation12 + $0x198] sm:$0xff] }
 0x777   :  { %2140 = vmatprep.subr.mxu0 %v2065_v19  ;;  %2253 = vmatprep.subr.mxu1 %v2067_v21  ;;  %v5619_v19 = vld [vmem:[#allocation12 + $0x168] sm:$0xff]  ;;  %v5623_v21 = vld [vmem:[#allocation12 + $0x190] sm:$0xff] }
 0x778   :  { %2141 = vmatpush1.msra.mxu0 %v2064_v14  ;;  %2254 = vmatpush1.msra.mxu1 %v2066_v24  ;;  %v5631_v14 = vld [vmem:[#allocation12 + $0x178] sm:$0xff]  ;;  %v5633_v24 = vld [vmem:[#allocation12 + $0x148] sm:$0xff] }
 0x779   :  { %2142 = vmatprep.subr.mxu0 %v2061_v16  ;;  %2255 = vmatprep.subr.mxu1 %v2063_v58  ;;  %7082 = vst [vmem:[#allocation28_spill] sm:$0xff] %v5631_v14  ;;  %7083 = vst [vmem:[#allocation29_spill] sm:$0xff] %v5633_v24  ;;  %v5637_v16 = vld [vmem:[#allocation12 + $0x170] sm:$0xff]  ;;  %v5639_v58 = vld [vmem:[#allocation12 + $0x140] sm:$0xff] }
 0x77a   :  { %2143 = vmatpush1.msra.mxu0 %v2060_v56  ;;  %2256 = vmatpush1.msra.mxu1 %v2062_v55  ;;  %7084 = vst [vmem:[#allocation30_spill] sm:$0xff] %v5637_v16  ;;  %7085 = vst [vmem:[#allocation31_spill] sm:$0xff] %v5639_v58  ;;  %v5643_v56 = vld [vmem:[#allocation12 + $0x158] sm:$0xff]  ;;  %v5647_v55 = vld [vmem:[#allocation12 + $0x128] sm:$0xff] }
 0x77b   :  { %2144 = vmatprep.subr.mxu0 %v2057_v6  ;;  %2257 = vmatprep.subr.mxu1 %v2059_v3  ;;  %7086 = vst [vmem:[#allocation33_spill] sm:$0xff] %v5643_v56  ;;  %7087 = vst [vmem:[#allocation34_spill] sm:$0xff] %v5647_v55  ;;  %v5651_v6 = vld [vmem:[#allocation12 + $0x150] sm:$0xff]  ;;  %v5659_v3 = vld [vmem:[#allocation12 + $0x138] sm:$0xff] }
 0x77c   :  { %2145 = vmatpush1.msra.mxu0 %v2056_v0  ;;  %2258 = vmatpush1.msra.mxu1 %v2058_v62  ;;  %7088 = vst [vmem:[#allocation35_spill] sm:$0xff] %v5651_v6  ;;  %7090 = vst [vmem:[#allocation22_spill] sm:$0xff] %v5659_v3  ;;  %v5661_v0 = vld [vmem:[#allocation12 + $0x108] sm:$0xff]  ;;  %v5665_v62 = vld [vmem:[#allocation12 + $0x130] sm:$0xff] }
 0x77d   :  { %2146 = vmatprep.subr.mxu0 %v2053_v4  ;;  %2259 = vmatprep.subr.mxu1 %v2055_v50  ;;  %7091 = vst [vmem:[#allocation23_spill] sm:$0xff] %v5661_v0  ;;  %7092 = vst [vmem:[#allocation24_spill] sm:$0xff] %v5665_v62  ;;  %v5667_v4 = vld [vmem:[#allocation12 + $0x100] sm:$0xff]  ;;  %v5675_v50 = vld [vmem:[#allocation12 + $0xe8] sm:$0xff] }
 0x77e   :  { %2147 = vmatpush1.msra.mxu0 %v2052_v57  ;;  %2260 = vmatpush1.msra.mxu1 %v2054_v54  ;;  %7093 = vst [vmem:[#allocation25_spill] sm:$0xff] %v5667_v4  ;;  %v5671_v57 = vld [vmem:[#allocation12 + $0x118] sm:$0xff]  ;;  %7095 = vst [vmem:[#allocation40_spill] sm:$0xff] %v5675_v50  ;;  %v5679_v54 = vld [vmem:[#allocation12 + $0x110] sm:$0xff] }
 0x77f   :  { %2450 = vmatprep.subr.mxu0 %v5560_v2  ;;  %2521 = vmatprep.subr.mxu1 %v5562_v5  ;;  %7094 = vst [vmem:[#allocation26_spill] sm:$0xff] %v5671_v57  ;;  %7096 = vst [vmem:[#allocation41_spill] sm:$0xff] %v5679_v54 }
 0x7f0   :  { %v1595_v8 = vpop.f32.mrf.mxu0  ;;  %v1666_v30 = vpop.f32.mrf.mxu1 }
 0x7f1   :  { %v1671_v9 = vadd.f32 %v1595_v8, %v7072_v32  ;;  %v1673_v39 = vadd.f32 %v1666_v30, %v4926_v60  ;;  %v5687_v8 = vld [vmem:[#allocation12 + $0xf8] sm:$0xff]  ;;  %v5703_v30 = vld [vmem:[#allocation12 + $0xa8] sm:$0xff] }
 0x7f2   :  { %v1597_v10 = vpop.f32.mrf.mxu0  ;;  %v1668_v34 = vpop.f32.mrf.mxu1  ;;  %7098 = vst [vmem:[#allocation37_spill] sm:$0xff] %v5687_v8  ;;  %7103 = vst [vmem:[#allocation20_spill] sm:$0xff] %v5703_v30 }
 0x7f3   :  { %v4008_v11 = vmul.f32 -1.442695, %v1671_v9  ;;  %v1672_v28 = vadd.f32 %v1597_v10, %v7073_v37  ;;  %v1674_v35 = vadd.f32 %v1668_v34, %v4921_v61  ;;  %v5689_v9 = vld [vmem:[#allocation12 + $0xc8] sm:$0xff]  ;;  %v5693_v10 = vld [vmem:[#allocation12 + $0xf0] sm:$0xff]  ;;  %v5715_v34 = vld [vmem:[#allocation12 + $0xb8] sm:$0xff] }
 0x7f4   :  { %7099 = vst [vmem:[#allocation38_spill] sm:$0xff] %v5689_v9  ;;  %7100 = vst [vmem:[#allocation39_spill] sm:$0xff] %v5693_v10 }
 0x7f5   :  { %4163 = vpow2.f32 %v4008_v11  ;;  %v4009_v31 = vmul.f32 -1.442695, %v1672_v28  ;;  %v4010_v36 = vmul.f32 -1.442695, %v1674_v35  ;;  %v5695_v11 = vld [vmem:[#allocation12 + $0xc0] sm:$0xff]  ;;  %v5699_v28 = vld [vmem:[#allocation12 + $0xd8] sm:$0xff] }
 0x7f6   :  { %7101 = vst [vmem:[#allocation18_spill] sm:$0xff] %v5695_v11  ;;  %7102 = vst [vmem:[#allocation16_spill] sm:$0xff] %v5699_v28  ;;  %v5717_v35 = vld [vmem:[#allocation12 + $0x88] sm:$0xff] }
 0x7f7   :  { %4165 = vpow2.f32 %v4009_v31  ;;  %v5707_v31 = vld [vmem:[#allocation12 + $0xd0] sm:$0xff]  ;;  %7106 = vst [vmem:[#allocation44_spill] sm:$0xff] %v5715_v34  ;;  %7107 = vst [vmem:[#allocation45_spill] sm:$0xff] %v5717_v35 }
 0x7f8   :  { %4167 = vpow2.f32 %v4010_v36  ;;  %7104 = vst [vmem:[#allocation32_spill] sm:$0xff] %v5707_v31  ;;  %v5721_v36 = vld [vmem:[#allocation12 + $0xb0] sm:$0xff] }
 0x7f9   :  { %7108 = vst [vmem:[#allocation46_spill] sm:$0xff] %v5721_v36 }
 0x802   :  { %v4164_v38 = vpop.eup %4163 }
 0x803   :  { %v1678_v40 = vadd.f32 1.0, %v4164_v38  ;;  %v5723_v38 = vld [vmem:[#allocation12 + $0x80] sm:$0xff] }
 0x804   :  { %v4166_v41 = vpop.eup %4165  ;;  %7109 = vst [vmem:[#allocation47_spill] sm:$0xff] %v5723_v38 }
 0x805   :  { %4169 = vrcp.f32 %v1678_v40  ;;  %v1684_v32 = vadd.f32 1.0, %v4166_v41  ;;  %v4168_v42 = vpop.eup %4167  ;;  %v5731_v40 = vld [vmem:[#allocation12 + $0x68] sm:$0xff]  ;;  %v5735_v41 = vld [vmem:[#allocation12 + $0x90] sm:$0xff] }
 0x806   :  { %4171 = vtanh.f32 %v1673_v39  ;;  %v1691_v45 = vadd.f32 1.0, %v4168_v42  ;;  %v5727_v39 = vld [vmem:[#allocation12 + $0x98] sm:$0xff]  ;;  %7111 = vst [vmem:[#allocation49_spill] sm:$0xff] %v5731_v40  ;;  %7112 = vst [vmem:[#allocation50_spill] sm:$0xff] %v5735_v41  ;;  %v5745_v42 = vld [vmem:[#allocation12 + $0x48] sm:$0xff] }
 0x807   :  { %4173 = vrcp.f32 %v1684_v32  ;;  %7110 = vst [vmem:[#allocation48_spill] sm:$0xff] %v5727_v39  ;;  %v5743_v32 = vld [vmem:[#allocation12 + $0x78] sm:$0xff]  ;;  %7115 = vst [vmem:[#allocation53_spill] sm:$0xff] %v5745_v42 }
 0x808   :  { %4175 = vrcp.f32 %v1691_v45  ;;  %7114 = vst [vmem:[#allocation52_spill] sm:$0xff] %v5743_v32  ;;  %v5759_v45 = vld [vmem:[#allocation12 + $0x28] sm:$0xff] }
 0x809   :  { %7119 = vst [vmem:[#allocation57_spill] sm:$0xff] %v5759_v45 }
 0x812   :  { %v4170_v37 = vpop.eup %4169 }
 0x813   :  { %v4172_v43 = vpop.eup %4171 }
 0x814   :  { %v4174_v44 = vpop.eup %4173  ;;  %v1695_v46 = vmul.f32 %v4172_v43, %v4170_v37  ;;  %v5749_v37 = vld [vmem:[#allocation12 + $0x70] sm:$0xff]  ;;  %v5751_v43 = vld [vmem:[#allocation12 + $0x40] sm:$0xff] }
 0x815   :  { %v1694_v47 = vmul.f32 %v4174_v44, %v5523_v33  ;;  %v4176_v48 = vpop.eup %4175  ;;  %v5581_v33 = vld [vmem:[#allocation12 + $0x1c8] sm:$0xff]  ;;  %7116 = vst [vmem:[#allocation54_spill] sm:$0xff] %v5749_v37  ;;  %7117 = vst [vmem:[#allocation55_spill] sm:$0xff] %v5751_v43  ;;  %v5755_v44 = vld [vmem:[#allocation12 + $0x58] sm:$0xff] }
 0x816   :  { %7118 = vst [vmem:[#allocation56_spill] sm:$0xff] %v5755_v44 }
 0x817   :  { %v1696_v61 = vadd.f32 %v1695_v46, %v1694_v47  ;;  %v5763_v46 = vld [vmem:[#allocation12 + $0x50] sm:$0xff]  ;;  %v5771_v47 = vld [vmem:[#allocation12 + $0x38] sm:$0xff] }
 0x818   :  { %7120 = vst [vmem:[#allocation58_spill] sm:$0xff] %v5763_v46  ;;  %7122 = vst [vmem:[#allocation60_spill] sm:$0xff] %v5771_v47 }
 0x819   :  { %4177 = vtanh.f32 %v1696_v61  ;;  %v5773_v61 = vld [vmem:[#allocation12 + $0x8] sm:$0xff] }
 0x81a   :  { %7123 = vst [vmem:[#allocation61_spill] sm:$0xff] %v5773_v61 }
 0x826   :  { %v4178_v60 = vpop.eup %4177 }
 0x827   :  { %v5571_v49 = vmul.f32 %v4178_v60, %v4176_v48  ;;  %v5777_v48 = vld [vmem:[#allocation12 + $0x30] sm:$0xff]  ;;  %v5779_v60 = vld [vmem:[#allocation12] sm:$0xff] }
 0x828   :  { %7124 = vst [vmem:[#allocation62_spill] sm:$0xff] %v5777_v48  ;;  %7125 = vst [vmem:[#allocation63_spill] sm:$0xff] %v5779_v60 }
 0x829   :  { %1901 = vmatmul.mubr.f32.gmra.mxu0 %v5571_v49  ;;  %2014 = vmatmul.mubr.f32.gmra.mxu1 %v5571_v49 }
 0x82a   :  { %2180 = vmatprep.mubr.f32.mxu0 %v7071_v12  ;;  %2293 = vmatprep.mubr.f32.mxu1 %v7071_v12 }
 0x82d   :  { %2181 = vmatmul.mubr.f32.vlgmr.msra.gmra.mxu0 %v7074_v22  ;;  %2294 = vmatmul.mubr.f32.vlgmr.msra.gmra.mxu1 %v7074_v22  ;;  %v5603_v22 = vld [vmem:[#allocation12 + $0x1b8] sm:$0xff] }
 0x82e   :  { %2451 = vmatpush1.msra.mxu0 %v5577_v51  ;;  %2522 = vmatpush1.msra.mxu1 %v5579_v52 }
 0x82f   :  { %2452 = vmatprep.subr.mxu0 %v5581_v33  ;;  %2523 = vmatprep.subr.mxu1 %v5583_v20 }
 0x830   :  { %2453 = vmatpush1.msra.mxu0 %v5587_v26  ;;  %2186 = vmatprep.mubr.f32.mxu0 %v7071_v12 }
 0x831   :  { %2299 = vmatprep.mubr.f32.mxu1 %v7071_v12  ;;  %2454 = vmatprep.subr.mxu0 %v5591_v27 }
 0x832   :  { %2524 = vmatpush1.msra.mxu1 %v5595_v29  ;;  %2187 = vmatmul.mubr.f32.gmra.mxu0 %v7075_v13 }
 0x833   :  { %2300 = vmatmul.mubr.f32.gmra.mxu1 %v7075_v13  ;;  %2455 = vmatpush1.msra.mxu0 %v5599_v7  ;;  %v5627_v13 = vld [vmem:[#allocation12 + $0x160] sm:$0xff] }
 0x834   :  { %2525 = vmatprep.subr.mxu1 %v5603_v22  ;;  %2456 = vmatprep.subr.mxu0 %v5605_v23  ;;  %7081 = vst [vmem:[#allocation27_spill] sm:$0xff] %v5627_v13 }
 0x835   :  { %2526 = vmatpush1.msra.mxu1 %v5609_v15  ;;  %2457 = vmatpush1.msra.mxu0 %v5611_v17 }
 0x836   :  { %2527 = vmatprep.subr.mxu1 %v5615_v18  ;;  %2192 = vmatprep.mubr.f32.mxu0 %v7071_v12 }
 0x837   :  { %2305 = vmatprep.mubr.f32.mxu1 %v7071_v12  ;;  %2458 = vmatprep.subr.mxu0 %v5619_v19 }
 0x838   :  { %2528 = vmatpush1.msra.mxu1 %v5623_v21  ;;  %2193 = vmatmul.mubr.f32.gmra.mxu0 %v7076_v63 }
 0x839   :  { %2306 = vmatmul.mubr.f32.gmra.mxu1 %v7076_v63  ;;  %2459 = vmatpush1.msra.mxu0 %v5627_v13  ;;  %v5655_v63 = vld [vmem:[#allocation12 + $0x120] sm:$0xff] }
 0x83a   :  { %2529 = vmatprep.subr.mxu1 %v5631_v14  ;;  %2460 = vmatprep.subr.mxu0 %v5633_v24  ;;  %7089 = vst [vmem:[#allocation21_spill] sm:$0xff] %v5655_v63 }
 0x83b   :  { %2530 = vmatpush1.msra.mxu1 %v5637_v16  ;;  %2461 = vmatpush1.msra.mxu0 %v5639_v58 }
 0x83c   :  { %2531 = vmatprep.subr.mxu1 %v5643_v56  ;;  %2198 = vmatprep.mubr.f32.mxu0 %v7071_v12 }
 0x83d   :  { %2311 = vmatprep.mubr.f32.mxu1 %v7071_v12  ;;  %2462 = vmatprep.subr.mxu0 %v5647_v55 }
 0x83e   :  { %2532 = vmatpush1.msra.mxu1 %v5651_v6  ;;  %2199 = vmatmul.mubr.f32.gmra.mxu0 %v7077_v1 }
 0x83f   :  { %2312 = vmatmul.mubr.f32.gmra.mxu1 %v7077_v1  ;;  %2463 = vmatpush1.msra.mxu0 %v5655_v63  ;;  %v5683_v1 = vld [vmem:[#allocation12 + $0xe0] sm:$0xff] }
 0x840   :  { %2533 = vmatprep.subr.mxu1 %v5659_v3  ;;  %2464 = vmatprep.subr.mxu0 %v5661_v0  ;;  %7097 = vst [vmem:[#allocation42_spill] sm:$0xff] %v5683_v1 }
 0x841   :  { %2534 = vmatpush1.msra.mxu1 %v5665_v62  ;;  %2465 = vmatpush1.msra.mxu0 %v5667_v4 }
 0x842   :  { %2535 = vmatprep.subr.mxu1 %v5671_v57  ;;  %2204 = vmatprep.mubr.f32.mxu0 %v7071_v12 }
 0x843   :  { %2317 = vmatprep.mubr.f32.mxu1 %v7071_v12  ;;  %2466 = vmatprep.subr.mxu0 %v5675_v50 }
 0x844   :  { %2536 = vmatpush1.msra.mxu1 %v5679_v54  ;;  %2205 = vmatmul.mubr.f32.gmra.mxu0 %v7078_v53 }
 0x845   :  { %2318 = vmatmul.mubr.f32.gmra.mxu1 %v7078_v53  ;;  %2467 = vmatpush1.msra.mxu0 %v5683_v1  ;;  %v5711_v53 = vld [vmem:[#allocation12 + $0xa0] sm:$0xff] }
 0x846   :  { %2537 = vmatprep.subr.mxu1 %v5687_v8  ;;  %2468 = vmatprep.subr.mxu0 %v5689_v9  ;;  %7105 = vst [vmem:[#allocation43_spill] sm:$0xff] %v5711_v53 }
 0x847   :  { %2538 = vmatpush1.msra.mxu1 %v5693_v10  ;;  %2469 = vmatpush1.msra.mxu0 %v5695_v11 }
 0x848   :  { %2539 = vmatprep.subr.mxu1 %v5699_v28  ;;  %2210 = vmatprep.mubr.f32.mxu0 %v7071_v12 }
 0x849   :  { %2323 = vmatprep.mubr.f32.mxu1 %v7071_v12  ;;  %2470 = vmatprep.subr.mxu0 %v5703_v30 }
 0x84a   :  { %2540 = vmatpush1.msra.mxu1 %v5707_v31  ;;  %2211 = vmatmul.mubr.f32.gmra.mxu0 %v5450_v59 }
 0x84b   :  { %2324 = vmatmul.mubr.f32.gmra.mxu1 %v5450_v59  ;;  %2471 = vmatpush1.msra.mxu0 %v5711_v53  ;;  %v5739_v59 = vld [vmem:[#allocation12 + $0x60] sm:$0xff] }
 0x84c   :  { %2541 = vmatprep.subr.mxu1 %v5715_v34  ;;  %2472 = vmatprep.subr.mxu0 %v5717_v35  ;;  %7113 = vst [vmem:[#allocation51_spill] sm:$0xff] %v5739_v59 }
 0x84d   :  { %2542 = vmatpush1.msra.mxu1 %v5721_v36  ;;  %2473 = vmatpush1.msra.mxu0 %v5723_v38 }
 0x84e   :  { %2543 = vmatprep.subr.mxu1 %v5727_v39  ;;  %2216 = vmatprep.mubr.f32.mxu0 %v7071_v12 }
 0x84f   :  { %2329 = vmatprep.mubr.f32.mxu1 %v7071_v12  ;;  %2474 = vmatprep.subr.mxu0 %v5731_v40 }
 0x850   :  { %2544 = vmatpush1.msra.mxu1 %v5735_v41  ;;  %2217 = vmatmul.mubr.f32.gmra.mxu0 %v5526_v25 }
 0x851   :  { %2330 = vmatmul.mubr.f32.gmra.mxu1 %v5526_v25  ;;  %2475 = vmatpush1.msra.mxu0 %v5739_v59  ;;  %v5767_v25 = vld [vmem:[#allocation12 + $0x20] sm:$0xff] }
 0x852   :  { %2545 = vmatprep.subr.mxu1 %v5743_v32  ;;  %2476 = vmatprep.subr.mxu0 %v5745_v42  ;;  %7121 = vst [vmem:[#allocation59_spill] sm:$0xff] %v5767_v25 }
 0x853   :  { %2546 = vmatpush1.msra.mxu1 %v5749_v37  ;;  %2477 = vmatpush1.msra.mxu0 %v5751_v43  ;;  %v5783_v43 = vld [vmem:[#allocation12 + $0x18] sm:$0xff] }
 0x854   :  { %2547 = vmatprep.subr.mxu1 %v5755_v44  ;;  %2222 = vmatprep.mubr.f32.mxu0 %v7071_v12  ;;  %7126 = vst [vmem:[#allocation64_spill] sm:$0xff] %v5783_v43 }
 0x855   :  { %2335 = vmatprep.mubr.f32.mxu1 %v7071_v12  ;;  %2478 = vmatprep.subr.mxu0 %v5759_v45  ;;  %v5787_v45 = vld [vmem:[#allocation12 + $0x10] sm:$0xff] }
 0x856   :  { %2548 = vmatpush1.msra.mxu1 %v5763_v46  ;;  %2223 = vmatmul.mubr.f32.gmra.mxu0 %v5571_v49  ;;  %7127 = vst [vmem:[#allocation65_spill] sm:$0xff] %v5787_v45 }
 0x857   :  { %2336 = vmatmul.mubr.f32.gmra.mxu1 %v5571_v49  ;;  %2479 = vmatpush1.msra.mxu0 %v5767_v25  ;;  %v7128_v49 = vld [vmem:[#allocation55_spill] sm:$0xff] }
 0x858   :  { %2549 = vmatprep.subr.mxu1 %v5771_v47  ;;  %2480 = vmatprep.subr.mxu0 %v5773_v61 }
 0x859   :  { %2550 = vmatpush1.msra.mxu1 %v5777_v48  ;;  %2481 = vmatpush1.msra.mxu0 %v5779_v60 }
 0x85a   :  { %2551 = vmatprep.subr.mxu1 %v5783_v43  ;;  %2514 = vmatprep.mubr.f32.mxu0 %v7071_v12 }
 0x85b   :  { %2552 = vmatpush1.msra.mxu1 %v5787_v45  ;;  %2585 = vmatprep.mubr.f32.mxu1 %v7071_v12 }
 0x85c   :  { %2515 = vmatmul.mubr.f32.vlgmr.msra.gmra.mxu0 %v7071_v12  ;;  %2586 = vmatmul.mubr.f32.vlgmr.msra.gmra.mxu1 %v7071_v12 }
 0x85d   :  { %2632 = vmatprep.subr.mxu0 %v5560_v2  ;;  %2703 = vmatprep.subr.mxu1 %v5562_v5 }
 0x85e   :  { %2633 = vmatpush1.msra.mxu0 %v5577_v51  ;;  %2704 = vmatpush1.msra.mxu1 %v5579_v52 }
 0x85f   :  { %2634 = vmatprep.subr.mxu0 %v5581_v33  ;;  %2705 = vmatprep.subr.mxu1 %v5583_v20 }
 0x860   :  { %2635 = vmatpush1.msra.mxu0 %v5587_v26  ;;  %2706 = vmatpush1.msra.mxu1 %v5595_v29 }
 0x861   :  { %2636 = vmatprep.subr.mxu0 %v5591_v27  ;;  %2707 = vmatprep.subr.mxu1 %v5603_v22 }
 0x862   :  { %2637 = vmatpush1.msra.mxu0 %v5599_v7  ;;  %2708 = vmatpush1.msra.mxu1 %v5609_v15 }
 0x863   :  { %2638 = vmatprep.subr.mxu0 %v5605_v23  ;;  %2709 = vmatprep.subr.mxu1 %v5615_v18 }
 0x864   :  { %2639 = vmatpush1.msra.mxu0 %v5611_v17  ;;  %2710 = vmatpush1.msra.mxu1 %v5623_v21 }
 0x865   :  { %2640 = vmatprep.subr.mxu0 %v5619_v19  ;;  %2711 = vmatprep.subr.mxu1 %v5631_v14 }
 0x866   :  { %2641 = vmatpush1.msra.mxu0 %v5627_v13  ;;  %2712 = vmatpush1.msra.mxu1 %v5637_v16 }
 0x867   :  { %2642 = vmatprep.subr.mxu0 %v5633_v24  ;;  %2713 = vmatprep.subr.mxu1 %v5643_v56 }
 0x868   :  { %2643 = vmatpush1.msra.mxu0 %v5639_v58  ;;  %2714 = vmatpush1.msra.mxu1 %v5651_v6 }
 0x869   :  { %2644 = vmatprep.subr.mxu0 %v5647_v55  ;;  %2715 = vmatprep.subr.mxu1 %v5659_v3 }
 0x86a   :  { %2645 = vmatpush1.msra.mxu0 %v5655_v63  ;;  %2716 = vmatpush1.msra.mxu1 %v5665_v62 }
 0x86b   :  { %2646 = vmatprep.subr.mxu0 %v5661_v0  ;;  %2717 = vmatprep.subr.mxu1 %v5671_v57 }
 0x86c   :  { %2647 = vmatpush1.msra.mxu0 %v5667_v4  ;;  %2718 = vmatpush1.msra.mxu1 %v5679_v54 }
 0x86d   :  { %2648 = vmatprep.subr.mxu0 %v5675_v50  ;;  %2719 = vmatprep.subr.mxu1 %v5687_v8 }
 0x86e   :  { %2649 = vmatpush1.msra.mxu0 %v5683_v1  ;;  %2720 = vmatpush1.msra.mxu1 %v5693_v10  ;;  %v7132_v1 = vld [vmem:[#allocation36_spill] sm:$0xff] }
 0x86f   :  { %2650 = vmatprep.subr.mxu0 %v5689_v9  ;;  %2721 = vmatprep.subr.mxu1 %v5699_v28  ;;  %v7133_v8 = vsub.s32 0, %v7132_v1  ;;  %v7134_v54 = vsub.s32 2, %v7132_v1  ;;  %v7135_v62 = vsub.s32 1, %v7132_v1 }
 0x870   :  { %2651 = vmatpush1.msra.mxu0 %v5695_v11  ;;  %2722 = vmatpush1.msra.mxu1 %v5707_v31  ;;  %v1772_v31 = vld [vmem:[%s6674_s6] sm:$0xf]  ;;  %s4549_s6 = smov 64  }
 0x871   :  { %2652 = vmatprep.subr.mxu0 %v5703_v30  ;;  %2723 = vmatprep.subr.mxu1 %v5715_v34  ;;  %v5906_v50 = vrot.slane %v1772_v31, %v7133_v8  ;;  %v5910_v4 = vrot.slane %v1772_v31, %v7134_v54  ;;  %v5914_v63 = vrot.slane %v1772_v31, %v7135_v62 }
 0x872   :  { %2653 = vmatpush1.msra.mxu0 %v5711_v53  ;;  %2724 = vmatpush1.msra.mxu1 %v5721_v36 }
 0x873   :  { %2654 = vmatprep.subr.mxu0 %v5717_v35  ;;  %2725 = vmatprep.subr.mxu1 %v5727_v39  ;;  %v7129_v39 = vld [vmem:[#allocation57_spill] sm:$0xff]  ;;  %7136 = vst [vmem:[#allocation36_spill] sm:$0xff] %v5914_v63 }
 0x874   :  { %2655 = vmatpush1.msra.mxu0 %v5723_v38  ;;  %2726 = vmatpush1.msra.mxu1 %v5735_v41 }
 0x875   :  { %2656 = vmatprep.subr.mxu0 %v5731_v40  ;;  %2727 = vmatprep.subr.mxu1 %v5743_v32 }
 0x876   :  { %2657 = vmatpush1.msra.mxu0 %v5739_v59  ;;  %2728 = vmatpush1.msra.mxu1 %v5749_v37 }
 0x877   :  { %2658 = vmatprep.subr.mxu0 %v5745_v42  ;;  %2729 = vmatprep.subr.mxu1 %v5755_v44 }
 0x878   :  { %2659 = vmatpush1.msra.mxu0 %v7128_v49  ;;  %2730 = vmatpush1.msra.mxu1 %v5763_v46 }
 0x879   :  { %2660 = vmatprep.subr.mxu0 %v7129_v39  ;;  %2731 = vmatprep.subr.mxu1 %v5771_v47  ;;  %v5865_v47 = vpop.f32.mrf.mxu0 }
 0x87a   :  { %2661 = vmatpush1.msra.mxu0 %v5767_v25  ;;  %2732 = vmatpush1.msra.mxu1 %v5777_v48  ;;  %v5867_v25 = vpop.f32.mrf.mxu1 }
 0x87b   :  { %2662 = vmatprep.subr.mxu0 %v5773_v61  ;;  %2733 = vmatprep.subr.mxu1 %v5783_v43  ;;  %v5869_v48 = vpop.f32.mrf.mxu0 }
 0x87c   :  { %2663 = vmatpush1.msra.mxu0 %v5779_v60  ;;  %2696 = vmatprep.mubr.f32.mxu0 %v7071_v12  ;;  %v5871_v61 = vpop.f32.mrf.mxu1 }
 0x87d   :  { %2734 = vmatpush1.msra.mxu1 %v5787_v45  ;;  %2767 = vmatprep.mubr.f32.mxu1 %v7071_v12  ;;  %v5873_v43 = vpop.f32.mrf.mxu0 }
 0x87e   :  { %2814 = vmatprep.subr.mxu0 %v5560_v2  ;;  %2885 = vmatprep.subr.mxu1 %v5562_v5  ;;  %v5875_v60 = vpop.f32.mrf.mxu1 }
 0x87f   :  { %v5877_v39 = vpop.f32.mrf.mxu0 }
 0x880   :  { %v5879_v45 = vpop.f32.mrf.mxu1 }
 0x881   :  { %v5881_v12 = vpop.f32.mrf.mxu0 }
 0x882   :  { %v5883_v2 = vpop.f32.mrf.mxu1 }
 0x883   :  { %v5885_v5 = vpop.f32.mrf.mxu0 }
 0x884   :  { %v5887_v46 = vpop.f32.mrf.mxu1 }
 0x885   :  { %v5889_v49 = vpop.f32.mrf.mxu0 }
 0x886   :  { %v5891_v44 = vpop.f32.mrf.mxu1 }
 0x887   :  { %v5893_v42 = vpop.f32.mrf.mxu0 }
 0x888   :  { %v5895_v37 = vpop.f32.mrf.mxu1 }
 0x889   :  { %v1884_v59 = vpop.f32.mrf.mxu0 }
 0x88a   :  { %v1997_v32 = vpop.f32.mrf.mxu1 }
 0x88b   :  { %v1886_v40 = vpop.f32.mrf.mxu0 }
 0x88c   :  { %v1999_v41 = vpop.f32.mrf.mxu1 }
 0x88d   :  { %v1890_v38 = vpop.f32.mrf.mxu0 }
 0x88e   :  { %v2003_v35 = vpop.f32.mrf.mxu1 }
 0x88f   :  { %v1892_v36 = vpop.f32.mrf.mxu0 }
 0x890   :  { %v2005_v53 = vpop.f32.mrf.mxu1 }
 0x891   :  { %v1896_v34 = vpop.f32.mrf.mxu0 }
 0x892   :  { %v2009_v30 = vpop.f32.mrf.mxu1 }
 0x893   :  { %v5900_v11 = vpop.f32.mrf.mxu0 }
 0x894   :  { %7130 = vst [vmem:[#allocation66_spill] sm:$0xff] %v5900_v11  ;;  %v5902_v28 = vpop.f32.mrf.mxu1  ;;  %v7137_v11 = vsub.s32 3, %v7132_v1 }
 0x895   :  { %7131 = vst [vmem:[#allocation67_spill] sm:$0xff] %v5902_v28 }
 0x896   :  { %v5918_v3 = vrot.slane %v1772_v31, %v7137_v11 }
 0x898   :  { %7138 = vst [vmem:[#allocation68_spill] sm:$0xff] %v5918_v3 }
 0x8e9   :  { %v1902_v9 = vpop.f32.mrf.mxu0  ;;  %v2015_v10 = vpop.f32.mrf.mxu1 }
 0x8ea   :  { %v1903_v28 = vadd.f32 %v1902_v9, %v5906_v50  ;;  %v2016_v55 = vadd.f32 %v2015_v10, %v5910_v4  ;;  %v1897_v9 = vadd.f32 %v1896_v34, %v5906_v50  ;;  %v2010_v10 = vadd.f32 %v2009_v30, %v5910_v4 }
 0x8eb   :  { %v1904_v57 = vpop.f32.mrf.mxu0  ;;  %v2017_v0 = vpop.f32.mrf.mxu1 }
 0x8ec   :  { %v1905_v58 = vadd.f32 %v1904_v57, %v5914_v63  ;;  %v2018_v54 = vadd.f32 %v2017_v0, %v5918_v3 }
 0x8ed   :  { %v2182_v8 = vpop.f32.mrf.mxu0  ;;  %v2295_v6 = vpop.f32.mrf.mxu1 }
 0x8ee   :  { %v5924_v56 = vadd.f32 %v2182_v8, %v1903_v28  ;;  %v5926_v24 = vadd.f32 %v2295_v6, %v2016_v55  ;;  %v1891_v6 = vadd.f32 %v1890_v38, %v5906_v50  ;;  %v1893_v28 = vadd.f32 %v1892_v36, %v5914_v63 }
 0x8ef   :  { %v2184_v62 = vpop.f32.mrf.mxu0  ;;  %v2297_v16 = vpop.f32.mrf.mxu1  ;;  %v2006_v8 = vadd.f32 %v2005_v53, %v5918_v3  ;;  %v1885_v38 = vadd.f32 %v1884_v59, %v5906_v50  ;;  %v1887_v36 = vadd.f32 %v1886_v40, %v5914_v63  ;;  %v2000_v53 = vadd.f32 %v1999_v41, %v5918_v3 }
 0x8f0   :  { %7139 = vst [vmem:[#allocation69_spill] sm:$0xff] %v5924_v56  ;;  %7140 = vst [vmem:[#allocation70_spill] sm:$0xff] %v5926_v24  ;;  %v5928_v13 = vadd.f32 %v2184_v62, %v1905_v58  ;;  %v5930_v1 = vadd.f32 %v2297_v16, %v2018_v54  ;;  %v2004_v58 = vadd.f32 %v2003_v35, %v5910_v4 }
 0x8f1   :  { %v1998_v35 = vadd.f32 %v1997_v32, %v5910_v4  ;;  %v1879_v59 = vadd.f32 %v5889_v49, %v5906_v50  ;;  %v1992_v32 = vadd.f32 %v5891_v44, %v5910_v4  ;;  %v1873_v44 = vadd.f32 %v5881_v12, %v5906_v50 }
 0x8f2   :  { %7141 = vst [vmem:[#allocation71_spill] sm:$0xff] %v5928_v13  ;;  %7142 = vst [vmem:[#allocation72_spill] sm:$0xff] %v5930_v1  ;;  %v2188_v11 = vpop.f32.mrf.mxu0  ;;  %v1976_v13 = vadd.f32 %v5871_v61, %v5918_v3 }
 0x8f3   :  { %v5934_v31 = vadd.f32 %v2188_v11, %v1897_v9  ;;  %v2301_v57 = vpop.f32.mrf.mxu1 }
 0x8f4   :  { %v5936_v14 = vadd.f32 %v2301_v57, %v2010_v10  ;;  %v5938_v0 = vpop.f32.mrf.mxu0 }
 0x8f5   :  { %7143 = vst [vmem:[#allocation73_spill] sm:$0xff] %v5934_v31  ;;  %7145 = vst [vmem:[#allocation75_spill] sm:$0xff] %v5938_v0  ;;  %v5940_v55 = vpop.f32.mrf.mxu1  ;;  %v7189_v31 = vld [vmem:[#allocation43_spill] sm:$0xff]  ;;  %v7190_v0 = vld [vmem:[#allocation46_spill] sm:$0xff] }
 0x8f6   :  { %7144 = vst [vmem:[#allocation74_spill] sm:$0xff] %v5936_v14  ;;  %7146 = vst [vmem:[#allocation76_spill] sm:$0xff] %v5940_v55  ;;  %v7186_v14 = vld [vmem:[#allocation32_spill] sm:$0xff] }
 0x8f7   :  { %v7187_v55 = vld [vmem:[#allocation20_spill] sm:$0xff] }
 0x8f8   :  { %v2194_v16 = vpop.f32.mrf.mxu0 }
 0x8f9   :  { %v5945_v34 = vadd.f32 %v2194_v16, %v1891_v6  ;;  %v2307_v30 = vpop.f32.mrf.mxu1 }
 0x8fa   :  { %v5948_v54 = vadd.f32 %v2307_v30, %v2004_v58  ;;  %v2196_v62 = vpop.f32.mrf.mxu0 }
 0x8fb   :  { %7147 = vst [vmem:[#allocation77_spill] sm:$0xff] %v5945_v34  ;;  %v5950_v9 = vadd.f32 %v2196_v62, %v1893_v28  ;;  %v2309_v10 = vpop.f32.mrf.mxu1  ;;  %v7195_v34 = vld [vmem:[#allocation49_spill] sm:$0xff] }
 0x8fc   :  { %7148 = vst [vmem:[#allocation78_spill] sm:$0xff] %v5948_v54  ;;  %v5952_v11 = vadd.f32 %v2309_v10, %v2006_v8  ;;  %v1881_v10 = vadd.f32 %v5893_v42, %v5914_v63  ;;  %v1986_v42 = vadd.f32 %v5883_v2, %v5910_v4  ;;  %v1867_v2 = vadd.f32 %v5873_v43, %v5906_v50  ;;  %v7192_v54 = vld [vmem:[#allocation48_spill] sm:$0xff] }
 0x8fd   :  { %7149 = vst [vmem:[#allocation79_spill] sm:$0xff] %v5950_v9  ;;  %v7194_v9 = vld [vmem:[#allocation50_spill] sm:$0xff] }
 0x8fe   :  { %7150 = vst [vmem:[#allocation80_spill] sm:$0xff] %v5952_v11  ;;  %v2200_v57 = vpop.f32.mrf.mxu0  ;;  %v7193_v11 = vld [vmem:[#allocation47_spill] sm:$0xff] }
 0x8ff   :  { %v5957_v6 = vadd.f32 %v2200_v57, %v1885_v38  ;;  %v2313_v16 = vpop.f32.mrf.mxu1 }
 0x900   :  { %v5960_v58 = vadd.f32 %v2313_v16, %v1998_v35  ;;  %v2202_v30 = vpop.f32.mrf.mxu0  ;;  %v1994_v35 = vadd.f32 %v5895_v37, %v5918_v3 }
 0x901   :  { %7151 = vst [vmem:[#allocation81_spill] sm:$0xff] %v5957_v6  ;;  %v5962_v28 = vadd.f32 %v2202_v30, %v1887_v36  ;;  %v2315_v62 = vpop.f32.mrf.mxu1  ;;  %v7199_v6 = vld [vmem:[#allocation53_spill] sm:$0xff] }
 0x902   :  { %7152 = vst [vmem:[#allocation82_spill] sm:$0xff] %v5960_v58  ;;  %v5964_v8 = vadd.f32 %v2315_v62, %v2000_v53  ;;  %v1875_v62 = vadd.f32 %v5885_v5, %v5914_v63  ;;  %v1980_v5 = vadd.f32 %v5875_v60, %v5910_v4  ;;  %v7196_v58 = vld [vmem:[#allocation52_spill] sm:$0xff] }
 0x903   :  { %7153 = vst [vmem:[#allocation83_spill] sm:$0xff] %v5962_v28  ;;  %v7198_v28 = vld [vmem:[#allocation54_spill] sm:$0xff] }
 0x904   :  { %7154 = vst [vmem:[#allocation84_spill] sm:$0xff] %v5964_v8  ;;  %v2206_v40 = vpop.f32.mrf.mxu0  ;;  %v7197_v8 = vld [vmem:[#allocation51_spill] sm:$0xff] }
 0x905   :  { %v5972_v38 = vadd.f32 %v2206_v40, %v1879_v59  ;;  %v2319_v41 = vpop.f32.mrf.mxu1 }
 0x906   :  { %v5976_v57 = vadd.f32 %v2319_v41, %v1992_v32  ;;  %v2208_v36 = vpop.f32.mrf.mxu0  ;;  %v1988_v32 = vadd.f32 %v5887_v46, %v5918_v3 }
 0x907   :  { %7155 = vst [vmem:[#allocation85_spill] sm:$0xff] %v5972_v38  ;;  %v5978_v16 = vadd.f32 %v2208_v36, %v1881_v10  ;;  %v2321_v53 = vpop.f32.mrf.mxu1  ;;  %v7203_v38 = vld [vmem:[#allocation57_spill] sm:$0xff] }
 0x908   :  { %7156 = vst [vmem:[#allocation86_spill] sm:$0xff] %v5976_v57  ;;  %v5980_v49 = vadd.f32 %v2321_v53, %v1994_v35  ;;  %v1869_v53 = vadd.f32 %v5877_v39, %v5914_v63  ;;  %v7200_v57 = vld [vmem:[#allocation56_spill] sm:$0xff] }
 0x909   :  { %7157 = vst [vmem:[#allocation87_spill] sm:$0xff] %v5978_v16  ;;  %v7202_v16 = vld [vmem:[#allocation58_spill] sm:$0xff] }
 0x90a   :  { %7158 = vst [vmem:[#allocation88_spill] sm:$0xff] %v5980_v49  ;;  %v2212_v30 = vpop.f32.mrf.mxu0  ;;  %v7201_v49 = vld [vmem:[#allocation55_spill] sm:$0xff] }
 0x90b   :  { %v5988_v59 = vadd.f32 %v2212_v30, %v1873_v44  ;;  %v2325_v37 = vpop.f32.mrf.mxu1 }
 0x90c   :  { %v5992_v40 = vadd.f32 %v2325_v37, %v1986_v42  ;;  %v2214_v10 = vpop.f32.mrf.mxu0  ;;  %v1982_v42 = vadd.f32 %v5879_v45, %v5918_v3  ;;  %v7188_v3 = vld [vmem:[#allocation44_spill] sm:$0xff] }
 0x90d   :  { %7159 = vst [vmem:[#allocation89_spill] sm:$0xff] %v5988_v59  ;;  %v5994_v41 = vadd.f32 %v2214_v10, %v1875_v62  ;;  %v2327_v35 = vpop.f32.mrf.mxu1  ;;  %v7207_v59 = vld [vmem:[#allocation61_spill] sm:$0xff] }
 0x90e   :  { %7160 = vst [vmem:[#allocation90_spill] sm:$0xff] %v5992_v40  ;;  %v5996_v12 = vadd.f32 %v2327_v35, %v1988_v32  ;;  %v1861_v35 = vadd.f32 %v5865_v47, %v5906_v50  ;;  %v7204_v40 = vld [vmem:[#allocation60_spill] sm:$0xff] }
 0x90f   :  { %7161 = vst [vmem:[#allocation91_spill] sm:$0xff] %v5994_v41  ;;  %v7206_v41 = vld [vmem:[#allocation62_spill] sm:$0xff] }
 0x910   :  { %7162 = vst [vmem:[#allocation92_spill] sm:$0xff] %v5996_v12  ;;  %v2218_v36 = vpop.f32.mrf.mxu0  ;;  %v7205_v12 = vld [vmem:[#allocation59_spill] sm:$0xff] }
 0x911   :  { %v6004_v44 = vadd.f32 %v2218_v36, %v1867_v2  ;;  %v2331_v46 = vpop.f32.mrf.mxu1  ;;  %v1863_v2 = vadd.f32 %v5869_v48, %v5914_v63  ;;  %v1974_v48 = vadd.f32 %v5867_v25, %v5910_v4  ;;  %v7191_v63 = vld [vmem:[#allocation45_spill] sm:$0xff] }
 0x912   :  { %v6008_v30 = vadd.f32 %v2331_v46, %v1980_v5  ;;  %v2220_v62 = vpop.f32.mrf.mxu0 }
 0x913   :  { %v6010_v37 = vadd.f32 %v2220_v62, %v1869_v53  ;;  %v2333_v32 = vpop.f32.mrf.mxu1 }
 0x914   :  { %v6012_v43 = vadd.f32 %v2333_v32, %v1982_v42 }
 0x916   :  { %v2224_v10 = vpop.f32.mrf.mxu0 }
 0x917   :  { %v2337_v39 = vpop.f32.mrf.mxu1  ;;  %v2446_v36 = vadd.f32 %v2224_v10, %v1861_v35 }
 0x918   :  { %v2226_v60 = vpop.f32.mrf.mxu0  ;;  %v2448_v10 = vadd.f32 %v2337_v39, %v1974_v48  ;;  %v7164_v39 = vld [vmem:[#allocation28_spill] sm:$0xff]  ;;  %v7168_v48 = vld [vmem:[#allocation33_spill] sm:$0xff] }
 0x919   :  { %v2447_v45 = vadd.f32 %v2226_v60, %v1863_v2  ;;  %v2339_v5 = vpop.f32.mrf.mxu1 }
 0x91a   :  { %v2449_v47 = vadd.f32 %v2339_v5, %v1976_v13 }
 0x91c   :  { %v2516_v24 = vpop.f32.mrf.mxu0  ;;  %v2587_v42 = vpop.f32.mrf.mxu1 }
 0x91d   :  { %v2592_v46 = vadd.f32 %v2516_v24, %v2446_v36  ;;  %v2594_v24 = vadd.f32 %v2587_v42, %v2448_v10  ;;  %v7165_v42 = vld [vmem:[#allocation27_spill] sm:$0xff] }
 0x91e   :  { %v2518_v1 = vpop.f32.mrf.mxu0  ;;  %v2589_v50 = vpop.f32.mrf.mxu1  ;;  %v7169_v10 = vld [vmem:[#allocation31_spill] sm:$0xff] }
 0x91f   :  { %v4011_v53 = vmul.f32 -1.442695, %v2592_v46  ;;  %v2593_v62 = vadd.f32 %v2518_v1, %v2447_v45  ;;  %v2595_v56 = vadd.f32 %v2589_v50, %v2449_v47  ;;  %v7166_v50 = vld [vmem:[#allocation30_spill] sm:$0xff]  ;;  %v7167_v47 = vld [vmem:[#allocation29_spill] sm:$0xff] }
 0x921   :  { %4179 = vpow2.f32 %v4011_v53  ;;  %v4012_v32 = vmul.f32 -1.442695, %v2593_v62  ;;  %v4013_v60 = vmul.f32 -1.442695, %v2595_v56 }
 0x923   :  { %4181 = vpow2.f32 %v4012_v32 }
 0x924   :  { %4183 = vpow2.f32 %v4013_v60  ;;  %v7170_v60 = vld [vmem:[#allocation35_spill] sm:$0xff] }
 0x92e   :  { %v4180_v35 = vpop.eup %4179 }
 0x92f   :  { %v2599_v2 = vadd.f32 1.0, %v4180_v35  ;;  %v7171_v35 = vld [vmem:[#allocation34_spill] sm:$0xff] }
 0x930   :  { %v4182_v36 = vpop.eup %4181 }
 0x931   :  { %4185 = vrcp.f32 %v2599_v2  ;;  %v2605_v1 = vadd.f32 1.0, %v4182_v36  ;;  %v4184_v45 = vpop.eup %4183  ;;  %v7173_v2 = vld [vmem:[#allocation21_spill] sm:$0xff]  ;;  %v7174_v36 = vld [vmem:[#allocation24_spill] sm:$0xff] }
 0x932   :  { %4187 = vtanh.f32 %v2594_v24  ;;  %v2612_v13 = vadd.f32 1.0, %v4184_v45  ;;  %v7172_v24 = vld [vmem:[#allocation22_spill] sm:$0xff] }
 0x933   :  { %4189 = vrcp.f32 %v2605_v1  ;;  %v7175_v1 = vld [vmem:[#allocation23_spill] sm:$0xff]  ;;  %v7176_v45 = vld [vmem:[#allocation26_spill] sm:$0xff] }
 0x934   :  { %4191 = vrcp.f32 %v2612_v13  ;;  %v7180_v13 = vld [vmem:[#allocation37_spill] sm:$0xff] }
 0x93e   :  { %v4186_v46 = vpop.eup %4185 }
 0x93f   :  { %v4188_v61 = vpop.eup %4187 }
 0x940   :  { %v4190_v53 = vpop.eup %4189  ;;  %v2616_v62 = vmul.f32 %v4188_v61, %v4186_v46  ;;  %v7177_v46 = vld [vmem:[#allocation25_spill] sm:$0xff] }
 0x941   :  { %v2615_v5 = vmul.f32 0.0, %v4190_v53  ;;  %v4192_v56 = vpop.eup %4191  ;;  %v7178_v61 = vld [vmem:[#allocation41_spill] sm:$0xff]  ;;  %v7179_v53 = vld [vmem:[#allocation40_spill] sm:$0xff] }
 0x943   :  { %v6022_v32 = vadd.f32 %v2616_v62, %v2615_v5  ;;  %v7181_v5 = vld [vmem:[#allocation42_spill] sm:$0xff]  ;;  %v7182_v62 = vld [vmem:[#allocation39_spill] sm:$0xff] }
 0x945   :  { %4193 = vtanh.f32 %v6022_v32 }
 0x952   :  { %v4194_v4 = vpop.eup %4193 }
 0x953   :  { %v6025_v25 = vmul.f32 %v4194_v4, %v4192_v56  ;;  %v7183_v56 = vld [vmem:[#allocation38_spill] sm:$0xff]  ;;  %v7184_v4 = vld [vmem:[#allocation16_spill] sm:$0xff] }
 0x955   :  { %7163 = vst [vmem:[#allocation93_spill] sm:$0xff] %v6025_v25  ;;  %2697 = vmatmul.mubr.f32.vlgmr.msra.gmra.mxu0 %v6025_v25  ;;  %2768 = vmatmul.mubr.f32.vlgmr.msra.gmra.mxu1 %v6025_v25  ;;  %v7185_v25 = vld [vmem:[#allocation18_spill] sm:$0xff] }
 0x956   :  { %2815 = vmatpush1.msra.mxu0 %v5577_v51  ;;  %2886 = vmatpush1.msra.mxu1 %v5579_v52 }
 0x957   :  { %2816 = vmatprep.subr.mxu0 %v5581_v33  ;;  %2887 = vmatprep.subr.mxu1 %v5583_v20 }
 0x958   :  { %2817 = vmatpush1.msra.mxu0 %v5587_v26  ;;  %2888 = vmatpush1.msra.mxu1 %v5595_v29 }
 0x959   :  { %2818 = vmatprep.subr.mxu0 %v5591_v27  ;;  %2889 = vmatprep.subr.mxu1 %v5603_v22 }
 0x95a   :  { %2819 = vmatpush1.msra.mxu0 %v5599_v7  ;;  %2890 = vmatpush1.msra.mxu1 %v5609_v15 }
 0x95b   :  { %2820 = vmatprep.subr.mxu0 %v5605_v23  ;;  %2891 = vmatprep.subr.mxu1 %v5615_v18 }
 0x95c   :  { %2821 = vmatpush1.msra.mxu0 %v5611_v17  ;;  %2892 = vmatpush1.msra.mxu1 %v5623_v21 }
 0x95d   :  { %2822 = vmatprep.subr.mxu0 %v5619_v19  ;;  %2893 = vmatprep.subr.mxu1 %v7164_v39 }
 0x95e   :  { %2823 = vmatpush1.msra.mxu0 %v7165_v42  ;;  %2894 = vmatpush1.msra.mxu1 %v7166_v50 }
 0x95f   :  { %2824 = vmatprep.subr.mxu0 %v7167_v47  ;;  %2895 = vmatprep.subr.mxu1 %v7168_v48 }
 0x960   :  { %2825 = vmatpush1.msra.mxu0 %v7169_v10  ;;  %2896 = vmatpush1.msra.mxu1 %v7170_v60 }
 0x961   :  { %2826 = vmatprep.subr.mxu0 %v7171_v35  ;;  %2897 = vmatprep.subr.mxu1 %v7172_v24 }
 0x962   :  { %2827 = vmatpush1.msra.mxu0 %v7173_v2  ;;  %2898 = vmatpush1.msra.mxu1 %v7174_v36 }
 0x963   :  { %2828 = vmatprep.subr.mxu0 %v7175_v1  ;;  %2899 = vmatprep.subr.mxu1 %v7176_v45 }
 0x964   :  { %2829 = vmatpush1.msra.mxu0 %v7177_v46  ;;  %2900 = vmatpush1.msra.mxu1 %v7178_v61 }
 0x965   :  { %2830 = vmatprep.subr.mxu0 %v7179_v53  ;;  %2901 = vmatprep.subr.mxu1 %v7180_v13 }
 0x966   :  { %2831 = vmatpush1.msra.mxu0 %v7181_v5  ;;  %2902 = vmatpush1.msra.mxu1 %v7182_v62 }
 0x967   :  { %2832 = vmatprep.subr.mxu0 %v7183_v56  ;;  %2903 = vmatprep.subr.mxu1 %v7184_v4 }
 0x968   :  { %2833 = vmatpush1.msra.mxu0 %v7185_v25  ;;  %2904 = vmatpush1.msra.mxu1 %v7186_v14 }
 0x969   :  { %2834 = vmatprep.subr.mxu0 %v7187_v55  ;;  %2905 = vmatprep.subr.mxu1 %v7188_v3 }
 0x96a   :  { %2835 = vmatpush1.msra.mxu0 %v7189_v31  ;;  %2906 = vmatpush1.msra.mxu1 %v7190_v0 }
 0x96b   :  { %2836 = vmatprep.subr.mxu0 %v7191_v63  ;;  %2907 = vmatprep.subr.mxu1 %v7192_v54 }
 0x96c   :  { %2837 = vmatpush1.msra.mxu0 %v7193_v11  ;;  %2908 = vmatpush1.msra.mxu1 %v7194_v9 }
 0x96d   :  { %2838 = vmatprep.subr.mxu0 %v7195_v34  ;;  %2909 = vmatprep.subr.mxu1 %v7196_v58 }
 0x96e   :  { %2839 = vmatpush1.msra.mxu0 %v7197_v8  ;;  %2910 = vmatpush1.msra.mxu1 %v7198_v28  ;;  %v7208_v8 = vld [vmem:[#allocation64_spill] sm:$0xff]  ;;  %v7209_v28 = vld [vmem:[#allocation63_spill] sm:$0xff] }
 0x96f   :  { %2840 = vmatprep.subr.mxu0 %v7199_v6  ;;  %2911 = vmatprep.subr.mxu1 %v7200_v57  ;;  %v7210_v6 = vmov 0.0   ;;  %v7211_v57 = vld [vmem:[#allocation65_spill] sm:$0xff] }
 0x970   :  { %2841 = vmatpush1.msra.mxu0 %v7201_v49  ;;  %2912 = vmatpush1.msra.mxu1 %v7202_v16  ;;  %v7212_v16 = vld [vmem:[#allocation17_spill] sm:$0xff] }
 0x971   :  { %2842 = vmatprep.subr.mxu0 %v7203_v38  ;;  %2913 = vmatprep.subr.mxu1 %v7204_v40  ;;  %v7213_v38 = vld [vmem:[#allocation19_spill] sm:$0xff] }
 0x972   :  { %2843 = vmatpush1.msra.mxu0 %v7205_v12  ;;  %2914 = vmatpush1.msra.mxu1 %v7206_v41 }
 0x973   :  { %2844 = vmatprep.subr.mxu0 %v7207_v59  ;;  %2915 = vmatprep.subr.mxu1 %v7208_v8 }
 0x974   :  { %2845 = vmatpush1.msra.mxu0 %v7209_v28  ;;  %2878 = vmatprep.mubr.f32.mxu0 %v7210_v6 }
 0x975   :  { %2916 = vmatpush1.msra.mxu1 %v7211_v57  ;;  %2949 = vmatprep.mubr.f32.mxu1 %v7210_v6 }
 0x976   :  { %2996 = vmatprep.subr.mxu0 %v7212_v16  ;;  %3067 = vmatprep.subr.mxu1 %v7213_v38 }
 0xa15   :  { %v2698_v40 = vpop.f32.mrf.mxu0  ;;  %v2769_v8 = vpop.f32.mrf.mxu1 }
 0xa16   :  { %v2774_v12 = vadd.f32 %v2698_v40, %v6004_v44  ;;  %v2776_v6 = vadd.f32 %v2769_v8, %v6008_v30  ;;  %v7236_v30 = vld [vmem:[#allocation91_spill] sm:$0xff] }
 0xa17   :  { %v2700_v41 = vpop.f32.mrf.mxu0  ;;  %v2771_v58 = vpop.f32.mrf.mxu1 }
 0xa18   :  { %v4014_v49 = vmul.f32 -1.442695, %v2774_v12  ;;  %v2775_v59 = vadd.f32 %v2700_v41, %v6010_v37  ;;  %v2777_v57 = vadd.f32 %v2771_v58, %v6012_v43 }
 0xa1a   :  { %4195 = vpow2.f32 %v4014_v49  ;;  %v4015_v28 = vmul.f32 -1.442695, %v2775_v59  ;;  %v4016_v34 = vmul.f32 -1.442695, %v2777_v57 }
 0xa1c   :  { %4197 = vpow2.f32 %v4015_v28 }
 0xa1d   :  { %4199 = vtanh.f32 %v2776_v6 }
 0xa1e   :  { %4201 = vpow2.f32 %v4016_v34  ;;  %v7235_v34 = vld [vmem:[#allocation89_spill] sm:$0xff] }
 0xa27   :  { %v4196_v16 = vpop.eup %4195 }
 0xa28   :  { %v2781_v9 = vadd.f32 1.0, %v4196_v16  ;;  %v6189_v16 = vld [vmem:[#allocation12 + $0x1e0] sm:$0xff] }
 0xa29   :  { %v4198_v38 = vpop.eup %4197 }
 0xa2a   :  { %4203 = vrcp.f32 %v2781_v9  ;;  %v2787_v40 = vadd.f32 1.0, %v4198_v38  ;;  %v4200_v12 = vpop.eup %4199  ;;  %v6192_v38 = vld [vmem:[#allocation12 + $0x1f0] sm:$0xff] }
 0xa2b   :  { %v4202_v41 = vpop.eup %4201 }
 0xa2c   :  { %4205 = vrcp.f32 %v2787_v40  ;;  %v2794_v28 = vadd.f32 1.0, %v4202_v41  ;;  %v6195_v40 = vld [vmem:[#allocation12 + $0x1c8] sm:$0xff]  ;;  %v6201_v41 = vld [vmem:[#allocation12 + $0x1c0] sm:$0xff] }
 0xa2e   :  { %4207 = vrcp.f32 %v2794_v28  ;;  %v6213_v28 = vld [vmem:[#allocation12 + $0x1a0] sm:$0xff] }
 0xa37   :  { %v4204_v49 = vpop.eup %4203 }
 0xa38   :  { %v2798_v44 = vmul.f32 %v4204_v49, %v4200_v12  ;;  %v6198_v12 = vld [vmem:[#allocation12 + $0x1d8] sm:$0xff]  ;;  %v6204_v49 = vld [vmem:[#allocation12 + $0x1d0] sm:$0xff] }
 0xa39   :  { %v4206_v59 = vpop.eup %4205 }
 0xa3a   :  { %v2797_v37 = vmul.f32 %v4206_v59, %v6022_v32  ;;  %v6210_v59 = vld [vmem:[#allocation12 + $0x1b8] sm:$0xff] }
 0xa3b   :  { %v4208_v8 = vpop.eup %4207 }
 0xa3c   :  { %v6100_v58 = vadd.f32 %v2798_v44, %v2797_v37  ;;  %v6207_v44 = vld [vmem:[#allocation12 + $0x1a8] sm:$0xff]  ;;  %v6216_v37 = vld [vmem:[#allocation12 + $0x1b0] sm:$0xff] }
 0xa3e   :  { %4209 = vtanh.f32 %v6100_v58 }
 0xa4b   :  { %v4210_v6 = vpop.eup %4209 }
 0xa4c   :  { %v6103_v57 = vmul.f32 %v4210_v6, %v4208_v8  ;;  %v6222_v8 = vld [vmem:[#allocation12 + $0x198] sm:$0xff]  ;;  %v6225_v6 = vld [vmem:[#allocation12 + $0x180] sm:$0xff] }
 0xa4e   :  { %7214 = vst [vmem:[#allocation28_spill] sm:$0xff] %v6103_v57  ;;  %2879 = vmatmul.mubr.f32.vlgmr.msra.gmra.mxu0 %v6103_v57  ;;  %2950 = vmatmul.mubr.f32.vlgmr.msra.gmra.mxu1 %v6103_v57  ;;  %v6357_v57 = vld [vmem:[#allocation12 + $0x20] sm:$0xff] }
 0xa4f   :  { %2997 = vmatpush1.msra.mxu0 %v5577_v51  ;;  %3068 = vmatpush1.msra.mxu1 %v5579_v52  ;;  %v7215_v51 = vld [vmem:[#allocation50_spill] sm:$0xff]  ;;  %v7216_v52 = vld [vmem:[#allocation49_spill] sm:$0xff]  ;;  %7251 = vst [vmem:[#allocation40_spill] sm:$0xff] %v6357_v57 }
 0xa50   :  { %2998 = vmatprep.subr.mxu0 %v5581_v33  ;;  %3069 = vmatprep.subr.mxu1 %v5583_v20  ;;  %v7217_v33 = vld [vmem:[#allocation52_spill] sm:$0xff]  ;;  %v7218_v20 = vld [vmem:[#allocation51_spill] sm:$0xff] }
 0xa51   :  { %2999 = vmatpush1.msra.mxu0 %v5587_v26  ;;  %3070 = vmatpush1.msra.mxu1 %v5595_v29  ;;  %v7219_v26 = vld [vmem:[#allocation54_spill] sm:$0xff]  ;;  %v7221_v29 = vld [vmem:[#allocation56_spill] sm:$0xff] }
 0xa52   :  { %3000 = vmatprep.subr.mxu0 %v5591_v27  ;;  %3071 = vmatprep.subr.mxu1 %v5603_v22  ;;  %v7220_v27 = vld [vmem:[#allocation53_spill] sm:$0xff]  ;;  %v7223_v22 = vld [vmem:[#allocation58_spill] sm:$0xff] }
 0xa53   :  { %3001 = vmatpush1.msra.mxu0 %v5599_v7  ;;  %3072 = vmatpush1.msra.mxu1 %v5609_v15  ;;  %v7222_v7 = vld [vmem:[#allocation55_spill] sm:$0xff]  ;;  %v7225_v15 = vld [vmem:[#allocation60_spill] sm:$0xff] }
 0xa54   :  { %3002 = vmatprep.subr.mxu0 %v5605_v23  ;;  %3073 = vmatprep.subr.mxu1 %v5615_v18  ;;  %v7224_v23 = vld [vmem:[#allocation57_spill] sm:$0xff]  ;;  %v7227_v18 = vld [vmem:[#allocation62_spill] sm:$0xff] }
 0xa55   :  { %3003 = vmatpush1.msra.mxu0 %v5611_v17  ;;  %3074 = vmatpush1.msra.mxu1 %v5623_v21  ;;  %v7226_v17 = vld [vmem:[#allocation59_spill] sm:$0xff]  ;;  %v7229_v21 = vld [vmem:[#allocation64_spill] sm:$0xff] }
 0xa56   :  { %3004 = vmatprep.subr.mxu0 %v5619_v19  ;;  %3075 = vmatprep.subr.mxu1 %v7164_v39  ;;  %v7228_v19 = vld [vmem:[#allocation61_spill] sm:$0xff] }
 0xa57   :  { %3005 = vmatpush1.msra.mxu0 %v7165_v42  ;;  %3076 = vmatpush1.msra.mxu1 %v7166_v50  ;;  %v7237_v42 = vld [vmem:[#allocation92_spill] sm:$0xff] }
 0xa58   :  { %3006 = vmatprep.subr.mxu0 %v7167_v47  ;;  %3077 = vmatprep.subr.mxu1 %v7168_v48  ;;  %v7238_v47 = vld [vmem:[#allocation90_spill] sm:$0xff] }
 0xa59   :  { %3007 = vmatpush1.msra.mxu0 %v7169_v10  ;;  %3078 = vmatpush1.msra.mxu1 %v7170_v60 }
 0xa5a   :  { %3008 = vmatprep.subr.mxu0 %v7171_v35  ;;  %3079 = vmatprep.subr.mxu1 %v7172_v24 }
 0xa5b   :  { %3009 = vmatpush1.msra.mxu0 %v7173_v2  ;;  %3080 = vmatpush1.msra.mxu1 %v7174_v36 }
 0xa5c   :  { %3010 = vmatprep.subr.mxu0 %v7175_v1  ;;  %3081 = vmatprep.subr.mxu1 %v7176_v45 }
 0xa5d   :  { %3011 = vmatpush1.msra.mxu0 %v7177_v46  ;;  %3082 = vmatpush1.msra.mxu1 %v7178_v61 }
 0xa5e   :  { %3012 = vmatprep.subr.mxu0 %v7179_v53  ;;  %3083 = vmatprep.subr.mxu1 %v7180_v13 }
 0xa5f   :  { %3013 = vmatpush1.msra.mxu0 %v7181_v5  ;;  %3084 = vmatpush1.msra.mxu1 %v7182_v62 }
 0xa60   :  { %3014 = vmatprep.subr.mxu0 %v7183_v56  ;;  %3085 = vmatprep.subr.mxu1 %v7184_v4 }
 0xa61   :  { %3015 = vmatpush1.msra.mxu0 %v7185_v25  ;;  %3086 = vmatpush1.msra.mxu1 %v7186_v14  ;;  %v7230_v14 = vld [vmem:[#allocation63_spill] sm:$0xff] }
 0xa62   :  { %3016 = vmatprep.subr.mxu0 %v7187_v55  ;;  %3087 = vmatprep.subr.mxu1 %v7188_v3  ;;  %v7232_v3 = vld [vmem:[#allocation65_spill] sm:$0xff] }
 0xa63   :  { %3017 = vmatpush1.msra.mxu0 %v7189_v31  ;;  %3088 = vmatpush1.msra.mxu1 %v7190_v0  ;;  %v6171_v31 = vld [vmem:[#allocation12 + $0x1e8] sm:$0xff]  ;;  %v6174_v0 = vld [vmem:[#allocation12 + $0x1f8] sm:$0xff] }
 0xa64   :  { %3018 = vmatprep.subr.mxu0 %v7191_v63  ;;  %3089 = vmatprep.subr.mxu1 %v7192_v54  ;;  %v7231_v63 = vmov 0.0   ;;  %7233 = vst [vmem:[#allocation27_spill] sm:$0xff] %v6171_v31  ;;  %7234 = vst [vmem:[#allocation30_spill] sm:$0xff] %v6174_v0 }
 0xa65   :  { %3019 = vmatpush1.msra.mxu0 %v7193_v11  ;;  %3090 = vmatpush1.msra.mxu1 %v7215_v51  ;;  %v6228_v51 = vld [vmem:[#allocation12 + $0x190] sm:$0xff] }
 0xa66   :  { %3020 = vmatprep.subr.mxu0 %v7216_v52  ;;  %3091 = vmatprep.subr.mxu1 %v7217_v33  ;;  %v6231_v52 = vld [vmem:[#allocation12 + $0x168] sm:$0xff]  ;;  %v6234_v33 = vld [vmem:[#allocation12 + $0x178] sm:$0xff] }
 0xa67   :  { %3021 = vmatpush1.msra.mxu0 %v7218_v20  ;;  %3092 = vmatpush1.msra.mxu1 %v7219_v26  ;;  %v6237_v20 = vld [vmem:[#allocation12 + $0x160] sm:$0xff]  ;;  %v6240_v26 = vld [vmem:[#allocation12 + $0x170] sm:$0xff] }
 0xa68   :  { %3022 = vmatprep.subr.mxu0 %v7220_v27  ;;  %3093 = vmatprep.subr.mxu1 %v7221_v29  ;;  %v6243_v27 = vld [vmem:[#allocation12 + $0x148] sm:$0xff]  ;;  %v6246_v29 = vld [vmem:[#allocation12 + $0x158] sm:$0xff] }
 0xa69   :  { %3023 = vmatpush1.msra.mxu0 %v7222_v7  ;;  %3094 = vmatpush1.msra.mxu1 %v7223_v22  ;;  %v6249_v7 = vld [vmem:[#allocation12 + $0x140] sm:$0xff]  ;;  %v6252_v22 = vld [vmem:[#allocation12 + $0x150] sm:$0xff] }
 0xa6a   :  { %3024 = vmatprep.subr.mxu0 %v7224_v23  ;;  %3095 = vmatprep.subr.mxu1 %v7225_v15  ;;  %v6255_v23 = vld [vmem:[#allocation12 + $0x128] sm:$0xff]  ;;  %v6258_v15 = vld [vmem:[#allocation12 + $0x138] sm:$0xff] }
 0xa6b   :  { %3025 = vmatpush1.msra.mxu0 %v7226_v17  ;;  %3096 = vmatpush1.msra.mxu1 %v7227_v18  ;;  %v6261_v17 = vld [vmem:[#allocation12 + $0x120] sm:$0xff] }
 0xa6c   :  { %3026 = vmatprep.subr.mxu0 %v7228_v19  ;;  %3097 = vmatprep.subr.mxu1 %v7229_v21  ;;  %v6264_v19 = vld [vmem:[#allocation12 + $0x130] sm:$0xff] }
 0xa6d   :  { %3027 = vmatpush1.msra.mxu0 %v7230_v14  ;;  %3060 = vmatprep.mubr.f32.mxu0 %v7231_v63  ;;  %v6267_v14 = vld [vmem:[#allocation12 + $0x108] sm:$0xff] }
 0xa6e   :  { %3098 = vmatpush1.msra.mxu1 %v7232_v3  ;;  %3131 = vmatprep.mubr.f32.mxu1 %v7231_v63 }
 0xa6f   :  { %3178 = vmatprep.subr.mxu0 %v6171_v31  ;;  %3249 = vmatprep.subr.mxu1 %v6174_v0 }
 0xb0e   :  { %v2880_v55 = vpop.f32.mrf.mxu0  ;;  %v2951_v32 = vpop.f32.mrf.mxu1 }
 0xb0f   :  { %v2956_v54 = vadd.f32 %v2880_v55, %v7235_v34  ;;  %v2958_v48 = vadd.f32 %v2951_v32, %v7238_v47  ;;  %v6270_v55 = vld [vmem:[#allocation12 + $0x118] sm:$0xff]  ;;  %v6273_v34 = vld [vmem:[#allocation12 + $0x100] sm:$0xff]  ;;  %v6291_v32 = vld [vmem:[#allocation12 + $0xc8] sm:$0xff] }
 0xb10   :  { %v2882_v9 = vpop.f32.mrf.mxu0  ;;  %v2953_v39 = vpop.f32.mrf.mxu1  ;;  %v6306_v47 = vld [vmem:[#allocation12 + $0xb8] sm:$0xff] }
 0xb11   :  { %v4017_v11 = vmul.f32 -1.442695, %v2956_v54  ;;  %v2957_v43 = vadd.f32 %v2882_v9, %v7236_v30  ;;  %v2959_v50 = vadd.f32 %v2953_v39, %v7237_v42  ;;  %v6276_v54 = vld [vmem:[#allocation12 + $0x110] sm:$0xff]  ;;  %v6279_v9 = vld [vmem:[#allocation12 + $0xe8] sm:$0xff]  ;;  %v6285_v30 = vld [vmem:[#allocation12 + $0xe0] sm:$0xff] }
 0xb12   :  { %v6297_v39 = vld [vmem:[#allocation12 + $0xc0] sm:$0xff]  ;;  %v6300_v42 = vld [vmem:[#allocation12 + $0xd0] sm:$0xff] }
 0xb13   :  { %4211 = vpow2.f32 %v4017_v11  ;;  %v4018_v25 = vmul.f32 -1.442695, %v2957_v43  ;;  %v4019_v10 = vmul.f32 -1.442695, %v2959_v50  ;;  %v6282_v11 = vld [vmem:[#allocation12 + $0xf8] sm:$0xff]  ;;  %v6288_v43 = vld [vmem:[#allocation12 + $0xf0] sm:$0xff] }
 0xb14   :  { %v6303_v50 = vld [vmem:[#allocation12 + $0xa8] sm:$0xff] }
 0xb15   :  { %4213 = vpow2.f32 %v4018_v25  ;;  %v6294_v25 = vld [vmem:[#allocation12 + $0xd8] sm:$0xff] }
 0xb16   :  { %4215 = vtanh.f32 %v2958_v48  ;;  %v6309_v48 = vld [vmem:[#allocation12 + $0xa0] sm:$0xff] }
 0xb17   :  { %4217 = vpow2.f32 %v4019_v10  ;;  %v6312_v10 = vld [vmem:[#allocation12 + $0xb0] sm:$0xff] }
 0xb20   :  { %v4212_v60 = vpop.eup %4211 }
 0xb21   :  { %v2963_v35 = vadd.f32 1.0, %v4212_v60  ;;  %v6315_v60 = vld [vmem:[#allocation12 + $0x88] sm:$0xff] }
 0xb22   :  { %v4214_v24 = vpop.eup %4213 }
 0xb23   :  { %4219 = vrcp.f32 %v2963_v35  ;;  %v2969_v2 = vadd.f32 1.0, %v4214_v24  ;;  %v4216_v36 = vpop.eup %4215  ;;  %v6318_v35 = vld [vmem:[#allocation12 + $0x98] sm:$0xff]  ;;  %v6321_v24 = vld [vmem:[#allocation12 + $0x80] sm:$0xff] }
 0xb24   :  { %v4218_v1 = vpop.eup %4217 }
 0xb25   :  { %4221 = vrcp.f32 %v2969_v2  ;;  %v2976_v53 = vadd.f32 1.0, %v4218_v1  ;;  %v6324_v2 = vld [vmem:[#allocation12 + $0x90] sm:$0xff]  ;;  %v6330_v1 = vld [vmem:[#allocation12 + $0x78] sm:$0xff] }
 0xb26   :  { %7240 = vst [vmem:[#allocation33_spill] sm:$0xff] %v6324_v2  ;;  %7242 = vst [vmem:[#allocation35_spill] sm:$0xff] %v6330_v1 }
 0xb27   :  { %4223 = vrcp.f32 %v2976_v53  ;;  %v6342_v53 = vld [vmem:[#allocation12 + $0x58] sm:$0xff] }
 0xb28   :  { %7246 = vst [vmem:[#allocation24_spill] sm:$0xff] %v6342_v53 }
 0xb30   :  { %v4220_v45 = vpop.eup %4219 }
 0xb31   :  { %v2980_v46 = vmul.f32 %v4220_v45, %v4216_v36  ;;  %v6327_v36 = vld [vmem:[#allocation12 + $0x68] sm:$0xff]  ;;  %v6333_v45 = vld [vmem:[#allocation12 + $0x60] sm:$0xff] }
 0xb32   :  { %v4222_v61 = vpop.eup %4221  ;;  %7241 = vst [vmem:[#allocation31_spill] sm:$0xff] %v6327_v36  ;;  %7243 = vst [vmem:[#allocation34_spill] sm:$0xff] %v6333_v45 }
 0xb33   :  { %v2979_v13 = vmul.f32 %v4222_v61, %v6100_v58  ;;  %v6219_v58 = vld [vmem:[#allocation12 + $0x188] sm:$0xff] }
 0xb34   :  { %v4224_v62 = vpop.eup %4223  ;;  %v6339_v61 = vld [vmem:[#allocation12 + $0x48] sm:$0xff] }
 0xb35   :  { %v6182_v5 = vadd.f32 %v2980_v46, %v2979_v13  ;;  %v6336_v46 = vld [vmem:[#allocation12 + $0x70] sm:$0xff]  ;;  %7245 = vst [vmem:[#allocation21_spill] sm:$0xff] %v6339_v61  ;;  %v6345_v13 = vld [vmem:[#allocation12 + $0x40] sm:$0xff] }
 0xb36   :  { %7244 = vst [vmem:[#allocation22_spill] sm:$0xff] %v6336_v46  ;;  %7247 = vst [vmem:[#allocation23_spill] sm:$0xff] %v6345_v13 }
 0xb37   :  { %4225 = vtanh.f32 %v6182_v5 }
 0xb44   :  { %v4226_v56 = vpop.eup %4225 }
 0xb45   :  { %v6185_v4 = vmul.f32 %v4226_v56, %v4224_v62  ;;  %v6348_v62 = vld [vmem:[#allocation12 + $0x50] sm:$0xff]  ;;  %v6351_v56 = vld [vmem:[#allocation12 + $0x28] sm:$0xff] }
 0xb46   :  { %7248 = vst [vmem:[#allocation26_spill] sm:$0xff] %v6348_v62  ;;  %7249 = vst [vmem:[#allocation25_spill] sm:$0xff] %v6351_v56 }
 0xb47   :  { %7239 = vst [vmem:[#allocation29_spill] sm:$0xff] %v6185_v4  ;;  %3061 = vmatmul.mubr.f32.vlgmr.msra.gmra.mxu0 %v6185_v4  ;;  %3132 = vmatmul.mubr.f32.vlgmr.msra.gmra.mxu1 %v6185_v4  ;;  %v6354_v4 = vld [vmem:[#allocation12 + $0x38] sm:$0xff] }
 0xb48   :  { %3179 = vmatpush1.msra.mxu0 %v6189_v16  ;;  %3250 = vmatpush1.msra.mxu1 %v6192_v38  ;;  %7250 = vst [vmem:[#allocation41_spill] sm:$0xff] %v6354_v4 }
 0xb49   :  { %3180 = vmatprep.subr.mxu0 %v6195_v40  ;;  %3251 = vmatprep.subr.mxu1 %v6198_v12 }
 0xb4a   :  { %3181 = vmatpush1.msra.mxu0 %v6201_v41  ;;  %3252 = vmatpush1.msra.mxu1 %v6204_v49 }
 0xb4b   :  { %3182 = vmatprep.subr.mxu0 %v6207_v44  ;;  %3253 = vmatprep.subr.mxu1 %v6210_v59 }
 0xb4c   :  { %3183 = vmatpush1.msra.mxu0 %v6213_v28  ;;  %3254 = vmatpush1.msra.mxu1 %v6216_v37 }
 0xb4d   :  { %3184 = vmatprep.subr.mxu0 %v6219_v58  ;;  %3255 = vmatprep.subr.mxu1 %v6222_v8 }
 0xb4e   :  { %3185 = vmatpush1.msra.mxu0 %v6225_v6  ;;  %3256 = vmatpush1.msra.mxu1 %v6228_v51 }
 0xb4f   :  { %3186 = vmatprep.subr.mxu0 %v6231_v52  ;;  %3257 = vmatprep.subr.mxu1 %v6234_v33 }
 0xb50   :  { %3187 = vmatpush1.msra.mxu0 %v6237_v20  ;;  %3258 = vmatpush1.msra.mxu1 %v6240_v26 }
 0xb51   :  { %3188 = vmatprep.subr.mxu0 %v6243_v27  ;;  %3259 = vmatprep.subr.mxu1 %v6246_v29 }
 0xb52   :  { %3189 = vmatpush1.msra.mxu0 %v6249_v7  ;;  %3260 = vmatpush1.msra.mxu1 %v6252_v22 }
 0xb53   :  { %3190 = vmatprep.subr.mxu0 %v6255_v23  ;;  %3261 = vmatprep.subr.mxu1 %v6258_v15 }
 0xb54   :  { %3191 = vmatpush1.msra.mxu0 %v6261_v17  ;;  %3262 = vmatpush1.msra.mxu1 %v6264_v19 }
 0xb55   :  { %3192 = vmatprep.subr.mxu0 %v6267_v14  ;;  %3263 = vmatprep.subr.mxu1 %v6270_v55 }
 0xb56   :  { %3193 = vmatpush1.msra.mxu0 %v6273_v34  ;;  %3264 = vmatpush1.msra.mxu1 %v6276_v54 }
 0xb57   :  { %3194 = vmatprep.subr.mxu0 %v6279_v9  ;;  %3265 = vmatprep.subr.mxu1 %v6282_v11 }
 0xb58   :  { %3195 = vmatpush1.msra.mxu0 %v6285_v30  ;;  %3266 = vmatpush1.msra.mxu1 %v6288_v43 }
 0xb59   :  { %3196 = vmatprep.subr.mxu0 %v6291_v32  ;;  %3267 = vmatprep.subr.mxu1 %v6294_v25 }
 0xb5a   :  { %3197 = vmatpush1.msra.mxu0 %v6297_v39  ;;  %3268 = vmatpush1.msra.mxu1 %v6300_v42 }
 0xb5b   :  { %3198 = vmatprep.subr.mxu0 %v6303_v50  ;;  %3269 = vmatprep.subr.mxu1 %v6306_v47 }
 0xb5c   :  { %3199 = vmatpush1.msra.mxu0 %v6309_v48  ;;  %3270 = vmatpush1.msra.mxu1 %v6312_v10 }
 0xb5d   :  { %3200 = vmatprep.subr.mxu0 %v6315_v60  ;;  %3271 = vmatprep.subr.mxu1 %v6318_v35 }
 0xb5e   :  { %3201 = vmatpush1.msra.mxu0 %v6321_v24  ;;  %3272 = vmatpush1.msra.mxu1 %v6324_v2 }
 0xb5f   :  { %3202 = vmatprep.subr.mxu0 %v6327_v36  ;;  %3273 = vmatprep.subr.mxu1 %v6330_v1  ;;  %v7257_v1 = vld [vmem:[#allocation86_spill] sm:$0xff] }
 0xb60   :  { %3203 = vmatpush1.msra.mxu0 %v6333_v45  ;;  %3274 = vmatpush1.msra.mxu1 %v6336_v46  ;;  %v7256_v45 = vld [vmem:[#allocation88_spill] sm:$0xff] }
 0xb61   :  { %3204 = vmatprep.subr.mxu0 %v6339_v61  ;;  %3275 = vmatprep.subr.mxu1 %v6342_v53  ;;  %v6361_v53 = vld [vmem:[#allocation12 + $0x8] sm:$0xff] }
 0xb62   :  { %3205 = vmatpush1.msra.mxu0 %v6345_v13  ;;  %3276 = vmatpush1.msra.mxu1 %v6348_v62  ;;  %7252 = vst [vmem:[#allocation37_spill] sm:$0xff] %v6361_v53  ;;  %v6365_v62 = vld [vmem:[#allocation12] sm:$0xff] }
 0xb63   :  { %3206 = vmatprep.subr.mxu0 %v6351_v56  ;;  %3277 = vmatprep.subr.mxu1 %v6354_v4  ;;  %7253 = vst [vmem:[#allocation42_spill] sm:$0xff] %v6365_v62 }
 0xb64   :  { %3207 = vmatpush1.msra.mxu0 %v6357_v57  ;;  %3278 = vmatpush1.msra.mxu1 %v7227_v18  ;;  %v7254_v57 = vld [vmem:[#allocation85_spill] sm:$0xff] }
 0xb65   :  { %3208 = vmatprep.subr.mxu0 %v6361_v53  ;;  %3279 = vmatprep.subr.mxu1 %v7229_v21  ;;  %v7255_v21 = vld [vmem:[#allocation87_spill] sm:$0xff] }
 0xb66   :  { %3209 = vmatpush1.msra.mxu0 %v6365_v62  ;;  %3242 = vmatprep.mubr.f32.mxu0 %v7231_v63 }
 0xb67   :  { %3280 = vmatpush1.msra.mxu1 %v7232_v3  ;;  %3313 = vmatprep.mubr.f32.mxu1 %v7231_v63 }
 0xb68   :  { %3360 = vmatprep.subr.mxu0 %v6171_v31  ;;  %3431 = vmatprep.subr.mxu1 %v6174_v0 }
 0xc07   :  { %v3062_v18 = vpop.f32.mrf.mxu0  ;;  %v3133_v61 = vpop.f32.mrf.mxu1 }
 0xc08   :  { %v3138_v4 = vadd.f32 %v3062_v18, %v7254_v57  ;;  %v3140_v63 = vadd.f32 %v3133_v61, %v7257_v1  ;;  %v7264_v61 = vld [vmem:[#allocation21_spill] sm:$0xff] }
 0xc09   :  { %v3064_v53 = vpop.f32.mrf.mxu0  ;;  %v3135_v46 = vpop.f32.mrf.mxu1 }
 0xc0a   :  { %v4020_v56 = vmul.f32 -1.442695, %v3138_v4  ;;  %v3139_v13 = vadd.f32 %v3064_v53, %v7255_v21  ;;  %v3141_v3 = vadd.f32 %v3135_v46, %v7256_v45  ;;  %v7263_v46 = vld [vmem:[#allocation22_spill] sm:$0xff] }
 0xc0c   :  { %4227 = vpow2.f32 %v4020_v56  ;;  %v4021_v62 = vmul.f32 -1.442695, %v3139_v13  ;;  %v4022_v36 = vmul.f32 -1.442695, %v3141_v3  ;;  %v7265_v3 = vld [vmem:[#allocation24_spill] sm:$0xff] }
 0xc0e   :  { %4229 = vpow2.f32 %v4021_v62 }
 0xc0f   :  { %4231 = vtanh.f32 %v3140_v63 }
 0xc10   :  { %4233 = vpow2.f32 %v4022_v36  ;;  %v7262_v36 = vld [vmem:[#allocation34_spill] sm:$0xff] }
 0xc19   :  { %v4228_v31 = vpop.eup %4227 }
 0xc1a   :  { %v3145_v2 = vadd.f32 1.0, %v4228_v31 }
 0xc1b   :  { %v4230_v0 = vpop.eup %4229 }
 0xc1c   :  { %4235 = vrcp.f32 %v3145_v2  ;;  %v3151_v57 = vadd.f32 1.0, %v4230_v0  ;;  %v4232_v4 = vpop.eup %4231  ;;  %v7259_v0 = vld [vmem:[#allocation33_spill] sm:$0xff]  ;;  %v7261_v2 = vld [vmem:[#allocation35_spill] sm:$0xff] }
 0xc1d   :  { %v4234_v53 = vpop.eup %4233 }
 0xc1e   :  { %4237 = vrcp.f32 %v3151_v57  ;;  %v3158_v62 = vadd.f32 1.0, %v4234_v53  ;;  %v7266_v57 = vld [vmem:[#allocation23_spill] sm:$0xff]  ;;  %v7268_v53 = vld [vmem:[#allocation25_spill] sm:$0xff] }
 0xc20   :  { %4239 = vrcp.f32 %v3158_v62  ;;  %v7272_v62 = vld [vmem:[#allocation37_spill] sm:$0xff] }
 0xc29   :  { %v4236_v56 = vpop.eup %4235 }
 0xc2a   :  { %v3162_v18 = vmul.f32 %v4236_v56, %v4232_v4  ;;  %v7267_v4 = vld [vmem:[#allocation26_spill] sm:$0xff]  ;;  %v7269_v56 = vld [vmem:[#allocation41_spill] sm:$0xff] }
 0xc2b   :  { %v4238_v13 = vpop.eup %4237 }
 0xc2c   :  { %v3161_v21 = vmul.f32 %v4238_v13, %v6182_v5  ;;  %v7260_v5 = vld [vmem:[#allocation31_spill] sm:$0xff]  ;;  %v6444_v13 = vld [vmem:[#allocation12 + $0x30] sm:$0xff] }
 0xc2d   :  { %v4240_v31 = vpop.eup %4239  ;;  %7271 = vst [vmem:[#allocation38_spill] sm:$0xff] %v6444_v13 }
 0xc2e   :  { %v6378_v45 = vadd.f32 %v3162_v18, %v3161_v21  ;;  %v7270_v18 = vld [vmem:[#allocation40_spill] sm:$0xff]  ;;  %v6448_v21 = vld [vmem:[#allocation12 + $0x18] sm:$0xff] }
 0xc2f   :  { %7273 = vst [vmem:[#allocation16_spill] sm:$0xff] %v6448_v21 }
 0xc30   :  { %4241 = vtanh.f32 %v6378_v45 }
 0xc3d   :  { %v4242_v63 = vpop.eup %4241 }
 0xc3e   :  { %v6381_v1 = vmul.f32 %v4242_v63, %v4240_v31  ;;  %v7274_v31 = vld [vmem:[#allocation42_spill] sm:$0xff]  ;;  %v7275_v63 = vmov 0.0  }
 0xc40   :  { %7258 = vst [vmem:[#allocation39_spill] sm:$0xff] %v6381_v1  ;;  %3935 = vrot.lane.b32.xlu1 %v6381_v1, %s4549_s6  ;;  %3243 = vmatmul.mubr.f32.vlgmr.msra.gmra.mxu0 %v6381_v1 }
 0xc41   :  { %3314 = vmatmul.mubr.f32.vlgmr.msra.gmra.mxu1 %v6381_v1  ;;  %3361 = vmatpush1.msra.mxu0 %v6189_v16  ;;  %v6453_v1 = vld [vmem:[#allocation12 + $0x10] sm:$0xff] }
 0xc42   :  { %3432 = vmatpush1.msra.mxu1 %v6192_v38  ;;  %3362 = vmatprep.subr.mxu0 %v6195_v40  ;;  %7276 = vst [vmem:[#allocation18_spill] sm:$0xff] %v6453_v1 }
 0xc43   :  { %3433 = vmatprep.subr.mxu1 %v6198_v12  ;;  %3363 = vmatpush1.msra.mxu0 %v6201_v41 }
 0xc44   :  { %3434 = vmatpush1.msra.mxu1 %v6204_v49  ;;  %3364 = vmatprep.subr.mxu0 %v6207_v44 }
 0xc45   :  { %3435 = vmatprep.subr.mxu1 %v6210_v59  ;;  %3365 = vmatpush1.msra.mxu0 %v6213_v28 }
 0xc46   :  { %3436 = vmatpush1.msra.mxu1 %v6216_v37  ;;  %3366 = vmatprep.subr.mxu0 %v6219_v58 }
 0xc47   :  { %3437 = vmatprep.subr.mxu1 %v6222_v8  ;;  %3367 = vmatpush1.msra.mxu0 %v6225_v6 }
 0xc48   :  { %3438 = vmatpush1.msra.mxu1 %v6228_v51  ;;  %3368 = vmatprep.subr.mxu0 %v6231_v52 }
 0xc49   :  { %3439 = vmatprep.subr.mxu1 %v6234_v33  ;;  %3369 = vmatpush1.msra.mxu0 %v6237_v20 }
 0xc4a   :  { %3440 = vmatpush1.msra.mxu1 %v6240_v26  ;;  %3370 = vmatprep.subr.mxu0 %v6243_v27 }
 0xc4b   :  { %3441 = vmatprep.subr.mxu1 %v6246_v29  ;;  %3371 = vmatpush1.msra.mxu0 %v6249_v7 }
 0xc4c   :  { %3442 = vmatpush1.msra.mxu1 %v6252_v22  ;;  %3372 = vmatprep.subr.mxu0 %v6255_v23 }
 0xc4d   :  { %3443 = vmatprep.subr.mxu1 %v6258_v15  ;;  %3373 = vmatpush1.msra.mxu0 %v6261_v17 }
 0xc4e   :  { %3444 = vmatpush1.msra.mxu1 %v6264_v19  ;;  %3374 = vmatprep.subr.mxu0 %v6267_v14 }
 0xc4f   :  { %3445 = vmatprep.subr.mxu1 %v6270_v55  ;;  %3375 = vmatpush1.msra.mxu0 %v6273_v34 }
 0xc50   :  { %3446 = vmatpush1.msra.mxu1 %v6276_v54  ;;  %3376 = vmatprep.subr.mxu0 %v6279_v9 }
 0xc51   :  { %3447 = vmatprep.subr.mxu1 %v6282_v11  ;;  %3377 = vmatpush1.msra.mxu0 %v6285_v30 }
 0xc52   :  { %3448 = vmatpush1.msra.mxu1 %v6288_v43  ;;  %3378 = vmatprep.subr.mxu0 %v6291_v32 }
 0xc53   :  { %3449 = vmatprep.subr.mxu1 %v6294_v25  ;;  %3379 = vmatpush1.msra.mxu0 %v6297_v39 }
 0xc54   :  { %3450 = vmatpush1.msra.mxu1 %v6300_v42  ;;  %3380 = vmatprep.subr.mxu0 %v6303_v50 }
 0xc55   :  { %3451 = vmatprep.subr.mxu1 %v6306_v47  ;;  %3381 = vmatpush1.msra.mxu0 %v6309_v48 }
 0xc56   :  { %3452 = vmatpush1.msra.mxu1 %v6312_v10  ;;  %3382 = vmatprep.subr.mxu0 %v6315_v60 }
 0xc57   :  { %3453 = vmatprep.subr.mxu1 %v6318_v35  ;;  %3383 = vmatpush1.msra.mxu0 %v6321_v24 }
 0xc58   :  { %3454 = vmatpush1.msra.mxu1 %v7259_v0  ;;  %3384 = vmatprep.subr.mxu0 %v7260_v5 }
 0xc59   :  { %3455 = vmatprep.subr.mxu1 %v7261_v2  ;;  %3385 = vmatpush1.msra.mxu0 %v7262_v36  ;;  %v7281_v36 = vld [vmem:[#allocation84_spill] sm:$0xff]  ;;  %v7282_v2 = vld [vmem:[#allocation82_spill] sm:$0xff] }
 0xc5a   :  { %3456 = vmatpush1.msra.mxu1 %v7263_v46  ;;  %3386 = vmatprep.subr.mxu0 %v7264_v61 }
 0xc5b   :  { %3457 = vmatprep.subr.mxu1 %v7265_v3  ;;  %3387 = vmatpush1.msra.mxu0 %v7266_v57 }
 0xc5c   :  { %3458 = vmatpush1.msra.mxu1 %v7267_v4  ;;  %3388 = vmatprep.subr.mxu0 %v7268_v53 }
 0xc5d   :  { %3459 = vmatprep.subr.mxu1 %v7269_v56  ;;  %3389 = vmatpush1.msra.mxu0 %v7270_v18  ;;  %v7277_v18 = vld [vmem:[#allocation27_spill] sm:$0xff]  ;;  %v7278_v56 = vld [vmem:[#allocation30_spill] sm:$0xff] }
 0xc5e   :  { %3460 = vmatpush1.msra.mxu1 %v6444_v13  ;;  %3390 = vmatprep.subr.mxu0 %v7272_v62  ;;  %v7279_v62 = vld [vmem:[#allocation81_spill] sm:$0xff] }
 0xc5f   :  { %3461 = vmatprep.subr.mxu1 %v6448_v21  ;;  %3391 = vmatpush1.msra.mxu0 %v7274_v31  ;;  %v7280_v21 = vld [vmem:[#allocation83_spill] sm:$0xff] }
 0xc60   :  { %3424 = vmatprep.mubr.f32.mxu0 %v7275_v63  ;;  %3462 = vmatpush1.msra.mxu1 %v6453_v1 }
 0xc61   :  { %3495 = vmatprep.mubr.f32.mxu1 %v7275_v63  ;;  %3542 = vmatprep.subr.mxu0 %v7277_v18 }
 0xc62   :  { %3613 = vmatprep.subr.mxu1 %v7278_v56 }
 0xd00   :  { %v3244_v13 = vpop.f32.mrf.mxu0 }
 0xd01   :  { %v3320_v53 = vadd.f32 %v3244_v13, %v7279_v62  ;;  %v3315_v31 = vpop.f32.mrf.mxu1 }
 0xd02   :  { %v3246_v4 = vpop.f32.mrf.mxu0  ;;  %v3322_v63 = vadd.f32 %v3315_v31, %v7282_v2  ;;  %v7289_v31 = vld [vmem:[#allocation22_spill] sm:$0xff] }
 0xd03   :  { %v4023_v57 = vmul.f32 -1.442695, %v3320_v53  ;;  %v3321_v3 = vadd.f32 %v3246_v4, %v7280_v21  ;;  %v3317_v46 = vpop.f32.mrf.mxu1 }
 0xd04   :  { %v3323_v1 = vadd.f32 %v3317_v46, %v7281_v36 }
 0xd05   :  { %4243 = vpow2.f32 %v4023_v57  ;;  %v4024_v61 = vmul.f32 -1.442695, %v3321_v3 }
 0xd06   :  { %v4025_v5 = vmul.f32 -1.442695, %v3323_v1 }
 0xd07   :  { %4245 = vpow2.f32 %v4024_v61 }
 0xd08   :  { %4247 = vtanh.f32 %v3322_v63  ;;  %v7290_v63 = vld [vmem:[#allocation21_spill] sm:$0xff] }
 0xd09   :  { %4249 = vpow2.f32 %v4025_v5  ;;  %v7286_v5 = vld [vmem:[#allocation31_spill] sm:$0xff] }
 0xd12   :  { %v4244_v18 = vpop.eup %4243 }
 0xd13   :  { %v3327_v0 = vadd.f32 1.0, %v4244_v18  ;;  %v7288_v18 = vld [vmem:[#allocation34_spill] sm:$0xff] }
 0xd14   :  { %v4246_v56 = vpop.eup %4245 }
 0xd15   :  { %4251 = vrcp.f32 %v3327_v0  ;;  %v3333_v13 = vadd.f32 1.0, %v4246_v56  ;;  %v4248_v53 = vpop.eup %4247  ;;  %v7285_v0 = vld [vmem:[#allocation33_spill] sm:$0xff]  ;;  %v7287_v56 = vld [vmem:[#allocation35_spill] sm:$0xff] }
 0xd16   :  { %v4250_v4 = vpop.eup %4249 }
 0xd17   :  { %4253 = vrcp.f32 %v3333_v13  ;;  %v3340_v61 = vadd.f32 1.0, %v4250_v4  ;;  %v7291_v13 = vld [vmem:[#allocation24_spill] sm:$0xff]  ;;  %v7293_v4 = vld [vmem:[#allocation26_spill] sm:$0xff] }
 0xd19   :  { %4255 = vrcp.f32 %v3340_v61  ;;  %v7297_v61 = vld [vmem:[#allocation38_spill] sm:$0xff] }
 0xd22   :  { %v4252_v57 = vpop.eup %4251 }
 0xd23   :  { %v3344_v62 = vmul.f32 %v4252_v57, %v4248_v53  ;;  %v7292_v53 = vld [vmem:[#allocation23_spill] sm:$0xff]  ;;  %v7294_v57 = vld [vmem:[#allocation25_spill] sm:$0xff] }
 0xd24   :  { %v4254_v3 = vpop.eup %4253 }
 0xd25   :  { %v3343_v21 = vmul.f32 %v4254_v3, %v6378_v45  ;;  %v7284_v45 = vld [vmem:[#allocation28_spill] sm:$0xff] }
 0xd26   :  { %v4256_v1 = vpop.eup %4255  ;;  %v7296_v3 = vld [vmem:[#allocation40_spill] sm:$0xff] }
 0xd27   :  { %v6464_v36 = vadd.f32 %v3344_v62, %v3343_v21  ;;  %v7295_v62 = vld [vmem:[#allocation41_spill] sm:$0xff] }
 0xd28   :  { %v7298_v21 = vld [vmem:[#allocation37_spill] sm:$0xff] }
 0xd29   :  { %4257 = vtanh.f32 %v6464_v36 }
 0xd36   :  { %v4258_v2 = vpop.eup %4257 }
 0xd37   :  { %v6467_v46 = vmul.f32 %v4258_v2, %v4256_v1  ;;  %v7299_v1 = vld [vmem:[#allocation16_spill] sm:$0xff]  ;;  %v7300_v2 = vld [vmem:[#allocation42_spill] sm:$0xff] }
 0xd39   :  { %7283 = vst [vmem:[#allocation32_spill] sm:$0xff] %v6467_v46  ;;  %3924 = vrot.lane.b32.xlu1 %v6467_v46, %s4549_s6  ;;  %3425 = vmatmul.mubr.f32.vlgmr.msra.gmra.mxu0 %v6467_v46 }
 0xd3a   :  { %3496 = vmatmul.mubr.f32.vlgmr.msra.gmra.mxu1 %v6467_v46  ;;  %3543 = vmatpush1.msra.mxu0 %v6189_v16  ;;  %v7301_v46 = vmov 0.0  }
 0xd3b   :  { %3614 = vmatpush1.msra.mxu1 %v6192_v38  ;;  %3544 = vmatprep.subr.mxu0 %v6195_v40 }
 0xd3c   :  { %3615 = vmatprep.subr.mxu1 %v6198_v12  ;;  %3545 = vmatpush1.msra.mxu0 %v6201_v41 }
 0xd3d   :  { %3957 = vrot.lane.b32.xlu1 %v7284_v45, %s4549_s6  ;;  %3616 = vmatpush1.msra.mxu1 %v6204_v49  ;;  %v7302_v45 = vld [vmem:[#allocation18_spill] sm:$0xff] }
 0xd3e   :  { %3546 = vmatprep.subr.mxu0 %v6207_v44  ;;  %3617 = vmatprep.subr.mxu1 %v6210_v59 }
 0xd3f   :  { %3547 = vmatpush1.msra.mxu0 %v6213_v28  ;;  %3618 = vmatpush1.msra.mxu1 %v6216_v37 }
 0xd40   :  { %3548 = vmatprep.subr.mxu0 %v6219_v58  ;;  %3619 = vmatprep.subr.mxu1 %v6222_v8 }
 0xd41   :  { %3549 = vmatpush1.msra.mxu0 %v6225_v6  ;;  %3620 = vmatpush1.msra.mxu1 %v6228_v51 }
 0xd42   :  { %3550 = vmatprep.subr.mxu0 %v6231_v52  ;;  %3621 = vmatprep.subr.mxu1 %v6234_v33 }
 0xd43   :  { %3551 = vmatpush1.msra.mxu0 %v6237_v20  ;;  %3622 = vmatpush1.msra.mxu1 %v6240_v26 }
 0xd44   :  { %3552 = vmatprep.subr.mxu0 %v6243_v27  ;;  %3623 = vmatprep.subr.mxu1 %v6246_v29 }
 0xd45   :  { %3553 = vmatpush1.msra.mxu0 %v6249_v7  ;;  %3624 = vmatpush1.msra.mxu1 %v6252_v22 }
 0xd46   :  { %3554 = vmatprep.subr.mxu0 %v6255_v23  ;;  %3625 = vmatprep.subr.mxu1 %v6258_v15 }
 0xd47   :  { %3555 = vmatpush1.msra.mxu0 %v6261_v17  ;;  %3626 = vmatpush1.msra.mxu1 %v6264_v19 }
 0xd48   :  { %3556 = vmatprep.subr.mxu0 %v6267_v14  ;;  %3627 = vmatprep.subr.mxu1 %v6270_v55 }
 0xd49   :  { %3557 = vmatpush1.msra.mxu0 %v6273_v34  ;;  %3628 = vmatpush1.msra.mxu1 %v6276_v54 }
 0xd4a   :  { %3558 = vmatprep.subr.mxu0 %v6279_v9  ;;  %3629 = vmatprep.subr.mxu1 %v6282_v11 }
 0xd4b   :  { %3559 = vmatpush1.msra.mxu0 %v6285_v30  ;;  %3630 = vmatpush1.msra.mxu1 %v6288_v43 }
 0xd4c   :  { %3560 = vmatprep.subr.mxu0 %v6291_v32  ;;  %3631 = vmatprep.subr.mxu1 %v6294_v25 }
 0xd4d   :  { %3561 = vmatpush1.msra.mxu0 %v6297_v39  ;;  %3632 = vmatpush1.msra.mxu1 %v6300_v42 }
 0xd4e   :  { %3562 = vmatprep.subr.mxu0 %v6303_v50  ;;  %3633 = vmatprep.subr.mxu1 %v6306_v47 }
 0xd4f   :  { %3563 = vmatpush1.msra.mxu0 %v6309_v48  ;;  %3634 = vmatpush1.msra.mxu1 %v6312_v10 }
 0xd50   :  { %3564 = vmatprep.subr.mxu0 %v6315_v60  ;;  %3635 = vmatprep.subr.mxu1 %v6318_v35 }
 0xd51   :  { %3565 = vmatpush1.msra.mxu0 %v6321_v24  ;;  %3636 = vmatpush1.msra.mxu1 %v7285_v0 }
 0xd52   :  { %3566 = vmatprep.subr.mxu0 %v7286_v5  ;;  %3637 = vmatprep.subr.mxu1 %v7287_v56  ;;  %v7308_v56 = vld [vmem:[#allocation78_spill] sm:$0xff] }
 0xd53   :  { %3567 = vmatpush1.msra.mxu0 %v7288_v18  ;;  %3638 = vmatpush1.msra.mxu1 %v7289_v31  ;;  %v7307_v18 = vld [vmem:[#allocation80_spill] sm:$0xff] }
 0xd54   :  { %3568 = vmatprep.subr.mxu0 %v7290_v63  ;;  %3639 = vmatprep.subr.mxu1 %v7291_v13 }
 0xd55   :  { %3569 = vmatpush1.msra.mxu0 %v7292_v53  ;;  %3640 = vmatpush1.msra.mxu1 %v7293_v4  ;;  %v7303_v4 = vld [vmem:[#allocation27_spill] sm:$0xff] }
 0xd56   :  { %3570 = vmatprep.subr.mxu0 %v7294_v57  ;;  %3641 = vmatprep.subr.mxu1 %v7295_v62  ;;  %v7304_v57 = vld [vmem:[#allocation30_spill] sm:$0xff] }
 0xd57   :  { %3571 = vmatpush1.msra.mxu0 %v7296_v3  ;;  %3642 = vmatpush1.msra.mxu1 %v7297_v61  ;;  %v7305_v3 = vld [vmem:[#allocation77_spill] sm:$0xff] }
 0xd58   :  { %3572 = vmatprep.subr.mxu0 %v7298_v21  ;;  %3643 = vmatprep.subr.mxu1 %v7299_v1  ;;  %v7306_v21 = vld [vmem:[#allocation79_spill] sm:$0xff] }
 0xd59   :  { %3573 = vmatpush1.msra.mxu0 %v7300_v2  ;;  %3606 = vmatprep.mubr.f32.mxu0 %v7301_v46 }
 0xd5a   :  { %3644 = vmatpush1.msra.mxu1 %v7302_v45  ;;  %3677 = vmatprep.mubr.f32.mxu1 %v7301_v46 }
 0xd5b   :  { %3724 = vmatprep.subr.mxu0 %v7303_v4  ;;  %3795 = vmatprep.subr.mxu1 %v7304_v57 }
 0xdf9   :  { %v3426_v62 = vpop.f32.mrf.mxu0 }
 0xdfa   :  { %v3502_v53 = vadd.f32 %v3426_v62, %v7305_v3  ;;  %v3497_v1 = vpop.f32.mrf.mxu1 }
 0xdfb   :  { %v3428_v61 = vpop.f32.mrf.mxu0  ;;  %v3504_v46 = vadd.f32 %v3497_v1, %v7308_v56 }
 0xdfc   :  { %v4026_v13 = vmul.f32 -1.442695, %v3502_v53  ;;  %v3503_v63 = vadd.f32 %v3428_v61, %v7306_v21  ;;  %v3499_v31 = vpop.f32.mrf.mxu1 }
 0xdfd   :  { %v3505_v45 = vadd.f32 %v3499_v31, %v7307_v18 }
 0xdfe   :  { %4259 = vpow2.f32 %v4026_v13  ;;  %v4027_v2 = vmul.f32 -1.442695, %v3503_v63 }
 0xdff   :  { %v4028_v5 = vmul.f32 -1.442695, %v3505_v45 }
 0xe00   :  { %4261 = vpow2.f32 %v4027_v2 }
 0xe01   :  { %4263 = vtanh.f32 %v3504_v46 }
 0xe02   :  { %4265 = vpow2.f32 %v4028_v5 }
 0xe0b   :  { %v4260_v4 = vpop.eup %4259 }
 0xe0c   :  { %v3509_v0 = vadd.f32 1.0, %v4260_v4 }
 0xe0d   :  { %v4262_v57 = vpop.eup %4261 }
 0xe0e   :  { %4267 = vrcp.f32 %v3509_v0  ;;  %v3515_v62 = vadd.f32 1.0, %v4262_v57  ;;  %v4264_v53 = vpop.eup %4263 }
 0xe0f   :  { %v4266_v3 = vpop.eup %4265 }
 0xe10   :  { %4269 = vrcp.f32 %v3515_v62  ;;  %v3522_v21 = vadd.f32 1.0, %v4266_v3 }
 0xe12   :  { %4271 = vrcp.f32 %v3522_v21 }
 0xe1b   :  { %v4268_v13 = vpop.eup %4267 }
 0xe1c   :  { %v3526_v61 = vmul.f32 %v4268_v13, %v4264_v53 }
 0xe1d   :  { %v4270_v63 = vpop.eup %4269 }
 0xe1e   :  { %v3525_v2 = vmul.f32 %v4270_v63, %v6464_v36 }
 0xe1f   :  { %v4272_v45 = vpop.eup %4271 }
 0xe20   :  { %v6546_v18 = vadd.f32 %v3526_v61, %v3525_v2  ;;  %v3936_v2 = vpop.permute.xlu1 %3935 }
 0xe22   :  { %4273 = vtanh.f32 %v6546_v18 }
 0xe2f   :  { %v4274_v46 = vpop.eup %4273 }
 0xe30   :  { %v6549_v56 = vmul.f32 %v4274_v46, %v4272_v45  ;;  %v3925_v45 = vpop.permute.xlu1 %3924  ;;  %v7336_v46 = vld [vmem:[#allocation93_spill] sm:$0xff] }
 0xe32   :  { %3913 = vrot.lane.b32.xlu0 %v6549_v56, %s4549_s6  ;;  %3607 = vmatmul.mubr.f32.vlgmr.msra.gmra.mxu0 %v6549_v56 }
 0xe33   :  { %3678 = vmatmul.mubr.f32.vlgmr.msra.gmra.mxu1 %v6549_v56  ;;  %3725 = vmatpush1.msra.mxu0 %v6189_v16  ;;  %v7309_v16 = vld [vmem:[#allocation33_spill] sm:$0xff] }
 0xe34   :  { %3796 = vmatpush1.msra.mxu1 %v6192_v38  ;;  %3726 = vmatprep.subr.mxu0 %v6195_v40  ;;  %v7310_v38 = vld [vmem:[#allocation31_spill] sm:$0xff] }
 0xe35   :  { %3797 = vmatprep.subr.mxu1 %v6198_v12  ;;  %3727 = vmatpush1.msra.mxu0 %v6201_v41  ;;  %v7311_v40 = vld [vmem:[#allocation35_spill] sm:$0xff]  ;;  %v7312_v12 = vld [vmem:[#allocation34_spill] sm:$0xff] }
 0xe36   :  { %3798 = vmatpush1.msra.mxu1 %v6204_v49  ;;  %3728 = vmatprep.subr.mxu0 %v6207_v44  ;;  %v7313_v41 = vld [vmem:[#allocation22_spill] sm:$0xff]  ;;  %v7314_v49 = vld [vmem:[#allocation21_spill] sm:$0xff]  ;;  %v7315_v44 = vld [vmem:[#allocation24_spill] sm:$0xff] }
 0xe37   :  { %3799 = vmatprep.subr.mxu1 %v6210_v59  ;;  %3729 = vmatpush1.msra.mxu0 %v6213_v28  ;;  %v7316_v59 = vld [vmem:[#allocation23_spill] sm:$0xff]  ;;  %v7317_v28 = vld [vmem:[#allocation26_spill] sm:$0xff] }
 0xe38   :  { %3800 = vmatpush1.msra.mxu1 %v6216_v37  ;;  %3730 = vmatprep.subr.mxu0 %v6219_v58  ;;  %v7318_v37 = vld [vmem:[#allocation25_spill] sm:$0xff] }
 0xe39   :  { %3801 = vmatprep.subr.mxu1 %v6222_v8  ;;  %3731 = vmatpush1.msra.mxu0 %v6225_v6  ;;  %v7319_v58 = vld [vmem:[#allocation41_spill] sm:$0xff]  ;;  %v7320_v8 = vld [vmem:[#allocation40_spill] sm:$0xff]  ;;  %v7321_v6 = vld [vmem:[#allocation38_spill] sm:$0xff] }
 0xe3a   :  { %3802 = vmatpush1.msra.mxu1 %v6228_v51  ;;  %3732 = vmatprep.subr.mxu0 %v6231_v52  ;;  %v7322_v51 = vld [vmem:[#allocation37_spill] sm:$0xff]  ;;  %v7323_v52 = vld [vmem:[#allocation16_spill] sm:$0xff] }
 0xe3b   :  { %3803 = vmatprep.subr.mxu1 %v6234_v33  ;;  %3733 = vmatpush1.msra.mxu0 %v6237_v20  ;;  %v7324_v33 = vld [vmem:[#allocation42_spill] sm:$0xff]  ;;  %v7325_v20 = vmov 0.0  }
 0xe3c   :  { %3804 = vmatpush1.msra.mxu1 %v6240_v26  ;;  %3734 = vmatprep.subr.mxu0 %v6243_v27  ;;  %v7326_v26 = vld [vmem:[#allocation18_spill] sm:$0xff] }
 0xe3d   :  { %3805 = vmatprep.subr.mxu1 %v6246_v29  ;;  %3735 = vmatpush1.msra.mxu0 %v6249_v7  ;;  %v7327_v29 = vld [vmem:[#allocation29_spill] sm:$0xff] }
 0xe3e   :  { %3806 = vmatpush1.msra.mxu1 %v6252_v22  ;;  %3736 = vmatprep.subr.mxu0 %v6255_v23  ;;  %v7328_v22 = vld [vmem:[#allocation36_spill] sm:$0xff]  ;;  %v7329_v23 = vld [vmem:[#allocation66_spill] sm:$0xff] }
 0xe3f   :  { %3807 = vmatprep.subr.mxu1 %v6258_v15  ;;  %3737 = vmatpush1.msra.mxu0 %v6261_v17  ;;  %v1899_v15 = vadd.f32 %v7329_v23, %v7328_v22 }
 0xe40   :  { %3808 = vmatpush1.msra.mxu1 %v6264_v19  ;;  %3738 = vmatprep.subr.mxu0 %v6267_v14  ;;  %v7330_v19 = vld [vmem:[#allocation75_spill] sm:$0xff] }
 0xe41   :  { %3809 = vmatprep.subr.mxu1 %v6270_v55  ;;  %3739 = vmatpush1.msra.mxu0 %v6273_v34  ;;  %v3539_v14 = vadd.f32 %v7330_v19, %v1899_v15  ;;  %v7331_v55 = vld [vmem:[#allocation73_spill] sm:$0xff] }
 0xe42   :  { %3810 = vmatpush1.msra.mxu1 %v6276_v54  ;;  %3740 = vmatprep.subr.mxu0 %v6279_v9 }
 0xe43   :  { %3811 = vmatprep.subr.mxu1 %v6282_v11  ;;  %3741 = vmatpush1.msra.mxu0 %v6285_v30 }
 0xe44   :  { %3812 = vmatpush1.msra.mxu1 %v6288_v43  ;;  %3742 = vmatprep.subr.mxu0 %v6291_v32  ;;  %v7332_v32 = vld [vmem:[#allocation68_spill] sm:$0xff] }
 0xe45   :  { %3813 = vmatprep.subr.mxu1 %v6294_v25  ;;  %3743 = vmatpush1.msra.mxu0 %v6297_v39  ;;  %v7333_v25 = vld [vmem:[#allocation67_spill] sm:$0xff] }
 0xe46   :  { %3814 = vmatpush1.msra.mxu1 %v6300_v42  ;;  %3744 = vmatprep.subr.mxu0 %v6303_v50  ;;  %v2012_v39 = vadd.f32 %v7333_v25, %v7332_v32  ;;  %v7334_v50 = vld [vmem:[#allocation76_spill] sm:$0xff] }
 0xe47   :  { %3815 = vmatprep.subr.mxu1 %v6306_v47  ;;  %3745 = vmatpush1.msra.mxu0 %v6309_v48 }
 0xe48   :  { %3816 = vmatpush1.msra.mxu1 %v6312_v10  ;;  %3746 = vmatprep.subr.mxu0 %v6315_v60  ;;  %v3541_v47 = vadd.f32 %v7334_v50, %v2012_v39  ;;  %v7335_v10 = vld [vmem:[#allocation74_spill] sm:$0xff] }
 0xe49   :  { %3817 = vmatprep.subr.mxu1 %v6318_v35  ;;  %3747 = vmatpush1.msra.mxu0 %v6321_v24 }
 0xe4a   :  { %3818 = vmatpush1.msra.mxu1 %v7309_v16  ;;  %3748 = vmatprep.subr.mxu0 %v7310_v38  ;;  %v7337_v16 = vld [vmem:[#allocation39_spill] sm:$0xff] }
 0xe4b   :  { %3819 = vmatprep.subr.mxu1 %v7311_v40  ;;  %3749 = vmatpush1.msra.mxu0 %v7312_v12  ;;  %v7338_v40 = vld [vmem:[#allocation28_spill] sm:$0xff] }
 0xe4c   :  { %3820 = vmatpush1.msra.mxu1 %v7313_v41  ;;  %3750 = vmatprep.subr.mxu0 %v7314_v49 }
 0xe4d   :  { %3821 = vmatprep.subr.mxu1 %v7315_v44  ;;  %3751 = vmatpush1.msra.mxu0 %v7316_v59  ;;  %v7339_v59 = vld [vmem:[#allocation69_spill] sm:$0xff] }
 0xe4e   :  { %3822 = vmatpush1.msra.mxu1 %v7317_v28  ;;  %3752 = vmatprep.subr.mxu0 %v7318_v37 }
 0xe4f   :  { %3823 = vmatprep.subr.mxu1 %v7319_v58  ;;  %3753 = vmatpush1.msra.mxu0 %v7320_v8  ;;  %v7340_v8 = vld [vmem:[#allocation71_spill] sm:$0xff] }
 0xe50   :  { %3824 = vmatpush1.msra.mxu1 %v7321_v6  ;;  %3754 = vmatprep.subr.mxu0 %v7322_v51 }
 0xe51   :  { %3825 = vmatprep.subr.mxu1 %v7323_v52  ;;  %3755 = vmatpush1.msra.mxu0 %v7324_v33 }
 0xe52   :  { %3788 = vmatprep.mubr.f32.mxu0 %v7325_v20  ;;  %3826 = vmatpush1.msra.mxu1 %v7326_v26 }
 0xe53   :  { %3859 = vmatprep.mubr.f32.mxu1 %v7325_v20  ;;  %v7341_v20 = vld [vmem:[#allocation72_spill] sm:$0xff] }
 0xea4   :  { %v3914_v27 = vpop.permute.xlu0 %3913 }
 0xea5   :  { %v3916_v7 = vadd.f32 %v3914_v27, %v7327_v29  ;;  %v7342_v27 = vld [vmem:[#allocation70_spill] sm:$0xff] }
 0xea7   :  { %3918 = vrot.lane.b32.xlu1 %v3916_v7, %s4550_s9 }
 0xef2   :  { %v3608_v17 = vpop.f32.mrf.mxu0 }
 0xef3   :  { %v3684_v34 = vadd.f32 %v3608_v17, %v7331_v55  ;;  %v3679_v30 = vpop.f32.mrf.mxu1 }
 0xef4   :  { %v3610_v54 = vpop.f32.mrf.mxu0  ;;  %v3686_v60 = vadd.f32 %v3679_v30, %v7335_v10 }
 0xef5   :  { %v4029_v9 = vmul.f32 -1.442695, %v3684_v34  ;;  %v3685_v11 = vadd.f32 %v3610_v54, %v3539_v14  ;;  %v3681_v42 = vpop.f32.mrf.mxu1 }
 0xef6   :  { %v3687_v48 = vadd.f32 %v3681_v42, %v3541_v47  ;;  %v7343_v42 = vld [vmem:[#allocation32_spill] sm:$0xff]  ;;  %v3958_v47 = vpop.permute.xlu1 %3957 }
 0xef7   :  { %4275 = vpow2.f32 %v4029_v9  ;;  %v4030_v43 = vmul.f32 -1.442695, %v3685_v11  ;;  %v3938_v50 = vadd.f32 %v3936_v2, %v7343_v42 }
 0xef8   :  { %v4031_v35 = vmul.f32 -1.442695, %v3687_v48 }
 0xef9   :  { %4277 = vpow2.f32 %v4030_v43 }
 0xefa   :  { %4279 = vtanh.f32 %v3686_v60 }
 0xefb   :  { %4281 = vpow2.f32 %v4031_v35 }
 0xf04   :  { %v4276_v24 = vpop.eup %4275 }
 0xf05   :  { %v3691_v36 = vadd.f32 1.0, %v4276_v24 }
 0xf06   :  { %v4278_v0 = vpop.eup %4277 }
 0xf07   :  { %4283 = vrcp.f32 %v3691_v36  ;;  %v3697_v5 = vadd.f32 1.0, %v4278_v0  ;;  %v4280_v31 = vpop.eup %4279 }
 0xf08   :  { %v4282_v1 = vpop.eup %4281 }
 0xf09   :  { %4285 = vrcp.f32 %v3697_v5  ;;  %v3704_v53 = vadd.f32 1.0, %v4282_v1 }
 0xf0b   :  { %4287 = vrcp.f32 %v3704_v53 }
 0xf14   :  { %v4284_v4 = vpop.eup %4283 }
 0xf15   :  { %v3708_v57 = vmul.f32 %v4284_v4, %v4280_v31 }
 0xf16   :  { %v4286_v62 = vpop.eup %4285 }
 0xf17   :  { %v3707_v3 = vmul.f32 %v4286_v62, %v6546_v18  ;;  %v3927_v18 = vadd.f32 %v3925_v45, %v7337_v16 }
 0xf18   :  { %v4288_v61 = vpop.eup %4287 }
 0xf19   :  { %v3709_v13 = vadd.f32 %v3708_v57, %v3707_v3  ;;  %v3919_v60 = vpop.permute.xlu1 %3918 }
 0xf1b   :  { %4289 = vtanh.f32 %v3709_v13 }
 0xf28   :  { %v4290_v63 = vpop.eup %4289 }
 0xf29   :  { %v3711_v21 = vmul.f32 %v4290_v63, %v4288_v61 }
 0xf2b   :  { %3902 = vrot.lane.b32.xlu0 %v3711_v21, %s4549_s6  ;;  %3789 = vmatmul.mubr.f32.vlgmr.msra.gmra.mxu0 %v3711_v21  ;;  %v3960_v48 = vadd.f32 %v3958_v47, %v3711_v21 }
 0xf2c   :  { %3860 = vmatmul.mubr.f32.vlgmr.msra.gmra.mxu1 %v3711_v21 }
 0xf2f   :  { %3946 = vrot.lane.b32.xlu0 %v7327_v29, %s4549_s6 }
 0xf33   :  { %3968 = vrot.lane.b32.xlu0 %v7336_v46, %s4549_s6 }
 0xf37   :  { %3929 = vrot.lane.b32.xlu0 %v3927_v18, %s4551_s10 }
 0xf9d   :  { %v3903_v38 = vpop.permute.xlu0 %3902 }
 0xf9e   :  { %v3905_v12 = vadd.f32 %v3903_v38, %v7338_v40 }
 0xfa0   :  { %3907 = vrot.lane.b32.xlu0 %v3905_v12, %s4552_s11 }
 0xfa1   :  { %v3947_v41 = vpop.permute.xlu0 %3946 }
 0xfa2   :  { %v3949_v49 = vadd.f32 %v3947_v41, %v6549_v56 }
 0xfa4   :  { %3951 = vrot.lane.b32.xlu0 %v3949_v49, %s4553_s12 }
 0xfa5   :  { %v3969_v25 = vpop.permute.xlu0 %3968 }
 0xfa9   :  { %v3930_v10 = vpop.permute.xlu0 %3929 }
 0xfeb   :  { %v3790_v44 = vpop.f32.mrf.mxu0 }
 0xfec   :  { %v3866_v28 = vadd.f32 %v3790_v44, %v7339_v59  ;;  %v3861_v51 = vpop.f32.mrf.mxu1 }
 0xfed   :  { %v3792_v37 = vpop.f32.mrf.mxu0  ;;  %v3868_v29 = vadd.f32 %v3861_v51, %v7342_v27 }
 0xfee   :  { %v4032_v58 = vmul.f32 -1.442695, %v3866_v28  ;;  %v3867_v6 = vadd.f32 %v3792_v37, %v7340_v8  ;;  %v3863_v33 = vpop.f32.mrf.mxu1 }
 0xfef   :  { %v3869_v26 = vadd.f32 %v3863_v33, %v7341_v20 }
 0xff0   :  { %4291 = vpow2.f32 %v4032_v58  ;;  %v4033_v52 = vmul.f32 -1.442695, %v3867_v6 }
 0xff1   :  { %v4034_v7 = vmul.f32 -1.442695, %v3869_v26 }
 0xff2   :  { %4293 = vpow2.f32 %v4033_v52 }
 0xff3   :  { %4295 = vtanh.f32 %v3868_v29 }
 0xff4   :  { %4297 = vpow2.f32 %v4034_v7 }
 0xffd   :  { %v4292_v56 = vpop.eup %4291 }
 0xffe   :  { %v3873_v22 = vadd.f32 1.0, %v4292_v56 }
 0xfff   :  { %v4294_v23 = vpop.eup %4293 }
0x1000   :  { %4299 = vrcp.f32 %v3873_v22  ;;  %v3879_v15 = vadd.f32 1.0, %v4294_v23  ;;  %v4296_v17 = vpop.eup %4295 }
0x1001   :  { %v4298_v19 = vpop.eup %4297 }
0x1002   :  { %4301 = vrcp.f32 %v3879_v15  ;;  %v3886_v54 = vadd.f32 1.0, %v4298_v19 }
0x1004   :  { %4303 = vrcp.f32 %v3886_v54 }
0x100d   :  { %v4300_v14 = vpop.eup %4299 }
0x100e   :  { %v3890_v55 = vmul.f32 %v4300_v14, %v4296_v17 }
0x100f   :  { %v4302_v34 = vpop.eup %4301 }
0x1010   :  { %v3889_v9 = vmul.f32 %v4302_v34, %v3709_v13 }
0x1011   :  { %v4304_v30 = vpop.eup %4303 }
0x1012   :  { %v3891_v11 = vadd.f32 %v3890_v55, %v3889_v9  ;;  %v3908_v35 = vpop.permute.xlu0 %3907 }
0x1014   :  { %4305 = vtanh.f32 %v3891_v11 }
0x1016   :  { %v3952_v5 = vpop.permute.xlu0 %3951 }
0x1021   :  { %v4306_v43 = vpop.eup %4305 }
0x1022   :  { %v3893_v32 = vmul.f32 %v4306_v43, %v4304_v30 }
0x1024   :  { %3895 = vrot.lane.b32.xlu1 %v3893_v32, %s4549_s6  ;;  %v3971_v39 = vadd.f32 %v3969_v25, %v3893_v32 }
0x1026   :  { %3973 = vrot.lane.b32.xlu0 %v3971_v39, %s4554_s13 }
0x1028   :  { %3940 = vrot.lane.b32.xlu1 %v3938_v50, %s4555_s14 }
0x102c   :  { %3962 = vrot.lane.b32.xlu1 %v3960_v48, %s4556_s15 }
0x1096   :  { %v3896_v24 = vpop.permute.xlu1 %3895 }
0x1097   :  { %v3898_v36 = vadd.f32 %v3896_v24, %v7336_v46 }
0x1098   :  { %v3974_v1 = vpop.permute.xlu0 %3973 }
0x1099   :  { %3900 = vst.msk [vmem:[%s6676_s8] sm:$0xff] %vm3899_vm1, %v3898_v36 }
0x109a   :  { %3911 = vst.msk [vmem:[%s6676_s8] sm:$0xff] %vm3910_vm2, %v3908_v35  ;;  %v3941_v0 = vpop.permute.xlu1 %3940 }
0x109b   :  { %3922 = vst.msk [vmem:[%s6676_s8] sm:$0xff] %vm3921_vm3, %v3919_v60 }
0x109c   :  { %3933 = vst.msk [vmem:[%s6676_s8] sm:$0xff] %vm3932_vm4, %v3930_v10 }
0x109d   :  { %3944 = vst.msk [vmem:[%s6676_s8] sm:$0xff] %vm3943_vm5, %v3941_v0 }
0x109e   :  { %3955 = vst.msk [vmem:[%s6676_s8] sm:$0xff] %vm3954_vm6, %v3952_v5  ;;  %v3963_v31 = vpop.permute.xlu1 %3962 }
0x109f   :  { %3966 = vst.msk [vmem:[%s6676_s8] sm:$0xff] %vm3965_vm7, %v3963_v31 }
0x10a0   :  { %3977 = vst.msk [vmem:[%s6676_s8] sm:$0xff] %vm3976_vm8, %v3974_v1 }
0x10a1   :  { %3982 = vsyncpa [#allocation6], 1 }
0x10a2   :  { %3983 = vsyncpa [#allocation8], 1 }
0x10a3   :  { %3984 = vsyncpa [#allocation11], 1 }

</bundles_post_ra>
